<compile_context>
chip_gen: v5e
topology: v5e:2x2
jax: 0.10.0
libtpu: 0.0.40
codegen_flags: <defaults>
</compile_context>

<pallas_src>
import math
from functools import partial

import jax
import jax.numpy as jnp
from jax import lax
from jax.experimental import pallas as pl
from jax.experimental.pallas import tpu as pltpu


_MM_DTYPES = {"float32": jnp.float32, "bfloat16": jnp.bfloat16}


def _choose_frames_per_step(n, pref):
    # Largest divisor of n that is <= pref.  Pick pref so that grid = n // F stays a
    # multiple of 2 on v7x (the "parallel" frame axis is sharded across 2 TensorCores).
    for f in range(min(pref, n), 0, -1):
        if n % f == 0:
            return f
    return 1


# ----------------------------------------------------------------------------
# Kernel 1: fused ViT (F frames per grid step)
# ----------------------------------------------------------------------------
def _vit_kernel(patches_ref, base_ref, amask_ref, hmask_ref, csel_ref,
                fc1_w_ref, fc1_b_ref, wqkv_ref, bqkv_ref, wo_ref,
                w1_ref, b1_ref, w2_ref, small_ref, encln_ref,
                fc2_w_ref, fc2_b_ref, out_ref,
                *, num_layers, nhead, eps, mm_dtype):
    emb = base_ref.shape[-1]
    dh = emb // nhead
    scale = 1.0 / math.sqrt(dh)

    def mm(a, b):                                 # MXU matmul, f32 accumulation
        return jnp.dot(a.astype(mm_dtype), b.astype(mm_dtype),
                       preferred_element_type=jnp.float32)

    def mm_t(a, b):                               # a [m,d] . b[n,d]^T -> [m,n]
        return lax.dot_general(a.astype(mm_dtype), b.astype(mm_dtype),
                               dimension_numbers=(((1,), (1,)), ((), ())),
                               preferred_element_type=jnp.float32)

    def layernorm(v, g, b):
        mu = jnp.mean(v, axis=-1, keepdims=True)
        var = jnp.mean((v - mu) ** 2, axis=-1, keepdims=True)
        return (v - mu) * lax.rsqrt(var + eps) * g + b

    amask = amask_ref[...]                        # [R,R] block-diag additive mask (0/-1e30)
    hmask = hmask_ref[...]                        # [nhead, E] per-head lane masks
    encln = encln_ref[...]                        # [2, E]

    # Patch embedding (fc1 + ReLU) on the whole [F*T, flat] frame slab.  Class-token,
    # positional encoding, and zero-row (class-slot / pad-row) corrections are all
    # pre-folded into base_ref, so no per-step iota/mask work is needed here.
    x = base_ref[...] + jnp.maximum(
        mm(patches_ref[...], fc1_w_ref[...]) + fc1_b_ref[...], 0.0)       # [R, E]

    for l in range(num_layers):
        sp = small_ref[l]                         # [6, E]: bo, n1g, n1b, b2, n2g, n2b
        # fused q/k/v projection (one N=3E matmul instead of three N=E matmuls)
        qkv = mm(x, wqkv_ref[l]) + bqkv_ref[l]                            # [R, 3E]
        q = qkv[:, 0:emb]
        k = qkv[:, emb:2 * emb]
        v = qkv[:, 2 * emb:3 * emb]
        attn = jnp.zeros_like(x)
        for h in range(nhead):
            hm = hmask[h:h + 1, :]                # restrict contraction to head h lanes
            s = mm_t(q, k * hm) * scale + amask   # block-diag mask => per-frame attention
            s = s - jnp.max(s, axis=-1, keepdims=True)
            e = jnp.exp(s)
            p = e * pl.reciprocal(jnp.sum(e, axis=-1, keepdims=True), approx=True)
            attn = attn + mm(p, v * hm)
        a = mm(attn, wo_ref[l]) + sp[0:1, :]
        x = layernorm(x + a, sp[1:2, :], sp[2:3, :])
        ff = jnp.maximum(mm(x, w1_ref[l]) + b1_ref[l], 0.0)
        ff = mm(ff, w2_ref[l]) + sp[3:4, :]
        x = layernorm(x + ff, sp[4:5, :], sp[5:6, :])

    # final encoder LayerNorm, class-token gather (via a tiny selection matmul: keeps the
    # VPU/XLU free), fc2 + ReLU written lane-dense (pad columns are exactly 0).
    x = layernorm(x, encln[0:1, :], encln[1:2, :])
    cls = mm(csel_ref[...], x)                                            # [F, E]
    out = jnp.maximum(mm(cls, fc2_w_ref[...]) + fc2_b_ref[...], 0.0)      # [F, D_PAD]
    out_ref[0] = out.astype(out_ref.dtype)


def vit_forward(frames, params, cfg):
    # frames: [N, C, H, W] -> [N, D_PAD]  (first d_emb columns meaningful, rest zero)
    n, c, h, w = frames.shape
    sh, sw = cfg["split"]
    ph, pw = h // sh, w // sw
    p_tok = sh * sw
    s_tok = p_tok + 1
    t_pad = -(-s_tok // 8) * 8                   # tokens per frame, padded to sublane tile
    flat = ph * pw * c
    emb = cfg["d_emb"]
    nhead = cfg["nhead"]
    nl = cfg["num_layer"]
    ffn = cfg["dim_feedforward"]
    dp = cfg["d_out_pad"]
    dh = emb // nhead
    mmdt = _MM_DTYPES[cfg.get("matmul_dtype", "float32")]
    v = params["vit"]

    f_per = _choose_frames_per_step(n, cfg.get("frames_per_step", 4))
    grid = n // f_per
    rows = f_per * t_pad                         # slab rows per grid step

    # 'b c (sh h) (sw w) -> b (sh sw) (h w c)'; row 0 = class slot, rows >= s_tok = pad.
    xp = frames.reshape(n, c, sh, ph, sw, pw)
    xp = jnp.transpose(xp, (0, 2, 4, 3, 5, 1)).reshape(n, p_tok, flat)
    patches = jnp.zeros((n, t_pad, flat), jnp.float32).at[:, 1:s_tok, :].set(xp)
    patches2d = patches.reshape(n * t_pad, flat).astype(mmdt)

    # ---- precomputed constants (hoisted out of the kernel body) -----------------
    # base slab: pos.enc + class token, minus relu(fc1_b) on rows whose patch input is
    # all-zero (class slot + pad rows) so x = base + relu(fc1(patch)) is exact everywhere.
    relu_b = jnp.maximum(v["fc1_b"][0], 0.0)                              # [E]
    zero_row = jnp.array([1.0] + [0.0] * (s_tok - 1) + [1.0] * (t_pad - s_tok),
                         jnp.float32)[:, None]
    base_frame = jnp.zeros((t_pad, emb), jnp.float32).at[:s_tok, :].set(v["base_tok"])
    base_frame = base_frame - zero_row * relu_b[None, :]
    base_slab = jnp.tile(base_frame, (f_per, 1))                          # [rows, E]

    fid = jnp.repeat(jnp.arange(f_per), t_pad)                            # frame id per row
    real = jnp.tile(jnp.arange(t_pad) < s_tok, (f_per,))                  # real-token rows
    allowed = (fid[:, None] == fid[None, :]) & real[None, :]
    attn_mask = jnp.where(allowed, 0.0, -1e30).astype(jnp.float32)        # [rows, rows]

    head_mask = ((jnp.arange(emb)[None, :] // dh)
                 == jnp.arange(nhead)[:, None]).astype(jnp.float32)       # [nhead, E]
    cls_sel = (jnp.arange(rows)[None, :]
               == (jnp.arange(f_per) * t_pad)[:, None]).astype(jnp.float32)  # [F, rows]

    # fc2 lane-padded to 128 (pad cols weight=0, bias=0 -> ReLU keeps them exactly 0)
    fc2_w = jnp.zeros((emb, dp), jnp.float32).at[:, :emb].set(v["fc2_w"])
    fc2_b = jnp.zeros((1, dp), jnp.float32).at[:, :emb].set(v["fc2_b"])

    weights = (base_slab, attn_mask, head_mask, cls_sel,
               v["fc1_w"].astype(mmdt), v["fc1_b"],
               v["wqkv"].astype(mmdt), v["bqkv"],
               v["wo"].astype(mmdt),
               v["w1"].astype(mmdt), v["b1"], v["w2"].astype(mmdt),
               v["small"], v["enc_ln"],
               fc2_w.astype(mmdt), fc2_b)

    # VMEM guard for the weight-resident design (toy sizes only).
    resident = sum(int(a.size) * a.dtype.itemsize for a in weights)
    assert resident < 32 * 1024 * 1024, "stream per-layer weights before scaling up"

    def const_spec(a):
        nd = a.ndim
        return pl.BlockSpec(a.shape, lambda *_: (0,) * nd)   # resident across the grid

    in_specs = [pl.BlockSpec((rows, flat), lambda i: (i, 0))]
    in_specs += [const_spec(a) for a in weights]

    # advisory cost estimate so XLA schedules the wrapper reshapes sensibly
    rows_total = n * t_pad
    flops = 2 * rows_total * flat * emb
    flops += nl * 2 * rows_total * emb * (3 * emb + emb + 2 * ffn)
    flops += nl * nhead * 4 * rows_total * rows * emb
    flops += 2 * n * rows * emb + 2 * n * emb * dp
    trans = nl * nhead * grid * rows * rows + rows_total * (2 * nl + 1)
    bytes_acc = (int(patches2d.size) * patches2d.dtype.itemsize + resident
                 + grid * f_per * dp * 4)

    kern = partial(_vit_kernel, num_layers=nl, nhead=nhead, eps=cfg["eps"],
                   mm_dtype=mmdt)
    out = pl.pallas_call(
        kern,
        out_shape=jax.ShapeDtypeStruct((grid, f_per, dp), jnp.float32),
        grid=(grid,),
        in_specs=in_specs,
        out_specs=pl.BlockSpec((1, f_per, dp), lambda i: (i, 0, 0)),
        compiler_params=pltpu.CompilerParams(dimension_semantics=("parallel",)),
        cost_estimate=pl.CostEstimate(flops=int(flops), transcendentals=int(trans),
                                      bytes_accessed=int(bytes_acc)),
    )(patches2d, *weights)
    return out.reshape(n, dp)


# ----------------------------------------------------------------------------
# Kernel 2: fused multi-layer LSTM + classifier head
# ----------------------------------------------------------------------------
def _lstm_head_kernel(x_ref, w_ih0_ref, w_ihr_ref, w_hh_ref, b_ref, h0_ref, c0_ref,
                      fc_w_ref, fc_b_ref, out_ref,
                      *, num_layers, hidden, seq, batch, mm_dtype):
    def mm(a, b):
        return jnp.dot(a.astype(mm_dtype), b.astype(mm_dtype),
                       preferred_element_type=jnp.float32)

    x = x_ref[...]                               # [seq*batch, D_PAD] time-major, layer-0 input
    h = None
    for l in range(num_layers):
        w_ih = w_ih0_ref[...] if l == 0 else w_ihr_ref[l - 1]   # layers>0: unpadded [H,4H]
        w_hh = w_hh_ref[l]
        b = b_ref[l]
        # input projection hoisted out of the recurrence: one lane-dense matmul
        zx = mm(x, w_ih) + b                                            # [S*B, 4H]
        h = jnp.broadcast_to(h0_ref[l], (batch, hidden)).astype(jnp.float32)
        c = jnp.broadcast_to(c0_ref[l], (batch, hidden)).astype(jnp.float32)
        hs = []
        for t in range(seq):                     # fully unrolled; state stays in registers
            z = zx[t * batch:(t + 1) * batch, :] + mm(h, w_hh)          # [B, 4H]
            i = jax.nn.sigmoid(z[:, 0 * hidden:1 * hidden])
            f = jax.nn.sigmoid(z[:, 1 * hidden:2 * hidden])
            g = jnp.tanh(z[:, 2 * hidden:3 * hidden])
            o = jax.nn.sigmoid(z[:, 3 * hidden:4 * hidden])
            c = f * c + i * g
            h = o * jnp.tanh(c)
            hs.append(h)
        if l + 1 < num_layers:
            x = jnp.concatenate(hs, axis=0)      # next-layer input in registers (no scratch)

    # classifier: Linear -> Softmax, lane-dense 128-wide output.  Pad-lane logits are
    # -1e30 (from fc_b padding) so exp underflows to 0 and pad probabilities are exactly 0.
    logits = mm(h, fc_w_ref[...]) + fc_b_ref[...]
    logits = logits - jnp.max(logits, axis=-1, keepdims=True)
    e = jnp.exp(logits)
    out_ref[...] = (e / jnp.sum(e, axis=-1, keepdims=True)).astype(out_ref.dtype)


def lstm_head_forward(x2d, lp, cfg, batch):
    # x2d: [seq*batch, D_PAD] -> [batch, d_model]
    hidden = cfg["lstm_hidden"]
    n_layers = cfg["lstm_num_layers"]
    d_model = cfg["d_model"]
    dp = cfg["d_out_pad"]
    seq = x2d.shape[0] // batch
    mmdt = _MM_DTYPES[cfg.get("matmul_dtype", "float32")]

    # layer-0 input is the 128-lane-padded ViT slab -> pad w_ih0 rows with zeros (exact).
    in0 = lp["w_ih0"].shape[0]
    w_ih0 = jnp.zeros((dp, 4 * hidden), jnp.float32).at[:in0, :].set(lp["w_ih0"])
    # lane-dense classifier: zero weight pad columns, -1e30 bias pad columns.
    fc_w = jnp.zeros((hidden, dp), jnp.float32).at[:, :d_model].set(lp["fc_w"])
    fc_b = jnp.full((1, dp), -1e30, jnp.float32).at[:, :d_model].set(lp["fc_b"])

    args = (x2d, w_ih0.astype(mmdt), lp["w_ihr"].astype(mmdt), lp["w_hh"].astype(mmdt),
            lp["b"], lp["h0"], lp["c0"], fc_w.astype(mmdt), fc_b)

    def const_spec(a):
        nd = a.ndim
        return pl.BlockSpec(a.shape, lambda *_: (0,) * nd)

    flops = 2 * seq * batch * dp * 4 * hidden
    flops += (n_layers - 1) * 2 * seq * batch * hidden * 4 * hidden
    flops += n_layers * seq * 2 * batch * hidden * 4 * hidden
    flops += 2 * batch * hidden * dp
    trans = n_layers * seq * batch * 4 * hidden + batch * dp
    bytes_acc = sum(int(a.size) * a.dtype.itemsize for a in args) + batch * dp * 4

    kern = partial(_lstm_head_kernel, num_layers=n_layers, hidden=hidden,
                   seq=seq, batch=batch, mm_dtype=mmdt)
    out = pl.pallas_call(
        kern,
        out_shape=jax.ShapeDtypeStruct((batch, dp), jnp.float32),
        grid=(1,),
        in_specs=[const_spec(a) for a in args],
        out_specs=pl.BlockSpec((batch, dp), lambda i: (0, 0)),
        compiler_params=pltpu.CompilerParams(dimension_semantics=("arbitrary",)),
        cost_estimate=pl.CostEstimate(flops=int(flops), transcendentals=int(trans),
                                      bytes_accessed=int(bytes_acc)),
    )(*args)
    return out[:, :d_model]


# ----------------------------------------------------------------------------
# Model glue
# ----------------------------------------------------------------------------
def vstm_forward(x, params, cfg):
    # x: [seq, batch, C, H, W] -> [batch, d_model] softmax probabilities
    s, b = x.shape[0], x.shape[1]
    frames = x.reshape((s * b,) + x.shape[2:])
    emb = vit_forward(frames, params, cfg)                 # [(s*b), D_PAD], time-major
    out = lstm_head_forward(emb, params["lstm"], cfg, batch=b)
    return out.astype(x.dtype)


def positional_encoding(d_model, length):
    position = jnp.arange(length, dtype=jnp.float32)[:, None]
    div_term = jnp.exp(jnp.arange(0, d_model, 2, dtype=jnp.float32)
                       * (-math.log(10000.0) / d_model))
    pe = jnp.zeros((length, d_model), jnp.float32)
    pe = pe.at[:, 0::2].set(jnp.sin(position * div_term))
    pe = pe.at[:, 1::2].set(jnp.cos(position * div_term))
    return pe


# ----------------------------------------------------------------------------
# Deterministic parameter initialization (shapes follow the PyTorch __init__;
# q/k/v are stored pre-fused, small per-layer vectors are packed into one array)
# ----------------------------------------------------------------------------
def init_params(key, cfg):
    d_emb = cfg["d_emb"]
    d_model = cfg["d_model"]
    ffn = cfg["dim_feedforward"]
    hidden = cfg["lstm_hidden"]
    n_lstm = cfg["lstm_num_layers"]
    nl = cfg["num_layer"]
    c, h, w = cfg["img_size"]
    sh, sw = cfg["split"]
    flat = (h // sh) * (w // sw) * c
    s_tok = sh * sw + 1

    keys = iter(jax.random.split(key, 64))

    def dense(shape, scale=0.05):
        return scale * jax.random.normal(next(keys), shape, jnp.float32)

    # class token + positional encoding, folded together once at init
    class_emb = jax.random.uniform(next(keys), (d_emb,), jnp.float32)
    base_tok = positional_encoding(d_emb, s_tok).at[0, :].add(class_emb)

    # packed per-layer vectors: rows = (bo, norm1_g, norm1_b, b2, norm2_g, norm2_b)
    small = jnp.concatenate([
        dense((nl, 1, d_emb)),
        jnp.ones((nl, 1, d_emb), jnp.float32),
        jnp.zeros((nl, 1, d_emb), jnp.float32),
        dense((nl, 1, d_emb)),
        jnp.ones((nl, 1, d_emb), jnp.float32),
        jnp.zeros((nl, 1, d_emb), jnp.float32),
    ], axis=1)

    vit = dict(
        base_tok=base_tok,
        fc1_w=dense((flat, d_emb)), fc1_b=dense((1, d_emb)),
        wqkv=dense((nl, d_emb, 3 * d_emb)),          # fused q/k/v projection
        bqkv=dense((nl, 1, 3 * d_emb)),
        wo=dense((nl, d_emb, d_emb)),
        w1=dense((nl, d_emb, ffn)), b1=dense((nl, 1, ffn)),
        w2=dense((nl, ffn, d_emb)),
        small=small,
        enc_ln=jnp.concatenate([jnp.ones((1, d_emb), jnp.float32),
                                jnp.zeros((1, d_emb), jnp.float32)], axis=0),
        fc2_w=dense((d_emb, d_emb)),                 # ViT(d_emb, d_emb, ...) -> fc2: E -> E
        fc2_b=dense((1, d_emb)),
    )

    # LSTM weights, gate order (i, f, g, o); b = b_ih + b_hh combined.
    lstm = dict(
        w_ih0=dense((d_emb, 4 * hidden)),                          # layer-0 input proj
        w_ihr=dense((max(1, n_lstm - 1), hidden, 4 * hidden)),     # layers > 0 (unpadded)
        w_hh=dense((n_lstm, hidden, 4 * hidden)),
        b=dense((n_lstm, 1, 4 * hidden)) + dense((n_lstm, 1, 4 * hidden)),
        h0=jnp.zeros((n_lstm, 1, hidden), jnp.float32),
        c0=jnp.zeros((n_lstm, 1, hidden), jnp.float32),
        fc_w=dense((hidden, d_model)),
        fc_b=dense((1, d_model)),
    )
    return dict(vit=vit, lstm=lstm)


# ----------------------------------------------------------------------------
if __name__ == "__main__":
    cfg = dict(
        d_model=8,             # number of output categories
        d_emb=32,
        img_size=(3, 16, 16),
        split=(2, 2),
        nhead=4,
        num_layer=2,
        dim_feedforward=64,
        lstm_hidden=32,
        lstm_num_layers=2,
        eps=1e-5,
        d_out_pad=128,         # lane-dense padding for the ViT->LSTM slab and the head
        frames_per_step=4,     # 8 frames / 4 => grid=(2,) -> even split across v7x TCs
        matmul_dtype="bfloat16",
    )

    key = jax.random.PRNGKey(0)
    pkey, xkey = jax.random.split(key)
    params = init_params(pkey, cfg)

    # x: [sequence, batch, channel, height, width]
    x = jax.random.normal(xkey, (4, 2, 3, 16, 16), jnp.float32)

    fwd = jax.jit(lambda xx, pp: vstm_forward(xx, pp, cfg))
    out = jax.block_until_ready(fwd(x, params))

    assert out.shape == (2, cfg["d_model"]), out.shape
    assert out.dtype == x.dtype
    # softmax rows sum to 1 (exact divide in the classifier)
    assert jnp.allclose(jnp.sum(out, axis=-1), 1.0, atol=1e-3)

    # tolerance check of the bf16-MXU path against the float32-matmul path
    cfg_f32 = dict(cfg, matmul_dtype="float32")
    fwd_f32 = jax.jit(lambda xx, pp: vstm_forward(xx, pp, cfg_f32))
    out_f32 = jax.block_until_ready(fwd_f32(x, params))
    assert float(jnp.max(jnp.abs(out - out_f32))) < 5e-2

    print("KERNEL_OK")
</pallas_src>

<mosaic_0001>
module attributes {stable_mosaic.version = 11 : i64} {
  func.func @_vit_kernel(%arg0: i32, %arg1: memref<32x192xbf16, #tpu.memory_space<vmem>>, %arg2: memref<32x32xf32, #tpu.memory_space<vmem>>, %arg3: memref<32x32xf32, #tpu.memory_space<vmem>>, %arg4: memref<4x32xf32, #tpu.memory_space<vmem>>, %arg5: memref<4x32xf32, #tpu.memory_space<vmem>>, %arg6: memref<192x32xbf16, #tpu.memory_space<vmem>>, %arg7: memref<1x32xf32, #tpu.memory_space<vmem>>, %arg8: memref<2x32x96xbf16, #tpu.memory_space<vmem>>, %arg9: memref<2x1x96xf32, #tpu.memory_space<vmem>>, %arg10: memref<2x32x32xbf16, #tpu.memory_space<vmem>>, %arg11: memref<2x32x64xbf16, #tpu.memory_space<vmem>>, %arg12: memref<2x1x64xf32, #tpu.memory_space<vmem>>, %arg13: memref<2x64x32xbf16, #tpu.memory_space<vmem>>, %arg14: memref<2x6x32xf32, #tpu.memory_space<vmem>>, %arg15: memref<2x32xf32, #tpu.memory_space<vmem>>, %arg16: memref<32x128xbf16, #tpu.memory_space<vmem>>, %arg17: memref<1x128xf32, #tpu.memory_space<vmem>>, %arg18: memref<1x4x128xf32, #tpu.memory_space<vmem>>) attributes {dimension_semantics = [#tpu.dimension_semantics<parallel>], iteration_bounds = array<i64: 2>, scalar_prefetch = 0 : i64, scratch_operands = 0 : i64, tpu.core_type = #tpu.core_type<tc>, window_params = [{transform_indices = @transform_0, window_bounds = array<i64: 32, 192>}, {pipeline_mode = #tpu.pipeline_mode<synchronous>, transform_indices = @transform_1, window_bounds = array<i64: 32, 32>}, {pipeline_mode = #tpu.pipeline_mode<synchronous>, transform_indices = @transform_2, window_bounds = array<i64: 32, 32>}, {pipeline_mode = #tpu.pipeline_mode<synchronous>, transform_indices = @transform_3, window_bounds = array<i64: 4, 32>}, {pipeline_mode = #tpu.pipeline_mode<synchronous>, transform_indices = @transform_4, window_bounds = array<i64: 4, 32>}, {pipeline_mode = #tpu.pipeline_mode<synchronous>, transform_indices = @transform_5, window_bounds = array<i64: 192, 32>}, {pipeline_mode = #tpu.pipeline_mode<synchronous>, transform_indices = @transform_6, window_bounds = array<i64: 1, 32>}, {pipeline_mode = #tpu.pipeline_mode<synchronous>, transform_indices = @transform_7, window_bounds = array<i64: 2, 32, 96>}, {pipeline_mode = #tpu.pipeline_mode<synchronous>, transform_indices = @transform_8, window_bounds = array<i64: 2, 1, 96>}, {pipeline_mode = #tpu.pipeline_mode<synchronous>, transform_indices = @transform_9, window_bounds = array<i64: 2, 32, 32>}, {pipeline_mode = #tpu.pipeline_mode<synchronous>, transform_indices = @transform_10, window_bounds = array<i64: 2, 32, 64>}, {pipeline_mode = #tpu.pipeline_mode<synchronous>, transform_indices = @transform_11, window_bounds = array<i64: 2, 1, 64>}, {pipeline_mode = #tpu.pipeline_mode<synchronous>, transform_indices = @transform_12, window_bounds = array<i64: 2, 64, 32>}, {pipeline_mode = #tpu.pipeline_mode<synchronous>, transform_indices = @transform_13, window_bounds = array<i64: 2, 6, 32>}, {pipeline_mode = #tpu.pipeline_mode<synchronous>, transform_indices = @transform_14, window_bounds = array<i64: 2, 32>}, {pipeline_mode = #tpu.pipeline_mode<synchronous>, transform_indices = @transform_15, window_bounds = array<i64: 32, 128>}, {pipeline_mode = #tpu.pipeline_mode<synchronous>, transform_indices = @transform_16, window_bounds = array<i64: 1, 128>}, {transform_indices = @transform_17, window_bounds = array<i64: 1, 4, 128>}]} {
    %c0 = arith.constant 0 : index
    %c0_0 = arith.constant 0 : index
    %0 = vector.load %arg3[%c0, %c0_0] : memref<32x32xf32, #tpu.memory_space<vmem>>, vector<32x32xf32>
    %c0_1 = arith.constant 0 : index
    %c0_2 = arith.constant 0 : index
    %1 = vector.load %arg4[%c0_1, %c0_2] : memref<4x32xf32, #tpu.memory_space<vmem>>, vector<4x32xf32>
    %c0_3 = arith.constant 0 : index
    %c0_4 = arith.constant 0 : index
    %2 = vector.load %arg15[%c0_3, %c0_4] : memref<2x32xf32, #tpu.memory_space<vmem>>, vector<2x32xf32>
    %c0_5 = arith.constant 0 : index
    %c0_6 = arith.constant 0 : index
    %3 = vector.load %arg2[%c0_5, %c0_6] : memref<32x32xf32, #tpu.memory_space<vmem>>, vector<32x32xf32>
    %c0_7 = arith.constant 0 : index
    %c0_8 = arith.constant 0 : index
    %4 = vector.load %arg1[%c0_7, %c0_8] : memref<32x192xbf16, #tpu.memory_space<vmem>>, vector<32x192xbf16>
    %c0_9 = arith.constant 0 : index
    %c0_10 = arith.constant 0 : index
    %5 = vector.load %arg6[%c0_9, %c0_10] : memref<192x32xbf16, #tpu.memory_space<vmem>>, vector<192x32xbf16>
    %cst = arith.constant dense<0.000000e+00> : vector<32x32xf32>
    %6 = tpu.matmul %4, %5, %cst {dimension_numbers = #tpu.dot_dimension_numbers<[1], [0], [0], [1], [0, 0, 1, 1], [], []>} : vector<32x192xbf16>, vector<192x32xbf16>, vector<32x32xf32> -> vector<32x32xf32>
    %c0_11 = arith.constant 0 : index
    %c0_12 = arith.constant 0 : index
    %7 = vector.load %arg7[%c0_11, %c0_12] : memref<1x32xf32, #tpu.memory_space<vmem>>, vector<1x32xf32>
    %8 = vector.broadcast %7 : vector<1x32xf32> to vector<32x32xf32>
    %9 = arith.addf %6, %8 : vector<32x32xf32>
    %cst_13 = arith.constant 0.000000e+00 : f32
    %10 = vector.broadcast %cst_13 : f32 to vector<32x32xf32>
    %11 = arith.maximumf %9, %10 : vector<32x32xf32>
    %12 = arith.addf %3, %11 : vector<32x32xf32>
    %c0_14 = arith.constant 0 : index
    %c0_15 = arith.constant 0 : index
    %c0_16 = arith.constant 0 : index
    %13 = vector.load %arg14[%c0_14, %c0_15, %c0_16] : memref<2x6x32xf32, #tpu.memory_space<vmem>>, vector<1x6x32xf32>
    %14 = vector.shape_cast %13 : vector<1x6x32xf32> to vector<6x32xf32>
    %c0_17 = arith.constant 0 : index
    %c0_18 = arith.constant 0 : index
    %c0_19 = arith.constant 0 : index
    %15 = vector.load %arg8[%c0_17, %c0_18, %c0_19] : memref<2x32x96xbf16, #tpu.memory_space<vmem>>, vector<1x32x96xbf16>
    %16 = vector.shape_cast %15 : vector<1x32x96xbf16> to vector<32x96xbf16>
    %17 = arith.truncf %12 : vector<32x32xf32> to vector<32x32xbf16>
    %cst_20 = arith.constant dense<0.000000e+00> : vector<32x96xf32>
    %18 = tpu.matmul %17, %16, %cst_20 {dimension_numbers = #tpu.dot_dimension_numbers<[1], [0], [0], [1], [0, 0, 1, 1], [], []>} : vector<32x32xbf16>, vector<32x96xbf16>, vector<32x96xf32> -> vector<32x96xf32>
    %c0_21 = arith.constant 0 : index
    %c0_22 = arith.constant 0 : index
    %c0_23 = arith.constant 0 : index
    %19 = vector.load %arg9[%c0_21, %c0_22, %c0_23] : memref<2x1x96xf32, #tpu.memory_space<vmem>>, vector<1x1x96xf32>
    %20 = vector.shape_cast %19 : vector<1x1x96xf32> to vector<1x96xf32>
    %21 = vector.broadcast %20 : vector<1x96xf32> to vector<32x96xf32>
    %22 = arith.addf %18, %21 : vector<32x96xf32>
    %23 = vector.extract_strided_slice %22 {offsets = [0, 0], sizes = [32, 32], strides = [1, 1]} : vector<32x96xf32> to vector<32x32xf32>
    %24 = vector.extract_strided_slice %22 {offsets = [0, 32], sizes = [32, 32], strides = [1, 1]} : vector<32x96xf32> to vector<32x32xf32>
    %25 = vector.extract_strided_slice %22 {offsets = [0, 64], sizes = [32, 32], strides = [1, 1]} : vector<32x96xf32> to vector<32x32xf32>
    %cst_24 = arith.constant 0.000000e+00 : f32
    %26 = vector.broadcast %cst_24 : f32 to vector<32x32xf32>
    %27 = vector.extract_strided_slice %1 {offsets = [0, 0], sizes = [1, 32], strides = [1, 1]} : vector<4x32xf32> to vector<1x32xf32>
    %28 = vector.broadcast %27 : vector<1x32xf32> to vector<32x32xf32>
    %29 = arith.mulf %24, %28 : vector<32x32xf32>
    %30 = arith.truncf %23 : vector<32x32xf32> to vector<32x32xbf16>
    %31 = arith.truncf %29 : vector<32x32xf32> to vector<32x32xbf16>
    %cst_25 = arith.constant dense<0.000000e+00> : vector<32x32xf32>
    %32 = tpu.matmul %30, %31, %cst_25 {dimension_numbers = #tpu.dot_dimension_numbers<[1], [1], [0], [0], [0, 0, 1, 0], [], []>} : vector<32x32xbf16>, vector<32x32xbf16>, vector<32x32xf32> -> vector<32x32xf32>
    %cst_26 = arith.constant 0.353553385 : f32
    %33 = vector.broadcast %cst_26 : f32 to vector<32x32xf32>
    %34 = arith.mulf %32, %33 : vector<32x32xf32>
    %35 = arith.addf %34, %0 : vector<32x32xf32>
    %cst_27 = arith.constant dense<0xFF800000> : vector<32xf32>
    %36 = vector.multi_reduction <maximumf>, %35, %cst_27 [1] : vector<32x32xf32> to vector<32xf32>
    %37 = vector.shape_cast %36 : vector<32xf32> to vector<32x1xf32>
    %38 = vector.broadcast %37 : vector<32x1xf32> to vector<32x32xf32>
    %39 = arith.subf %35, %38 : vector<32x32xf32>
    %40 = math.exp %39 : vector<32x32xf32>
    %cst_28 = arith.constant dense<0.000000e+00> : vector<32xf32>
    %41 = vector.multi_reduction <add>, %40, %cst_28 [1] : vector<32x32xf32> to vector<32xf32>
    %42 = vector.shape_cast %41 : vector<32xf32> to vector<32x1xf32>
    %43 = tpu.reciprocal %42 {approx = true} : vector<32x1xf32> -> vector<32x1xf32>
    %44 = vector.broadcast %43 : vector<32x1xf32> to vector<32x32xf32>
    %45 = arith.mulf %40, %44 : vector<32x32xf32>
    %46 = vector.broadcast %27 : vector<1x32xf32> to vector<32x32xf32>
    %47 = arith.mulf %25, %46 : vector<32x32xf32>
    %48 = arith.truncf %45 : vector<32x32xf32> to vector<32x32xbf16>
    %49 = arith.truncf %47 : vector<32x32xf32> to vector<32x32xbf16>
    %cst_29 = arith.constant dense<0.000000e+00> : vector<32x32xf32>
    %50 = tpu.matmul %48, %49, %cst_29 {dimension_numbers = #tpu.dot_dimension_numbers<[1], [0], [0], [1], [0, 0, 1, 1], [], []>} : vector<32x32xbf16>, vector<32x32xbf16>, vector<32x32xf32> -> vector<32x32xf32>
    %51 = arith.addf %26, %50 : vector<32x32xf32>
    %52 = vector.extract_strided_slice %1 {offsets = [1, 0], sizes = [1, 32], strides = [1, 1]} : vector<4x32xf32> to vector<1x32xf32>
    %53 = vector.broadcast %52 : vector<1x32xf32> to vector<32x32xf32>
    %54 = arith.mulf %24, %53 : vector<32x32xf32>
    %55 = arith.truncf %23 : vector<32x32xf32> to vector<32x32xbf16>
    %56 = arith.truncf %54 : vector<32x32xf32> to vector<32x32xbf16>
    %cst_30 = arith.constant dense<0.000000e+00> : vector<32x32xf32>
    %57 = tpu.matmul %55, %56, %cst_30 {dimension_numbers = #tpu.dot_dimension_numbers<[1], [1], [0], [0], [0, 0, 1, 0], [], []>} : vector<32x32xbf16>, vector<32x32xbf16>, vector<32x32xf32> -> vector<32x32xf32>
    %cst_31 = arith.constant 0.353553385 : f32
    %58 = vector.broadcast %cst_31 : f32 to vector<32x32xf32>
    %59 = arith.mulf %57, %58 : vector<32x32xf32>
    %60 = arith.addf %59, %0 : vector<32x32xf32>
    %cst_32 = arith.constant dense<0xFF800000> : vector<32xf32>
    %61 = vector.multi_reduction <maximumf>, %60, %cst_32 [1] : vector<32x32xf32> to vector<32xf32>
    %62 = vector.shape_cast %61 : vector<32xf32> to vector<32x1xf32>
    %63 = vector.broadcast %62 : vector<32x1xf32> to vector<32x32xf32>
    %64 = arith.subf %60, %63 : vector<32x32xf32>
    %65 = math.exp %64 : vector<32x32xf32>
    %cst_33 = arith.constant dense<0.000000e+00> : vector<32xf32>
    %66 = vector.multi_reduction <add>, %65, %cst_33 [1] : vector<32x32xf32> to vector<32xf32>
    %67 = vector.shape_cast %66 : vector<32xf32> to vector<32x1xf32>
    %68 = tpu.reciprocal %67 {approx = true} : vector<32x1xf32> -> vector<32x1xf32>
    %69 = vector.broadcast %68 : vector<32x1xf32> to vector<32x32xf32>
    %70 = arith.mulf %65, %69 : vector<32x32xf32>
    %71 = vector.broadcast %52 : vector<1x32xf32> to vector<32x32xf32>
    %72 = arith.mulf %25, %71 : vector<32x32xf32>
    %73 = arith.truncf %70 : vector<32x32xf32> to vector<32x32xbf16>
    %74 = arith.truncf %72 : vector<32x32xf32> to vector<32x32xbf16>
    %cst_34 = arith.constant dense<0.000000e+00> : vector<32x32xf32>
    %75 = tpu.matmul %73, %74, %cst_34 {dimension_numbers = #tpu.dot_dimension_numbers<[1], [0], [0], [1], [0, 0, 1, 1], [], []>} : vector<32x32xbf16>, vector<32x32xbf16>, vector<32x32xf32> -> vector<32x32xf32>
    %76 = arith.addf %51, %75 : vector<32x32xf32>
    %77 = vector.extract_strided_slice %1 {offsets = [2, 0], sizes = [1, 32], strides = [1, 1]} : vector<4x32xf32> to vector<1x32xf32>
    %78 = vector.broadcast %77 : vector<1x32xf32> to vector<32x32xf32>
    %79 = arith.mulf %24, %78 : vector<32x32xf32>
    %80 = arith.truncf %23 : vector<32x32xf32> to vector<32x32xbf16>
    %81 = arith.truncf %79 : vector<32x32xf32> to vector<32x32xbf16>
    %cst_35 = arith.constant dense<0.000000e+00> : vector<32x32xf32>
    %82 = tpu.matmul %80, %81, %cst_35 {dimension_numbers = #tpu.dot_dimension_numbers<[1], [1], [0], [0], [0, 0, 1, 0], [], []>} : vector<32x32xbf16>, vector<32x32xbf16>, vector<32x32xf32> -> vector<32x32xf32>
    %cst_36 = arith.constant 0.353553385 : f32
    %83 = vector.broadcast %cst_36 : f32 to vector<32x32xf32>
    %84 = arith.mulf %82, %83 : vector<32x32xf32>
    %85 = arith.addf %84, %0 : vector<32x32xf32>
    %cst_37 = arith.constant dense<0xFF800000> : vector<32xf32>
    %86 = vector.multi_reduction <maximumf>, %85, %cst_37 [1] : vector<32x32xf32> to vector<32xf32>
    %87 = vector.shape_cast %86 : vector<32xf32> to vector<32x1xf32>
    %88 = vector.broadcast %87 : vector<32x1xf32> to vector<32x32xf32>
    %89 = arith.subf %85, %88 : vector<32x32xf32>
    %90 = math.exp %89 : vector<32x32xf32>
    %cst_38 = arith.constant dense<0.000000e+00> : vector<32xf32>
    %91 = vector.multi_reduction <add>, %90, %cst_38 [1] : vector<32x32xf32> to vector<32xf32>
    %92 = vector.shape_cast %91 : vector<32xf32> to vector<32x1xf32>
    %93 = tpu.reciprocal %92 {approx = true} : vector<32x1xf32> -> vector<32x1xf32>
    %94 = vector.broadcast %93 : vector<32x1xf32> to vector<32x32xf32>
    %95 = arith.mulf %90, %94 : vector<32x32xf32>
    %96 = vector.broadcast %77 : vector<1x32xf32> to vector<32x32xf32>
    %97 = arith.mulf %25, %96 : vector<32x32xf32>
    %98 = arith.truncf %95 : vector<32x32xf32> to vector<32x32xbf16>
    %99 = arith.truncf %97 : vector<32x32xf32> to vector<32x32xbf16>
    %cst_39 = arith.constant dense<0.000000e+00> : vector<32x32xf32>
    %100 = tpu.matmul %98, %99, %cst_39 {dimension_numbers = #tpu.dot_dimension_numbers<[1], [0], [0], [1], [0, 0, 1, 1], [], []>} : vector<32x32xbf16>, vector<32x32xbf16>, vector<32x32xf32> -> vector<32x32xf32>
    %101 = arith.addf %76, %100 : vector<32x32xf32>
    %102 = vector.extract_strided_slice %1 {offsets = [3, 0], sizes = [1, 32], strides = [1, 1]} : vector<4x32xf32> to vector<1x32xf32>
    %103 = vector.broadcast %102 : vector<1x32xf32> to vector<32x32xf32>
    %104 = arith.mulf %24, %103 : vector<32x32xf32>
    %105 = arith.truncf %23 : vector<32x32xf32> to vector<32x32xbf16>
    %106 = arith.truncf %104 : vector<32x32xf32> to vector<32x32xbf16>
    %cst_40 = arith.constant dense<0.000000e+00> : vector<32x32xf32>
    %107 = tpu.matmul %105, %106, %cst_40 {dimension_numbers = #tpu.dot_dimension_numbers<[1], [1], [0], [0], [0, 0, 1, 0], [], []>} : vector<32x32xbf16>, vector<32x32xbf16>, vector<32x32xf32> -> vector<32x32xf32>
    %cst_41 = arith.constant 0.353553385 : f32
    %108 = vector.broadcast %cst_41 : f32 to vector<32x32xf32>
    %109 = arith.mulf %107, %108 : vector<32x32xf32>
    %110 = arith.addf %109, %0 : vector<32x32xf32>
    %cst_42 = arith.constant dense<0xFF800000> : vector<32xf32>
    %111 = vector.multi_reduction <maximumf>, %110, %cst_42 [1] : vector<32x32xf32> to vector<32xf32>
    %112 = vector.shape_cast %111 : vector<32xf32> to vector<32x1xf32>
    %113 = vector.broadcast %112 : vector<32x1xf32> to vector<32x32xf32>
    %114 = arith.subf %110, %113 : vector<32x32xf32>
    %115 = math.exp %114 : vector<32x32xf32>
    %cst_43 = arith.constant dense<0.000000e+00> : vector<32xf32>
    %116 = vector.multi_reduction <add>, %115, %cst_43 [1] : vector<32x32xf32> to vector<32xf32>
    %117 = vector.shape_cast %116 : vector<32xf32> to vector<32x1xf32>
    %118 = tpu.reciprocal %117 {approx = true} : vector<32x1xf32> -> vector<32x1xf32>
    %119 = vector.broadcast %118 : vector<32x1xf32> to vector<32x32xf32>
    %120 = arith.mulf %115, %119 : vector<32x32xf32>
    %121 = vector.broadcast %102 : vector<1x32xf32> to vector<32x32xf32>
    %122 = arith.mulf %25, %121 : vector<32x32xf32>
    %123 = arith.truncf %120 : vector<32x32xf32> to vector<32x32xbf16>
    %124 = arith.truncf %122 : vector<32x32xf32> to vector<32x32xbf16>
    %cst_44 = arith.constant dense<0.000000e+00> : vector<32x32xf32>
    %125 = tpu.matmul %123, %124, %cst_44 {dimension_numbers = #tpu.dot_dimension_numbers<[1], [0], [0], [1], [0, 0, 1, 1], [], []>} : vector<32x32xbf16>, vector<32x32xbf16>, vector<32x32xf32> -> vector<32x32xf32>
    %126 = arith.addf %101, %125 : vector<32x32xf32>
    %c0_45 = arith.constant 0 : index
    %c0_46 = arith.constant 0 : index
    %c0_47 = arith.constant 0 : index
    %127 = vector.load %arg10[%c0_45, %c0_46, %c0_47] : memref<2x32x32xbf16, #tpu.memory_space<vmem>>, vector<1x32x32xbf16>
    %128 = vector.shape_cast %127 : vector<1x32x32xbf16> to vector<32x32xbf16>
    %129 = arith.truncf %126 : vector<32x32xf32> to vector<32x32xbf16>
    %cst_48 = arith.constant dense<0.000000e+00> : vector<32x32xf32>
    %130 = tpu.matmul %129, %128, %cst_48 {dimension_numbers = #tpu.dot_dimension_numbers<[1], [0], [0], [1], [0, 0, 1, 1], [], []>} : vector<32x32xbf16>, vector<32x32xbf16>, vector<32x32xf32> -> vector<32x32xf32>
    %131 = vector.extract_strided_slice %14 {offsets = [0, 0], sizes = [1, 32], strides = [1, 1]} : vector<6x32xf32> to vector<1x32xf32>
    %132 = vector.broadcast %131 : vector<1x32xf32> to vector<32x32xf32>
    %133 = arith.addf %130, %132 : vector<32x32xf32>
    %134 = arith.addf %12, %133 : vector<32x32xf32>
    %135 = vector.extract_strided_slice %14 {offsets = [1, 0], sizes = [1, 32], strides = [1, 1]} : vector<6x32xf32> to vector<1x32xf32>
    %136 = vector.extract_strided_slice %14 {offsets = [2, 0], sizes = [1, 32], strides = [1, 1]} : vector<6x32xf32> to vector<1x32xf32>
    %cst_49 = arith.constant dense<0.000000e+00> : vector<32xf32>
    %137 = vector.multi_reduction <add>, %134, %cst_49 [1] : vector<32x32xf32> to vector<32xf32>
    %138 = vector.shape_cast %137 : vector<32xf32> to vector<32x1xf32>
    %cst_50 = arith.constant 3.200000e+01 : f32
    %139 = vector.broadcast %cst_50 : f32 to vector<32x1xf32>
    %140 = arith.divf %138, %139 : vector<32x1xf32>
    %141 = vector.broadcast %140 : vector<32x1xf32> to vector<32x32xf32>
    %142 = arith.subf %134, %141 : vector<32x32xf32>
    %143 = arith.mulf %142, %142 : vector<32x32xf32>
    %cst_51 = arith.constant dense<0.000000e+00> : vector<32xf32>
    %144 = vector.multi_reduction <add>, %143, %cst_51 [1] : vector<32x32xf32> to vector<32xf32>
    %145 = vector.shape_cast %144 : vector<32xf32> to vector<32x1xf32>
    %cst_52 = arith.constant 3.200000e+01 : f32
    %146 = vector.broadcast %cst_52 : f32 to vector<32x1xf32>
    %147 = arith.divf %145, %146 : vector<32x1xf32>
    %148 = vector.broadcast %140 : vector<32x1xf32> to vector<32x32xf32>
    %149 = arith.subf %134, %148 : vector<32x32xf32>
    %cst_53 = arith.constant 9.99999974E-6 : f32
    %150 = vector.broadcast %cst_53 : f32 to vector<32x1xf32>
    %151 = arith.addf %147, %150 : vector<32x1xf32>
    %152 = math.rsqrt %151 : vector<32x1xf32>
    %153 = vector.broadcast %152 : vector<32x1xf32> to vector<32x32xf32>
    %154 = arith.mulf %149, %153 : vector<32x32xf32>
    %155 = vector.broadcast %135 : vector<1x32xf32> to vector<32x32xf32>
    %156 = arith.mulf %154, %155 : vector<32x32xf32>
    %157 = vector.broadcast %136 : vector<1x32xf32> to vector<32x32xf32>
    %158 = arith.addf %156, %157 : vector<32x32xf32>
    %c0_54 = arith.constant 0 : index
    %c0_55 = arith.constant 0 : index
    %c0_56 = arith.constant 0 : index
    %159 = vector.load %arg11[%c0_54, %c0_55, %c0_56] : memref<2x32x64xbf16, #tpu.memory_space<vmem>>, vector<1x32x64xbf16>
    %160 = vector.shape_cast %159 : vector<1x32x64xbf16> to vector<32x64xbf16>
    %161 = arith.truncf %158 : vector<32x32xf32> to vector<32x32xbf16>
    %cst_57 = arith.constant dense<0.000000e+00> : vector<32x64xf32>
    %162 = tpu.matmul %161, %160, %cst_57 {dimension_numbers = #tpu.dot_dimension_numbers<[1], [0], [0], [1], [0, 0, 1, 1], [], []>} : vector<32x32xbf16>, vector<32x64xbf16>, vector<32x64xf32> -> vector<32x64xf32>
    %c0_58 = arith.constant 0 : index
    %c0_59 = arith.constant 0 : index
    %c0_60 = arith.constant 0 : index
    %163 = vector.load %arg12[%c0_58, %c0_59, %c0_60] : memref<2x1x64xf32, #tpu.memory_space<vmem>>, vector<1x1x64xf32>
    %164 = vector.shape_cast %163 : vector<1x1x64xf32> to vector<1x64xf32>
    %165 = vector.broadcast %164 : vector<1x64xf32> to vector<32x64xf32>
    %166 = arith.addf %162, %165 : vector<32x64xf32>
    %cst_61 = arith.constant 0.000000e+00 : f32
    %167 = vector.broadcast %cst_61 : f32 to vector<32x64xf32>
    %168 = arith.maximumf %166, %167 : vector<32x64xf32>
    %c0_62 = arith.constant 0 : index
    %c0_63 = arith.constant 0 : index
    %c0_64 = arith.constant 0 : index
    %169 = vector.load %arg13[%c0_62, %c0_63, %c0_64] : memref<2x64x32xbf16, #tpu.memory_space<vmem>>, vector<1x64x32xbf16>
    %170 = vector.shape_cast %169 : vector<1x64x32xbf16> to vector<64x32xbf16>
    %171 = arith.truncf %168 : vector<32x64xf32> to vector<32x64xbf16>
    %cst_65 = arith.constant dense<0.000000e+00> : vector<32x32xf32>
    %172 = tpu.matmul %171, %170, %cst_65 {dimension_numbers = #tpu.dot_dimension_numbers<[1], [0], [0], [1], [0, 0, 1, 1], [], []>} : vector<32x64xbf16>, vector<64x32xbf16>, vector<32x32xf32> -> vector<32x32xf32>
    %173 = vector.extract_strided_slice %14 {offsets = [3, 0], sizes = [1, 32], strides = [1, 1]} : vector<6x32xf32> to vector<1x32xf32>
    %174 = vector.broadcast %173 : vector<1x32xf32> to vector<32x32xf32>
    %175 = arith.addf %172, %174 : vector<32x32xf32>
    %176 = arith.addf %158, %175 : vector<32x32xf32>
    %177 = vector.extract_strided_slice %14 {offsets = [4, 0], sizes = [1, 32], strides = [1, 1]} : vector<6x32xf32> to vector<1x32xf32>
    %178 = vector.extract_strided_slice %14 {offsets = [5, 0], sizes = [1, 32], strides = [1, 1]} : vector<6x32xf32> to vector<1x32xf32>
    %cst_66 = arith.constant dense<0.000000e+00> : vector<32xf32>
    %179 = vector.multi_reduction <add>, %176, %cst_66 [1] : vector<32x32xf32> to vector<32xf32>
    %180 = vector.shape_cast %179 : vector<32xf32> to vector<32x1xf32>
    %cst_67 = arith.constant 3.200000e+01 : f32
    %181 = vector.broadcast %cst_67 : f32 to vector<32x1xf32>
    %182 = arith.divf %180, %181 : vector<32x1xf32>
    %183 = vector.broadcast %182 : vector<32x1xf32> to vector<32x32xf32>
    %184 = arith.subf %176, %183 : vector<32x32xf32>
    %185 = arith.mulf %184, %184 : vector<32x32xf32>
    %cst_68 = arith.constant dense<0.000000e+00> : vector<32xf32>
    %186 = vector.multi_reduction <add>, %185, %cst_68 [1] : vector<32x32xf32> to vector<32xf32>
    %187 = vector.shape_cast %186 : vector<32xf32> to vector<32x1xf32>
    %cst_69 = arith.constant 3.200000e+01 : f32
    %188 = vector.broadcast %cst_69 : f32 to vector<32x1xf32>
    %189 = arith.divf %187, %188 : vector<32x1xf32>
    %190 = vector.broadcast %182 : vector<32x1xf32> to vector<32x32xf32>
    %191 = arith.subf %176, %190 : vector<32x32xf32>
    %cst_70 = arith.constant 9.99999974E-6 : f32
    %192 = vector.broadcast %cst_70 : f32 to vector<32x1xf32>
    %193 = arith.addf %189, %192 : vector<32x1xf32>
    %194 = math.rsqrt %193 : vector<32x1xf32>
    %195 = vector.broadcast %194 : vector<32x1xf32> to vector<32x32xf32>
    %196 = arith.mulf %191, %195 : vector<32x32xf32>
    %197 = vector.broadcast %177 : vector<1x32xf32> to vector<32x32xf32>
    %198 = arith.mulf %196, %197 : vector<32x32xf32>
    %199 = vector.broadcast %178 : vector<1x32xf32> to vector<32x32xf32>
    %200 = arith.addf %198, %199 : vector<32x32xf32>
    %c1 = arith.constant 1 : index
    %c0_71 = arith.constant 0 : index
    %c0_72 = arith.constant 0 : index
    %201 = vector.load %arg14[%c1, %c0_71, %c0_72] : memref<2x6x32xf32, #tpu.memory_space<vmem>>, vector<1x6x32xf32>
    %202 = vector.shape_cast %201 : vector<1x6x32xf32> to vector<6x32xf32>
    %c1_73 = arith.constant 1 : index
    %c0_74 = arith.constant 0 : index
    %c0_75 = arith.constant 0 : index
    %203 = vector.load %arg8[%c1_73, %c0_74, %c0_75] : memref<2x32x96xbf16, #tpu.memory_space<vmem>>, vector<1x32x96xbf16>
    %204 = vector.shape_cast %203 : vector<1x32x96xbf16> to vector<32x96xbf16>
    %205 = arith.truncf %200 : vector<32x32xf32> to vector<32x32xbf16>
    %cst_76 = arith.constant dense<0.000000e+00> : vector<32x96xf32>
    %206 = tpu.matmul %205, %204, %cst_76 {dimension_numbers = #tpu.dot_dimension_numbers<[1], [0], [0], [1], [0, 0, 1, 1], [], []>} : vector<32x32xbf16>, vector<32x96xbf16>, vector<32x96xf32> -> vector<32x96xf32>
    %c1_77 = arith.constant 1 : index
    %c0_78 = arith.constant 0 : index
    %c0_79 = arith.constant 0 : index
    %207 = vector.load %arg9[%c1_77, %c0_78, %c0_79] : memref<2x1x96xf32, #tpu.memory_space<vmem>>, vector<1x1x96xf32>
    %208 = vector.shape_cast %207 : vector<1x1x96xf32> to vector<1x96xf32>
    %209 = vector.broadcast %208 : vector<1x96xf32> to vector<32x96xf32>
    %210 = arith.addf %206, %209 : vector<32x96xf32>
    %211 = vector.extract_strided_slice %210 {offsets = [0, 0], sizes = [32, 32], strides = [1, 1]} : vector<32x96xf32> to vector<32x32xf32>
    %212 = vector.extract_strided_slice %210 {offsets = [0, 32], sizes = [32, 32], strides = [1, 1]} : vector<32x96xf32> to vector<32x32xf32>
    %213 = vector.extract_strided_slice %210 {offsets = [0, 64], sizes = [32, 32], strides = [1, 1]} : vector<32x96xf32> to vector<32x32xf32>
    %cst_80 = arith.constant 0.000000e+00 : f32
    %214 = vector.broadcast %cst_80 : f32 to vector<32x32xf32>
    %215 = vector.extract_strided_slice %1 {offsets = [0, 0], sizes = [1, 32], strides = [1, 1]} : vector<4x32xf32> to vector<1x32xf32>
    %216 = vector.broadcast %215 : vector<1x32xf32> to vector<32x32xf32>
    %217 = arith.mulf %212, %216 : vector<32x32xf32>
    %218 = arith.truncf %211 : vector<32x32xf32> to vector<32x32xbf16>
    %219 = arith.truncf %217 : vector<32x32xf32> to vector<32x32xbf16>
    %cst_81 = arith.constant dense<0.000000e+00> : vector<32x32xf32>
    %220 = tpu.matmul %218, %219, %cst_81 {dimension_numbers = #tpu.dot_dimension_numbers<[1], [1], [0], [0], [0, 0, 1, 0], [], []>} : vector<32x32xbf16>, vector<32x32xbf16>, vector<32x32xf32> -> vector<32x32xf32>
    %cst_82 = arith.constant 0.353553385 : f32
    %221 = vector.broadcast %cst_82 : f32 to vector<32x32xf32>
    %222 = arith.mulf %220, %221 : vector<32x32xf32>
    %223 = arith.addf %222, %0 : vector<32x32xf32>
    %cst_83 = arith.constant dense<0xFF800000> : vector<32xf32>
    %224 = vector.multi_reduction <maximumf>, %223, %cst_83 [1] : vector<32x32xf32> to vector<32xf32>
    %225 = vector.shape_cast %224 : vector<32xf32> to vector<32x1xf32>
    %226 = vector.broadcast %225 : vector<32x1xf32> to vector<32x32xf32>
    %227 = arith.subf %223, %226 : vector<32x32xf32>
    %228 = math.exp %227 : vector<32x32xf32>
    %cst_84 = arith.constant dense<0.000000e+00> : vector<32xf32>
    %229 = vector.multi_reduction <add>, %228, %cst_84 [1] : vector<32x32xf32> to vector<32xf32>
    %230 = vector.shape_cast %229 : vector<32xf32> to vector<32x1xf32>
    %231 = tpu.reciprocal %230 {approx = true} : vector<32x1xf32> -> vector<32x1xf32>
    %232 = vector.broadcast %231 : vector<32x1xf32> to vector<32x32xf32>
    %233 = arith.mulf %228, %232 : vector<32x32xf32>
    %234 = vector.broadcast %215 : vector<1x32xf32> to vector<32x32xf32>
    %235 = arith.mulf %213, %234 : vector<32x32xf32>
    %236 = arith.truncf %233 : vector<32x32xf32> to vector<32x32xbf16>
    %237 = arith.truncf %235 : vector<32x32xf32> to vector<32x32xbf16>
    %cst_85 = arith.constant dense<0.000000e+00> : vector<32x32xf32>
    %238 = tpu.matmul %236, %237, %cst_85 {dimension_numbers = #tpu.dot_dimension_numbers<[1], [0], [0], [1], [0, 0, 1, 1], [], []>} : vector<32x32xbf16>, vector<32x32xbf16>, vector<32x32xf32> -> vector<32x32xf32>
    %239 = arith.addf %214, %238 : vector<32x32xf32>
    %240 = vector.extract_strided_slice %1 {offsets = [1, 0], sizes = [1, 32], strides = [1, 1]} : vector<4x32xf32> to vector<1x32xf32>
    %241 = vector.broadcast %240 : vector<1x32xf32> to vector<32x32xf32>
    %242 = arith.mulf %212, %241 : vector<32x32xf32>
    %243 = arith.truncf %211 : vector<32x32xf32> to vector<32x32xbf16>
    %244 = arith.truncf %242 : vector<32x32xf32> to vector<32x32xbf16>
    %cst_86 = arith.constant dense<0.000000e+00> : vector<32x32xf32>
    %245 = tpu.matmul %243, %244, %cst_86 {dimension_numbers = #tpu.dot_dimension_numbers<[1], [1], [0], [0], [0, 0, 1, 0], [], []>} : vector<32x32xbf16>, vector<32x32xbf16>, vector<32x32xf32> -> vector<32x32xf32>
    %cst_87 = arith.constant 0.353553385 : f32
    %246 = vector.broadcast %cst_87 : f32 to vector<32x32xf32>
    %247 = arith.mulf %245, %246 : vector<32x32xf32>
    %248 = arith.addf %247, %0 : vector<32x32xf32>
    %cst_88 = arith.constant dense<0xFF800000> : vector<32xf32>
    %249 = vector.multi_reduction <maximumf>, %248, %cst_88 [1] : vector<32x32xf32> to vector<32xf32>
    %250 = vector.shape_cast %249 : vector<32xf32> to vector<32x1xf32>
    %251 = vector.broadcast %250 : vector<32x1xf32> to vector<32x32xf32>
    %252 = arith.subf %248, %251 : vector<32x32xf32>
    %253 = math.exp %252 : vector<32x32xf32>
    %cst_89 = arith.constant dense<0.000000e+00> : vector<32xf32>
    %254 = vector.multi_reduction <add>, %253, %cst_89 [1] : vector<32x32xf32> to vector<32xf32>
    %255 = vector.shape_cast %254 : vector<32xf32> to vector<32x1xf32>
    %256 = tpu.reciprocal %255 {approx = true} : vector<32x1xf32> -> vector<32x1xf32>
    %257 = vector.broadcast %256 : vector<32x1xf32> to vector<32x32xf32>
    %258 = arith.mulf %253, %257 : vector<32x32xf32>
    %259 = vector.broadcast %240 : vector<1x32xf32> to vector<32x32xf32>
    %260 = arith.mulf %213, %259 : vector<32x32xf32>
    %261 = arith.truncf %258 : vector<32x32xf32> to vector<32x32xbf16>
    %262 = arith.truncf %260 : vector<32x32xf32> to vector<32x32xbf16>
    %cst_90 = arith.constant dense<0.000000e+00> : vector<32x32xf32>
    %263 = tpu.matmul %261, %262, %cst_90 {dimension_numbers = #tpu.dot_dimension_numbers<[1], [0], [0], [1], [0, 0, 1, 1], [], []>} : vector<32x32xbf16>, vector<32x32xbf16>, vector<32x32xf32> -> vector<32x32xf32>
    %264 = arith.addf %239, %263 : vector<32x32xf32>
    %265 = vector.extract_strided_slice %1 {offsets = [2, 0], sizes = [1, 32], strides = [1, 1]} : vector<4x32xf32> to vector<1x32xf32>
    %266 = vector.broadcast %265 : vector<1x32xf32> to vector<32x32xf32>
    %267 = arith.mulf %212, %266 : vector<32x32xf32>
    %268 = arith.truncf %211 : vector<32x32xf32> to vector<32x32xbf16>
    %269 = arith.truncf %267 : vector<32x32xf32> to vector<32x32xbf16>
    %cst_91 = arith.constant dense<0.000000e+00> : vector<32x32xf32>
    %270 = tpu.matmul %268, %269, %cst_91 {dimension_numbers = #tpu.dot_dimension_numbers<[1], [1], [0], [0], [0, 0, 1, 0], [], []>} : vector<32x32xbf16>, vector<32x32xbf16>, vector<32x32xf32> -> vector<32x32xf32>
    %cst_92 = arith.constant 0.353553385 : f32
    %271 = vector.broadcast %cst_92 : f32 to vector<32x32xf32>
    %272 = arith.mulf %270, %271 : vector<32x32xf32>
    %273 = arith.addf %272, %0 : vector<32x32xf32>
    %cst_93 = arith.constant dense<0xFF800000> : vector<32xf32>
    %274 = vector.multi_reduction <maximumf>, %273, %cst_93 [1] : vector<32x32xf32> to vector<32xf32>
    %275 = vector.shape_cast %274 : vector<32xf32> to vector<32x1xf32>
    %276 = vector.broadcast %275 : vector<32x1xf32> to vector<32x32xf32>
    %277 = arith.subf %273, %276 : vector<32x32xf32>
    %278 = math.exp %277 : vector<32x32xf32>
    %cst_94 = arith.constant dense<0.000000e+00> : vector<32xf32>
    %279 = vector.multi_reduction <add>, %278, %cst_94 [1] : vector<32x32xf32> to vector<32xf32>
    %280 = vector.shape_cast %279 : vector<32xf32> to vector<32x1xf32>
    %281 = tpu.reciprocal %280 {approx = true} : vector<32x1xf32> -> vector<32x1xf32>
    %282 = vector.broadcast %281 : vector<32x1xf32> to vector<32x32xf32>
    %283 = arith.mulf %278, %282 : vector<32x32xf32>
    %284 = vector.broadcast %265 : vector<1x32xf32> to vector<32x32xf32>
    %285 = arith.mulf %213, %284 : vector<32x32xf32>
    %286 = arith.truncf %283 : vector<32x32xf32> to vector<32x32xbf16>
    %287 = arith.truncf %285 : vector<32x32xf32> to vector<32x32xbf16>
    %cst_95 = arith.constant dense<0.000000e+00> : vector<32x32xf32>
    %288 = tpu.matmul %286, %287, %cst_95 {dimension_numbers = #tpu.dot_dimension_numbers<[1], [0], [0], [1], [0, 0, 1, 1], [], []>} : vector<32x32xbf16>, vector<32x32xbf16>, vector<32x32xf32> -> vector<32x32xf32>
    %289 = arith.addf %264, %288 : vector<32x32xf32>
    %290 = vector.extract_strided_slice %1 {offsets = [3, 0], sizes = [1, 32], strides = [1, 1]} : vector<4x32xf32> to vector<1x32xf32>
    %291 = vector.broadcast %290 : vector<1x32xf32> to vector<32x32xf32>
    %292 = arith.mulf %212, %291 : vector<32x32xf32>
    %293 = arith.truncf %211 : vector<32x32xf32> to vector<32x32xbf16>
    %294 = arith.truncf %292 : vector<32x32xf32> to vector<32x32xbf16>
    %cst_96 = arith.constant dense<0.000000e+00> : vector<32x32xf32>
    %295 = tpu.matmul %293, %294, %cst_96 {dimension_numbers = #tpu.dot_dimension_numbers<[1], [1], [0], [0], [0, 0, 1, 0], [], []>} : vector<32x32xbf16>, vector<32x32xbf16>, vector<32x32xf32> -> vector<32x32xf32>
    %cst_97 = arith.constant 0.353553385 : f32
    %296 = vector.broadcast %cst_97 : f32 to vector<32x32xf32>
    %297 = arith.mulf %295, %296 : vector<32x32xf32>
    %298 = arith.addf %297, %0 : vector<32x32xf32>
    %cst_98 = arith.constant dense<0xFF800000> : vector<32xf32>
    %299 = vector.multi_reduction <maximumf>, %298, %cst_98 [1] : vector<32x32xf32> to vector<32xf32>
    %300 = vector.shape_cast %299 : vector<32xf32> to vector<32x1xf32>
    %301 = vector.broadcast %300 : vector<32x1xf32> to vector<32x32xf32>
    %302 = arith.subf %298, %301 : vector<32x32xf32>
    %303 = math.exp %302 : vector<32x32xf32>
    %cst_99 = arith.constant dense<0.000000e+00> : vector<32xf32>
    %304 = vector.multi_reduction <add>, %303, %cst_99 [1] : vector<32x32xf32> to vector<32xf32>
    %305 = vector.shape_cast %304 : vector<32xf32> to vector<32x1xf32>
    %306 = tpu.reciprocal %305 {approx = true} : vector<32x1xf32> -> vector<32x1xf32>
    %307 = vector.broadcast %306 : vector<32x1xf32> to vector<32x32xf32>
    %308 = arith.mulf %303, %307 : vector<32x32xf32>
    %309 = vector.broadcast %290 : vector<1x32xf32> to vector<32x32xf32>
    %310 = arith.mulf %213, %309 : vector<32x32xf32>
    %311 = arith.truncf %308 : vector<32x32xf32> to vector<32x32xbf16>
    %312 = arith.truncf %310 : vector<32x32xf32> to vector<32x32xbf16>
    %cst_100 = arith.constant dense<0.000000e+00> : vector<32x32xf32>
    %313 = tpu.matmul %311, %312, %cst_100 {dimension_numbers = #tpu.dot_dimension_numbers<[1], [0], [0], [1], [0, 0, 1, 1], [], []>} : vector<32x32xbf16>, vector<32x32xbf16>, vector<32x32xf32> -> vector<32x32xf32>
    %314 = arith.addf %289, %313 : vector<32x32xf32>
    %c1_101 = arith.constant 1 : index
    %c0_102 = arith.constant 0 : index
    %c0_103 = arith.constant 0 : index
    %315 = vector.load %arg10[%c1_101, %c0_102, %c0_103] : memref<2x32x32xbf16, #tpu.memory_space<vmem>>, vector<1x32x32xbf16>
    %316 = vector.shape_cast %315 : vector<1x32x32xbf16> to vector<32x32xbf16>
    %317 = arith.truncf %314 : vector<32x32xf32> to vector<32x32xbf16>
    %cst_104 = arith.constant dense<0.000000e+00> : vector<32x32xf32>
    %318 = tpu.matmul %317, %316, %cst_104 {dimension_numbers = #tpu.dot_dimension_numbers<[1], [0], [0], [1], [0, 0, 1, 1], [], []>} : vector<32x32xbf16>, vector<32x32xbf16>, vector<32x32xf32> -> vector<32x32xf32>
    %319 = vector.extract_strided_slice %202 {offsets = [0, 0], sizes = [1, 32], strides = [1, 1]} : vector<6x32xf32> to vector<1x32xf32>
    %320 = vector.broadcast %319 : vector<1x32xf32> to vector<32x32xf32>
    %321 = arith.addf %318, %320 : vector<32x32xf32>
    %322 = arith.addf %200, %321 : vector<32x32xf32>
    %323 = vector.extract_strided_slice %202 {offsets = [1, 0], sizes = [1, 32], strides = [1, 1]} : vector<6x32xf32> to vector<1x32xf32>
    %324 = vector.extract_strided_slice %202 {offsets = [2, 0], sizes = [1, 32], strides = [1, 1]} : vector<6x32xf32> to vector<1x32xf32>
    %cst_105 = arith.constant dense<0.000000e+00> : vector<32xf32>
    %325 = vector.multi_reduction <add>, %322, %cst_105 [1] : vector<32x32xf32> to vector<32xf32>
    %326 = vector.shape_cast %325 : vector<32xf32> to vector<32x1xf32>
    %cst_106 = arith.constant 3.200000e+01 : f32
    %327 = vector.broadcast %cst_106 : f32 to vector<32x1xf32>
    %328 = arith.divf %326, %327 : vector<32x1xf32>
    %329 = vector.broadcast %328 : vector<32x1xf32> to vector<32x32xf32>
    %330 = arith.subf %322, %329 : vector<32x32xf32>
    %331 = arith.mulf %330, %330 : vector<32x32xf32>
    %cst_107 = arith.constant dense<0.000000e+00> : vector<32xf32>
    %332 = vector.multi_reduction <add>, %331, %cst_107 [1] : vector<32x32xf32> to vector<32xf32>
    %333 = vector.shape_cast %332 : vector<32xf32> to vector<32x1xf32>
    %cst_108 = arith.constant 3.200000e+01 : f32
    %334 = vector.broadcast %cst_108 : f32 to vector<32x1xf32>
    %335 = arith.divf %333, %334 : vector<32x1xf32>
    %336 = vector.broadcast %328 : vector<32x1xf32> to vector<32x32xf32>
    %337 = arith.subf %322, %336 : vector<32x32xf32>
    %cst_109 = arith.constant 9.99999974E-6 : f32
    %338 = vector.broadcast %cst_109 : f32 to vector<32x1xf32>
    %339 = arith.addf %335, %338 : vector<32x1xf32>
    %340 = math.rsqrt %339 : vector<32x1xf32>
    %341 = vector.broadcast %340 : vector<32x1xf32> to vector<32x32xf32>
    %342 = arith.mulf %337, %341 : vector<32x32xf32>
    %343 = vector.broadcast %323 : vector<1x32xf32> to vector<32x32xf32>
    %344 = arith.mulf %342, %343 : vector<32x32xf32>
    %345 = vector.broadcast %324 : vector<1x32xf32> to vector<32x32xf32>
    %346 = arith.addf %344, %345 : vector<32x32xf32>
    %c1_110 = arith.constant 1 : index
    %c0_111 = arith.constant 0 : index
    %c0_112 = arith.constant 0 : index
    %347 = vector.load %arg11[%c1_110, %c0_111, %c0_112] : memref<2x32x64xbf16, #tpu.memory_space<vmem>>, vector<1x32x64xbf16>
    %348 = vector.shape_cast %347 : vector<1x32x64xbf16> to vector<32x64xbf16>
    %349 = arith.truncf %346 : vector<32x32xf32> to vector<32x32xbf16>
    %cst_113 = arith.constant dense<0.000000e+00> : vector<32x64xf32>
    %350 = tpu.matmul %349, %348, %cst_113 {dimension_numbers = #tpu.dot_dimension_numbers<[1], [0], [0], [1], [0, 0, 1, 1], [], []>} : vector<32x32xbf16>, vector<32x64xbf16>, vector<32x64xf32> -> vector<32x64xf32>
    %c1_114 = arith.constant 1 : index
    %c0_115 = arith.constant 0 : index
    %c0_116 = arith.constant 0 : index
    %351 = vector.load %arg12[%c1_114, %c0_115, %c0_116] : memref<2x1x64xf32, #tpu.memory_space<vmem>>, vector<1x1x64xf32>
    %352 = vector.shape_cast %351 : vector<1x1x64xf32> to vector<1x64xf32>
    %353 = vector.broadcast %352 : vector<1x64xf32> to vector<32x64xf32>
    %354 = arith.addf %350, %353 : vector<32x64xf32>
    %cst_117 = arith.constant 0.000000e+00 : f32
    %355 = vector.broadcast %cst_117 : f32 to vector<32x64xf32>
    %356 = arith.maximumf %354, %355 : vector<32x64xf32>
    %c1_118 = arith.constant 1 : index
    %c0_119 = arith.constant 0 : index
    %c0_120 = arith.constant 0 : index
    %357 = vector.load %arg13[%c1_118, %c0_119, %c0_120] : memref<2x64x32xbf16, #tpu.memory_space<vmem>>, vector<1x64x32xbf16>
    %358 = vector.shape_cast %357 : vector<1x64x32xbf16> to vector<64x32xbf16>
    %359 = arith.truncf %356 : vector<32x64xf32> to vector<32x64xbf16>
    %cst_121 = arith.constant dense<0.000000e+00> : vector<32x32xf32>
    %360 = tpu.matmul %359, %358, %cst_121 {dimension_numbers = #tpu.dot_dimension_numbers<[1], [0], [0], [1], [0, 0, 1, 1], [], []>} : vector<32x64xbf16>, vector<64x32xbf16>, vector<32x32xf32> -> vector<32x32xf32>
    %361 = vector.extract_strided_slice %202 {offsets = [3, 0], sizes = [1, 32], strides = [1, 1]} : vector<6x32xf32> to vector<1x32xf32>
    %362 = vector.broadcast %361 : vector<1x32xf32> to vector<32x32xf32>
    %363 = arith.addf %360, %362 : vector<32x32xf32>
    %364 = arith.addf %346, %363 : vector<32x32xf32>
    %365 = vector.extract_strided_slice %202 {offsets = [4, 0], sizes = [1, 32], strides = [1, 1]} : vector<6x32xf32> to vector<1x32xf32>
    %366 = vector.extract_strided_slice %202 {offsets = [5, 0], sizes = [1, 32], strides = [1, 1]} : vector<6x32xf32> to vector<1x32xf32>
    %cst_122 = arith.constant dense<0.000000e+00> : vector<32xf32>
    %367 = vector.multi_reduction <add>, %364, %cst_122 [1] : vector<32x32xf32> to vector<32xf32>
    %368 = vector.shape_cast %367 : vector<32xf32> to vector<32x1xf32>
    %cst_123 = arith.constant 3.200000e+01 : f32
    %369 = vector.broadcast %cst_123 : f32 to vector<32x1xf32>
    %370 = arith.divf %368, %369 : vector<32x1xf32>
    %371 = vector.broadcast %370 : vector<32x1xf32> to vector<32x32xf32>
    %372 = arith.subf %364, %371 : vector<32x32xf32>
    %373 = arith.mulf %372, %372 : vector<32x32xf32>
    %cst_124 = arith.constant dense<0.000000e+00> : vector<32xf32>
    %374 = vector.multi_reduction <add>, %373, %cst_124 [1] : vector<32x32xf32> to vector<32xf32>
    %375 = vector.shape_cast %374 : vector<32xf32> to vector<32x1xf32>
    %cst_125 = arith.constant 3.200000e+01 : f32
    %376 = vector.broadcast %cst_125 : f32 to vector<32x1xf32>
    %377 = arith.divf %375, %376 : vector<32x1xf32>
    %378 = vector.broadcast %370 : vector<32x1xf32> to vector<32x32xf32>
    %379 = arith.subf %364, %378 : vector<32x32xf32>
    %cst_126 = arith.constant 9.99999974E-6 : f32
    %380 = vector.broadcast %cst_126 : f32 to vector<32x1xf32>
    %381 = arith.addf %377, %380 : vector<32x1xf32>
    %382 = math.rsqrt %381 : vector<32x1xf32>
    %383 = vector.broadcast %382 : vector<32x1xf32> to vector<32x32xf32>
    %384 = arith.mulf %379, %383 : vector<32x32xf32>
    %385 = vector.broadcast %365 : vector<1x32xf32> to vector<32x32xf32>
    %386 = arith.mulf %384, %385 : vector<32x32xf32>
    %387 = vector.broadcast %366 : vector<1x32xf32> to vector<32x32xf32>
    %388 = arith.addf %386, %387 : vector<32x32xf32>
    %389 = vector.extract_strided_slice %2 {offsets = [0, 0], sizes = [1, 32], strides = [1, 1]} : vector<2x32xf32> to vector<1x32xf32>
    %390 = vector.extract_strided_slice %2 {offsets = [1, 0], sizes = [1, 32], strides = [1, 1]} : vector<2x32xf32> to vector<1x32xf32>
    %cst_127 = arith.constant dense<0.000000e+00> : vector<32xf32>
    %391 = vector.multi_reduction <add>, %388, %cst_127 [1] : vector<32x32xf32> to vector<32xf32>
    %392 = vector.shape_cast %391 : vector<32xf32> to vector<32x1xf32>
    %cst_128 = arith.constant 3.200000e+01 : f32
    %393 = vector.broadcast %cst_128 : f32 to vector<32x1xf32>
    %394 = arith.divf %392, %393 : vector<32x1xf32>
    %395 = vector.broadcast %394 : vector<32x1xf32> to vector<32x32xf32>
    %396 = arith.subf %388, %395 : vector<32x32xf32>
    %397 = arith.mulf %396, %396 : vector<32x32xf32>
    %cst_129 = arith.constant dense<0.000000e+00> : vector<32xf32>
    %398 = vector.multi_reduction <add>, %397, %cst_129 [1] : vector<32x32xf32> to vector<32xf32>
    %399 = vector.shape_cast %398 : vector<32xf32> to vector<32x1xf32>
    %cst_130 = arith.constant 3.200000e+01 : f32
    %400 = vector.broadcast %cst_130 : f32 to vector<32x1xf32>
    %401 = arith.divf %399, %400 : vector<32x1xf32>
    %402 = vector.broadcast %394 : vector<32x1xf32> to vector<32x32xf32>
    %403 = arith.subf %388, %402 : vector<32x32xf32>
    %cst_131 = arith.constant 9.99999974E-6 : f32
    %404 = vector.broadcast %cst_131 : f32 to vector<32x1xf32>
    %405 = arith.addf %401, %404 : vector<32x1xf32>
    %406 = math.rsqrt %405 : vector<32x1xf32>
    %407 = vector.broadcast %406 : vector<32x1xf32> to vector<32x32xf32>
    %408 = arith.mulf %403, %407 : vector<32x32xf32>
    %409 = vector.broadcast %389 : vector<1x32xf32> to vector<32x32xf32>
    %410 = arith.mulf %408, %409 : vector<32x32xf32>
    %411 = vector.broadcast %390 : vector<1x32xf32> to vector<32x32xf32>
    %412 = arith.addf %410, %411 : vector<32x32xf32>
    %c0_132 = arith.constant 0 : index
    %c0_133 = arith.constant 0 : index
    %413 = vector.load %arg5[%c0_132, %c0_133] : memref<4x32xf32, #tpu.memory_space<vmem>>, vector<4x32xf32>
    %414 = arith.truncf %413 : vector<4x32xf32> to vector<4x32xbf16>
    %415 = arith.truncf %412 : vector<32x32xf32> to vector<32x32xbf16>
    %cst_134 = arith.constant dense<0.000000e+00> : vector<4x32xf32>
    %416 = tpu.matmul %414, %415, %cst_134 {dimension_numbers = #tpu.dot_dimension_numbers<[1], [0], [0], [1], [0, 0, 1, 1], [], []>} : vector<4x32xbf16>, vector<32x32xbf16>, vector<4x32xf32> -> vector<4x32xf32>
    %c0_135 = arith.constant 0 : index
    %c0_136 = arith.constant 0 : index
    %417 = vector.load %arg16[%c0_135, %c0_136] : memref<32x128xbf16, #tpu.memory_space<vmem>>, vector<32x128xbf16>
    %418 = arith.truncf %416 : vector<4x32xf32> to vector<4x32xbf16>
    %cst_137 = arith.constant dense<0.000000e+00> : vector<4x128xf32>
    %419 = tpu.matmul %418, %417, %cst_137 {dimension_numbers = #tpu.dot_dimension_numbers<[1], [0], [0], [1], [0, 0, 1, 1], [], []>} : vector<4x32xbf16>, vector<32x128xbf16>, vector<4x128xf32> -> vector<4x128xf32>
    %c0_138 = arith.constant 0 : index
    %c0_139 = arith.constant 0 : index
    %420 = vector.load %arg17[%c0_138, %c0_139] : memref<1x128xf32, #tpu.memory_space<vmem>>, vector<1x128xf32>
    %421 = vector.broadcast %420 : vector<1x128xf32> to vector<4x128xf32>
    %422 = arith.addf %419, %421 : vector<4x128xf32>
    %cst_140 = arith.constant 0.000000e+00 : f32
    %423 = vector.broadcast %cst_140 : f32 to vector<4x128xf32>
    %424 = arith.maximumf %422, %423 : vector<4x128xf32>
    %c0_141 = arith.constant 0 : index
    %c0_142 = arith.constant 0 : index
    %c0_143 = arith.constant 0 : index
    %425 = vector.load %arg18[%c0_141, %c0_142, %c0_143] : memref<1x4x128xf32, #tpu.memory_space<vmem>>, vector<1x4x128xf32>
    %426 = vector.shape_cast %425 : vector<1x4x128xf32> to vector<4x128xf32>
    %427 = vector.shape_cast %424 : vector<4x128xf32> to vector<1x4x128xf32>
    tpu.vector_store %arg18[%c0_141, %c0_142, %c0_143], %427 {strides = array<i32>} : memref<1x4x128xf32, #tpu.memory_space<vmem>>, vector<1x4x128xf32>,
    return
  }
  func.func @transform_0(%arg0: i32) -> (i32, i32) {
    %c0_i32 = arith.constant 0 : i32
    %c0_i32_0 = arith.constant 0 : i32
    return %arg0, %c0_i32 : i32, i32
  }
  func.func @transform_1(%arg0: i32) -> (i32, i32) {
    %c0_i32 = arith.constant 0 : i32
    %c0_i32_0 = arith.constant 0 : i32
    %c0_i32_1 = arith.constant 0 : i32
    return %c0_i32, %c0_i32_0 : i32, i32
  }
  func.func @transform_2(%arg0: i32) -> (i32, i32) {
    %c0_i32 = arith.constant 0 : i32
    %c0_i32_0 = arith.constant 0 : i32
    %c0_i32_1 = arith.constant 0 : i32
    return %c0_i32, %c0_i32_0 : i32, i32
  }
  func.func @transform_3(%arg0: i32) -> (i32, i32) {
    %c0_i32 = arith.constant 0 : i32
    %c0_i32_0 = arith.constant 0 : i32
    %c0_i32_1 = arith.constant 0 : i32
    return %c0_i32, %c0_i32_0 : i32, i32
  }
  func.func @transform_4(%arg0: i32) -> (i32, i32) {
    %c0_i32 = arith.constant 0 : i32
    %c0_i32_0 = arith.constant 0 : i32
    %c0_i32_1 = arith.constant 0 : i32
    return %c0_i32, %c0_i32_0 : i32, i32
  }
  func.func @transform_5(%arg0: i32) -> (i32, i32) {
    %c0_i32 = arith.constant 0 : i32
    %c0_i32_0 = arith.constant 0 : i32
    %c0_i32_1 = arith.constant 0 : i32
    return %c0_i32, %c0_i32_0 : i32, i32
  }
  func.func @transform_6(%arg0: i32) -> (i32, i32) {
    %c0_i32 = arith.constant 0 : i32
    %c0_i32_0 = arith.constant 0 : i32
    %c0_i32_1 = arith.constant 0 : i32
    return %c0_i32, %c0_i32_0 : i32, i32
  }
  func.func @transform_7(%arg0: i32) -> (i32, i32, i32) {
    %c0_i32 = arith.constant 0 : i32
    %c0_i32_0 = arith.constant 0 : i32
    %c0_i32_1 = arith.constant 0 : i32
    %c0_i32_2 = arith.constant 0 : i32
    return %c0_i32, %c0_i32_0, %c0_i32_1 : i32, i32, i32
  }
  func.func @transform_8(%arg0: i32) -> (i32, i32, i32) {
    %c0_i32 = arith.constant 0 : i32
    %c0_i32_0 = arith.constant 0 : i32
    %c0_i32_1 = arith.constant 0 : i32
    %c0_i32_2 = arith.constant 0 : i32
    return %c0_i32, %c0_i32_0, %c0_i32_1 : i32, i32, i32
  }
  func.func @transform_9(%arg0: i32) -> (i32, i32, i32) {
    %c0_i32 = arith.constant 0 : i32
    %c0_i32_0 = arith.constant 0 : i32
    %c0_i32_1 = arith.constant 0 : i32
    %c0_i32_2 = arith.constant 0 : i32
    return %c0_i32, %c0_i32_0, %c0_i32_1 : i32, i32, i32
  }
  func.func @transform_10(%arg0: i32) -> (i32, i32, i32) {
    %c0_i32 = arith.constant 0 : i32
    %c0_i32_0 = arith.constant 0 : i32
    %c0_i32_1 = arith.constant 0 : i32
    %c0_i32_2 = arith.constant 0 : i32
    return %c0_i32, %c0_i32_0, %c0_i32_1 : i32, i32, i32
  }
  func.func @transform_11(%arg0: i32) -> (i32, i32, i32) {
    %c0_i32 = arith.constant 0 : i32
    %c0_i32_0 = arith.constant 0 : i32
    %c0_i32_1 = arith.constant 0 : i32
    %c0_i32_2 = arith.constant 0 : i32
    return %c0_i32, %c0_i32_0, %c0_i32_1 : i32, i32, i32
  }
  func.func @transform_12(%arg0: i32) -> (i32, i32, i32) {
    %c0_i32 = arith.constant 0 : i32
    %c0_i32_0 = arith.constant 0 : i32
    %c0_i32_1 = arith.constant 0 : i32
    %c0_i32_2 = arith.constant 0 : i32
    return %c0_i32, %c0_i32_0, %c0_i32_1 : i32, i32, i32
  }
  func.func @transform_13(%arg0: i32) -> (i32, i32, i32) {
    %c0_i32 = arith.constant 0 : i32
    %c0_i32_0 = arith.constant 0 : i32
    %c0_i32_1 = arith.constant 0 : i32
    %c0_i32_2 = arith.constant 0 : i32
    return %c0_i32, %c0_i32_0, %c0_i32_1 : i32, i32, i32
  }
  func.func @transform_14(%arg0: i32) -> (i32, i32) {
    %c0_i32 = arith.constant 0 : i32
    %c0_i32_0 = arith.constant 0 : i32
    %c0_i32_1 = arith.constant 0 : i32
    return %c0_i32, %c0_i32_0 : i32, i32
  }
  func.func @transform_15(%arg0: i32) -> (i32, i32) {
    %c0_i32 = arith.constant 0 : i32
    %c0_i32_0 = arith.constant 0 : i32
    %c0_i32_1 = arith.constant 0 : i32
    return %c0_i32, %c0_i32_0 : i32, i32
  }
  func.func @transform_16(%arg0: i32) -> (i32, i32) {
    %c0_i32 = arith.constant 0 : i32
    %c0_i32_0 = arith.constant 0 : i32
    %c0_i32_1 = arith.constant 0 : i32
    return %c0_i32, %c0_i32_0 : i32, i32
  }
  func.func @transform_17(%arg0: i32) -> (i32, i32, i32) {
    %c0_i32 = arith.constant 0 : i32
    %c0_i32_0 = arith.constant 0 : i32
    %c0_i32_1 = arith.constant 0 : i32
    return %arg0, %c0_i32, %c0_i32_0 : i32, i32, i32
  }
}

module attributes {stable_mosaic.version = 11 : i64} {
  func.func @_lstm_head_kernel(%arg0: i32, %arg1: memref<8x128xf32, #tpu.memory_space<vmem>>, %arg2: memref<128x128xbf16, #tpu.memory_space<vmem>>, %arg3: memref<1x32x128xbf16, #tpu.memory_space<vmem>>, %arg4: memref<2x32x128xbf16, #tpu.memory_space<vmem>>, %arg5: memref<2x1x128xf32, #tpu.memory_space<vmem>>, %arg6: memref<2x1x32xf32, #tpu.memory_space<vmem>>, %arg7: memref<2x1x32xf32, #tpu.memory_space<vmem>>, %arg8: memref<32x128xbf16, #tpu.memory_space<vmem>>, %arg9: memref<1x128xf32, #tpu.memory_space<vmem>>, %arg10: memref<2x128xf32, #tpu.memory_space<vmem>>) attributes {dimension_semantics = [#tpu.dimension_semantics<arbitrary>], iteration_bounds = array<i64: 1>, scalar_prefetch = 0 : i64, scratch_operands = 0 : i64, tpu.core_type = #tpu.core_type<tc>, window_params = [{pipeline_mode = #tpu.pipeline_mode<synchronous>, transform_indices = @transform_0, window_bounds = array<i64: 8, 128>}, {pipeline_mode = #tpu.pipeline_mode<synchronous>, transform_indices = @transform_1, window_bounds = array<i64: 128, 128>}, {pipeline_mode = #tpu.pipeline_mode<synchronous>, transform_indices = @transform_2, window_bounds = array<i64: 1, 32, 128>}, {pipeline_mode = #tpu.pipeline_mode<synchronous>, transform_indices = @transform_3, window_bounds = array<i64: 2, 32, 128>}, {pipeline_mode = #tpu.pipeline_mode<synchronous>, transform_indices = @transform_4, window_bounds = array<i64: 2, 1, 128>}, {pipeline_mode = #tpu.pipeline_mode<synchronous>, transform_indices = @transform_5, window_bounds = array<i64: 2, 1, 32>}, {pipeline_mode = #tpu.pipeline_mode<synchronous>, transform_indices = @transform_6, window_bounds = array<i64: 2, 1, 32>}, {pipeline_mode = #tpu.pipeline_mode<synchronous>, transform_indices = @transform_7, window_bounds = array<i64: 32, 128>}, {pipeline_mode = #tpu.pipeline_mode<synchronous>, transform_indices = @transform_8, window_bounds = array<i64: 1, 128>}, {pipeline_mode = #tpu.pipeline_mode<synchronous>, transform_indices = @transform_9, window_bounds = array<i64: 2, 128>}]} {
    %c0 = arith.constant 0 : index
    %c0_0 = arith.constant 0 : index
    %0 = vector.load %arg1[%c0, %c0_0] : memref<8x128xf32, #tpu.memory_space<vmem>>, vector<8x128xf32>
    %c0_1 = arith.constant 0 : index
    %c0_2 = arith.constant 0 : index
    %1 = vector.load %arg2[%c0_1, %c0_2] : memref<128x128xbf16, #tpu.memory_space<vmem>>, vector<128x128xbf16>
    %c0_3 = arith.constant 0 : index
    %c0_4 = arith.constant 0 : index
    %c0_5 = arith.constant 0 : index
    %2 = vector.load %arg4[%c0_3, %c0_4, %c0_5] : memref<2x32x128xbf16, #tpu.memory_space<vmem>>, vector<1x32x128xbf16>
    %3 = vector.shape_cast %2 : vector<1x32x128xbf16> to vector<32x128xbf16>
    %c0_6 = arith.constant 0 : index
    %c0_7 = arith.constant 0 : index
    %c0_8 = arith.constant 0 : index
    %4 = vector.load %arg5[%c0_6, %c0_7, %c0_8] : memref<2x1x128xf32, #tpu.memory_space<vmem>>, vector<1x1x128xf32>
    %5 = vector.shape_cast %4 : vector<1x1x128xf32> to vector<1x128xf32>
    %6 = arith.truncf %0 : vector<8x128xf32> to vector<8x128xbf16>
    %cst = arith.constant dense<0.000000e+00> : vector<8x128xf32>
    %7 = tpu.matmul %6, %1, %cst {dimension_numbers = #tpu.dot_dimension_numbers<[1], [0], [0], [1], [0, 0, 1, 1], [], []>} : vector<8x128xbf16>, vector<128x128xbf16>, vector<8x128xf32> -> vector<8x128xf32>
    %8 = vector.broadcast %5 : vector<1x128xf32> to vector<8x128xf32>
    %9 = arith.addf %7, %8 : vector<8x128xf32>
    %c0_9 = arith.constant 0 : index
    %c0_10 = arith.constant 0 : index
    %c0_11 = arith.constant 0 : index
    %10 = vector.load %arg6[%c0_9, %c0_10, %c0_11] : memref<2x1x32xf32, #tpu.memory_space<vmem>>, vector<1x1x32xf32>
    %11 = vector.shape_cast %10 : vector<1x1x32xf32> to vector<1x32xf32>
    %12 = vector.shape_cast %11 : vector<1x32xf32> to vector<1x32xf32>
    %13 = vector.broadcast %12 : vector<1x32xf32> to vector<2x32xf32>
    %c0_12 = arith.constant 0 : index
    %c0_13 = arith.constant 0 : index
    %c0_14 = arith.constant 0 : index
    %14 = vector.load %arg7[%c0_12, %c0_13, %c0_14] : memref<2x1x32xf32, #tpu.memory_space<vmem>>, vector<1x1x32xf32>
    %15 = vector.shape_cast %14 : vector<1x1x32xf32> to vector<1x32xf32>
    %16 = vector.shape_cast %15 : vector<1x32xf32> to vector<1x32xf32>
    %17 = vector.broadcast %16 : vector<1x32xf32> to vector<2x32xf32>
    %18 = vector.extract_strided_slice %9 {offsets = [0, 0], sizes = [2, 128], strides = [1, 1]} : vector<8x128xf32> to vector<2x128xf32>
    %19 = arith.truncf %13 : vector<2x32xf32> to vector<2x32xbf16>
    %cst_15 = arith.constant dense<0.000000e+00> : vector<2x128xf32>
    %20 = tpu.matmul %19, %3, %cst_15 {dimension_numbers = #tpu.dot_dimension_numbers<[1], [0], [0], [1], [0, 0, 1, 1], [], []>} : vector<2x32xbf16>, vector<32x128xbf16>, vector<2x128xf32> -> vector<2x128xf32>
    %21 = arith.addf %18, %20 : vector<2x128xf32>
    %22 = vector.extract_strided_slice %21 {offsets = [0, 0], sizes = [2, 32], strides = [1, 1]} : vector<2x128xf32> to vector<2x32xf32>
    %23 = arith.negf %22 : vector<2x32xf32>
    %24 = math.exp %23 : vector<2x32xf32>
    %cst_16 = arith.constant 1.000000e+00 : f32
    %25 = vector.broadcast %cst_16 : f32 to vector<2x32xf32>
    %26 = arith.addf %25, %24 : vector<2x32xf32>
    %27 = arith.divf %25, %26 : vector<2x32xf32>
    %28 = vector.extract_strided_slice %21 {offsets = [0, 32], sizes = [2, 32], strides = [1, 1]} : vector<2x128xf32> to vector<2x32xf32>
    %29 = arith.negf %28 : vector<2x32xf32>
    %30 = math.exp %29 : vector<2x32xf32>
    %cst_17 = arith.constant 1.000000e+00 : f32
    %31 = vector.broadcast %cst_17 : f32 to vector<2x32xf32>
    %32 = arith.addf %31, %30 : vector<2x32xf32>
    %33 = arith.divf %31, %32 : vector<2x32xf32>
    %34 = vector.extract_strided_slice %21 {offsets = [0, 64], sizes = [2, 32], strides = [1, 1]} : vector<2x128xf32> to vector<2x32xf32>
    %35 = math.tanh %34 : vector<2x32xf32>
    %36 = vector.extract_strided_slice %21 {offsets = [0, 96], sizes = [2, 32], strides = [1, 1]} : vector<2x128xf32> to vector<2x32xf32>
    %37 = arith.negf %36 : vector<2x32xf32>
    %38 = math.exp %37 : vector<2x32xf32>
    %cst_18 = arith.constant 1.000000e+00 : f32
    %39 = vector.broadcast %cst_18 : f32 to vector<2x32xf32>
    %40 = arith.addf %39, %38 : vector<2x32xf32>
    %41 = arith.divf %39, %40 : vector<2x32xf32>
    %42 = arith.mulf %33, %17 : vector<2x32xf32>
    %43 = arith.mulf %27, %35 : vector<2x32xf32>
    %44 = arith.addf %42, %43 : vector<2x32xf32>
    %45 = math.tanh %44 : vector<2x32xf32>
    %46 = arith.mulf %41, %45 : vector<2x32xf32>
    %47 = vector.extract_strided_slice %9 {offsets = [2, 0], sizes = [2, 128], strides = [1, 1]} : vector<8x128xf32> to vector<2x128xf32>
    %48 = arith.truncf %46 : vector<2x32xf32> to vector<2x32xbf16>
    %cst_19 = arith.constant dense<0.000000e+00> : vector<2x128xf32>
    %49 = tpu.matmul %48, %3, %cst_19 {dimension_numbers = #tpu.dot_dimension_numbers<[1], [0], [0], [1], [0, 0, 1, 1], [], []>} : vector<2x32xbf16>, vector<32x128xbf16>, vector<2x128xf32> -> vector<2x128xf32>
    %50 = arith.addf %47, %49 : vector<2x128xf32>
    %51 = vector.extract_strided_slice %50 {offsets = [0, 0], sizes = [2, 32], strides = [1, 1]} : vector<2x128xf32> to vector<2x32xf32>
    %52 = arith.negf %51 : vector<2x32xf32>
    %53 = math.exp %52 : vector<2x32xf32>
    %cst_20 = arith.constant 1.000000e+00 : f32
    %54 = vector.broadcast %cst_20 : f32 to vector<2x32xf32>
    %55 = arith.addf %54, %53 : vector<2x32xf32>
    %56 = arith.divf %54, %55 : vector<2x32xf32>
    %57 = vector.extract_strided_slice %50 {offsets = [0, 32], sizes = [2, 32], strides = [1, 1]} : vector<2x128xf32> to vector<2x32xf32>
    %58 = arith.negf %57 : vector<2x32xf32>
    %59 = math.exp %58 : vector<2x32xf32>
    %cst_21 = arith.constant 1.000000e+00 : f32
    %60 = vector.broadcast %cst_21 : f32 to vector<2x32xf32>
    %61 = arith.addf %60, %59 : vector<2x32xf32>
    %62 = arith.divf %60, %61 : vector<2x32xf32>
    %63 = vector.extract_strided_slice %50 {offsets = [0, 64], sizes = [2, 32], strides = [1, 1]} : vector<2x128xf32> to vector<2x32xf32>
    %64 = math.tanh %63 : vector<2x32xf32>
    %65 = vector.extract_strided_slice %50 {offsets = [0, 96], sizes = [2, 32], strides = [1, 1]} : vector<2x128xf32> to vector<2x32xf32>
    %66 = arith.negf %65 : vector<2x32xf32>
    %67 = math.exp %66 : vector<2x32xf32>
    %cst_22 = arith.constant 1.000000e+00 : f32
    %68 = vector.broadcast %cst_22 : f32 to vector<2x32xf32>
    %69 = arith.addf %68, %67 : vector<2x32xf32>
    %70 = arith.divf %68, %69 : vector<2x32xf32>
    %71 = arith.mulf %62, %44 : vector<2x32xf32>
    %72 = arith.mulf %56, %64 : vector<2x32xf32>
    %73 = arith.addf %71, %72 : vector<2x32xf32>
    %74 = math.tanh %73 : vector<2x32xf32>
    %75 = arith.mulf %70, %74 : vector<2x32xf32>
    %76 = vector.extract_strided_slice %9 {offsets = [4, 0], sizes = [2, 128], strides = [1, 1]} : vector<8x128xf32> to vector<2x128xf32>
    %77 = arith.truncf %75 : vector<2x32xf32> to vector<2x32xbf16>
    %cst_23 = arith.constant dense<0.000000e+00> : vector<2x128xf32>
    %78 = tpu.matmul %77, %3, %cst_23 {dimension_numbers = #tpu.dot_dimension_numbers<[1], [0], [0], [1], [0, 0, 1, 1], [], []>} : vector<2x32xbf16>, vector<32x128xbf16>, vector<2x128xf32> -> vector<2x128xf32>
    %79 = arith.addf %76, %78 : vector<2x128xf32>
    %80 = vector.extract_strided_slice %79 {offsets = [0, 0], sizes = [2, 32], strides = [1, 1]} : vector<2x128xf32> to vector<2x32xf32>
    %81 = arith.negf %80 : vector<2x32xf32>
    %82 = math.exp %81 : vector<2x32xf32>
    %cst_24 = arith.constant 1.000000e+00 : f32
    %83 = vector.broadcast %cst_24 : f32 to vector<2x32xf32>
    %84 = arith.addf %83, %82 : vector<2x32xf32>
    %85 = arith.divf %83, %84 : vector<2x32xf32>
    %86 = vector.extract_strided_slice %79 {offsets = [0, 32], sizes = [2, 32], strides = [1, 1]} : vector<2x128xf32> to vector<2x32xf32>
    %87 = arith.negf %86 : vector<2x32xf32>
    %88 = math.exp %87 : vector<2x32xf32>
    %cst_25 = arith.constant 1.000000e+00 : f32
    %89 = vector.broadcast %cst_25 : f32 to vector<2x32xf32>
    %90 = arith.addf %89, %88 : vector<2x32xf32>
    %91 = arith.divf %89, %90 : vector<2x32xf32>
    %92 = vector.extract_strided_slice %79 {offsets = [0, 64], sizes = [2, 32], strides = [1, 1]} : vector<2x128xf32> to vector<2x32xf32>
    %93 = math.tanh %92 : vector<2x32xf32>
    %94 = vector.extract_strided_slice %79 {offsets = [0, 96], sizes = [2, 32], strides = [1, 1]} : vector<2x128xf32> to vector<2x32xf32>
    %95 = arith.negf %94 : vector<2x32xf32>
    %96 = math.exp %95 : vector<2x32xf32>
    %cst_26 = arith.constant 1.000000e+00 : f32
    %97 = vector.broadcast %cst_26 : f32 to vector<2x32xf32>
    %98 = arith.addf %97, %96 : vector<2x32xf32>
    %99 = arith.divf %97, %98 : vector<2x32xf32>
    %100 = arith.mulf %91, %73 : vector<2x32xf32>
    %101 = arith.mulf %85, %93 : vector<2x32xf32>
    %102 = arith.addf %100, %101 : vector<2x32xf32>
    %103 = math.tanh %102 : vector<2x32xf32>
    %104 = arith.mulf %99, %103 : vector<2x32xf32>
    %105 = vector.extract_strided_slice %9 {offsets = [6, 0], sizes = [2, 128], strides = [1, 1]} : vector<8x128xf32> to vector<2x128xf32>
    %106 = arith.truncf %104 : vector<2x32xf32> to vector<2x32xbf16>
    %cst_27 = arith.constant dense<0.000000e+00> : vector<2x128xf32>
    %107 = tpu.matmul %106, %3, %cst_27 {dimension_numbers = #tpu.dot_dimension_numbers<[1], [0], [0], [1], [0, 0, 1, 1], [], []>} : vector<2x32xbf16>, vector<32x128xbf16>, vector<2x128xf32> -> vector<2x128xf32>
    %108 = arith.addf %105, %107 : vector<2x128xf32>
    %109 = vector.extract_strided_slice %108 {offsets = [0, 0], sizes = [2, 32], strides = [1, 1]} : vector<2x128xf32> to vector<2x32xf32>
    %110 = arith.negf %109 : vector<2x32xf32>
    %111 = math.exp %110 : vector<2x32xf32>
    %cst_28 = arith.constant 1.000000e+00 : f32
    %112 = vector.broadcast %cst_28 : f32 to vector<2x32xf32>
    %113 = arith.addf %112, %111 : vector<2x32xf32>
    %114 = arith.divf %112, %113 : vector<2x32xf32>
    %115 = vector.extract_strided_slice %108 {offsets = [0, 32], sizes = [2, 32], strides = [1, 1]} : vector<2x128xf32> to vector<2x32xf32>
    %116 = arith.negf %115 : vector<2x32xf32>
    %117 = math.exp %116 : vector<2x32xf32>
    %cst_29 = arith.constant 1.000000e+00 : f32
    %118 = vector.broadcast %cst_29 : f32 to vector<2x32xf32>
    %119 = arith.addf %118, %117 : vector<2x32xf32>
    %120 = arith.divf %118, %119 : vector<2x32xf32>
    %121 = vector.extract_strided_slice %108 {offsets = [0, 64], sizes = [2, 32], strides = [1, 1]} : vector<2x128xf32> to vector<2x32xf32>
    %122 = math.tanh %121 : vector<2x32xf32>
    %123 = vector.extract_strided_slice %108 {offsets = [0, 96], sizes = [2, 32], strides = [1, 1]} : vector<2x128xf32> to vector<2x32xf32>
    %124 = arith.negf %123 : vector<2x32xf32>
    %125 = math.exp %124 : vector<2x32xf32>
    %cst_30 = arith.constant 1.000000e+00 : f32
    %126 = vector.broadcast %cst_30 : f32 to vector<2x32xf32>
    %127 = arith.addf %126, %125 : vector<2x32xf32>
    %128 = arith.divf %126, %127 : vector<2x32xf32>
    %129 = arith.mulf %120, %102 : vector<2x32xf32>
    %130 = arith.mulf %114, %122 : vector<2x32xf32>
    %131 = arith.addf %129, %130 : vector<2x32xf32>
    %132 = math.tanh %131 : vector<2x32xf32>
    %133 = arith.mulf %128, %132 : vector<2x32xf32>
    %134 = tpu.concatenate %46, %75, %104, %133 in 0 : vector<2x32xf32>, vector<2x32xf32>, vector<2x32xf32>, vector<2x32xf32> -> vector<8x32xf32>
    %c0_31 = arith.constant 0 : index
    %c0_32 = arith.constant 0 : index
    %c0_33 = arith.constant 0 : index
    %135 = vector.load %arg3[%c0_31, %c0_32, %c0_33] : memref<1x32x128xbf16, #tpu.memory_space<vmem>>, vector<1x32x128xbf16>
    %136 = vector.shape_cast %135 : vector<1x32x128xbf16> to vector<32x128xbf16>
    %c1 = arith.constant 1 : index
    %c0_34 = arith.constant 0 : index
    %c0_35 = arith.constant 0 : index
    %137 = vector.load %arg4[%c1, %c0_34, %c0_35] : memref<2x32x128xbf16, #tpu.memory_space<vmem>>, vector<1x32x128xbf16>
    %138 = vector.shape_cast %137 : vector<1x32x128xbf16> to vector<32x128xbf16>
    %c1_36 = arith.constant 1 : index
    %c0_37 = arith.constant 0 : index
    %c0_38 = arith.constant 0 : index
    %139 = vector.load %arg5[%c1_36, %c0_37, %c0_38] : memref<2x1x128xf32, #tpu.memory_space<vmem>>, vector<1x1x128xf32>
    %140 = vector.shape_cast %139 : vector<1x1x128xf32> to vector<1x128xf32>
    %141 = arith.truncf %134 : vector<8x32xf32> to vector<8x32xbf16>
    %cst_39 = arith.constant dense<0.000000e+00> : vector<8x128xf32>
    %142 = tpu.matmul %141, %136, %cst_39 {dimension_numbers = #tpu.dot_dimension_numbers<[1], [0], [0], [1], [0, 0, 1, 1], [], []>} : vector<8x32xbf16>, vector<32x128xbf16>, vector<8x128xf32> -> vector<8x128xf32>
    %143 = vector.broadcast %140 : vector<1x128xf32> to vector<8x128xf32>
    %144 = arith.addf %142, %143 : vector<8x128xf32>
    %c1_40 = arith.constant 1 : index
    %c0_41 = arith.constant 0 : index
    %c0_42 = arith.constant 0 : index
    %145 = vector.load %arg6[%c1_40, %c0_41, %c0_42] : memref<2x1x32xf32, #tpu.memory_space<vmem>>, vector<1x1x32xf32>
    %146 = vector.shape_cast %145 : vector<1x1x32xf32> to vector<1x32xf32>
    %147 = vector.shape_cast %146 : vector<1x32xf32> to vector<1x32xf32>
    %148 = vector.broadcast %147 : vector<1x32xf32> to vector<2x32xf32>
    %c1_43 = arith.constant 1 : index
    %c0_44 = arith.constant 0 : index
    %c0_45 = arith.constant 0 : index
    %149 = vector.load %arg7[%c1_43, %c0_44, %c0_45] : memref<2x1x32xf32, #tpu.memory_space<vmem>>, vector<1x1x32xf32>
    %150 = vector.shape_cast %149 : vector<1x1x32xf32> to vector<1x32xf32>
    %151 = vector.shape_cast %150 : vector<1x32xf32> to vector<1x32xf32>
    %152 = vector.broadcast %151 : vector<1x32xf32> to vector<2x32xf32>
    %153 = vector.extract_strided_slice %144 {offsets = [0, 0], sizes = [2, 128], strides = [1, 1]} : vector<8x128xf32> to vector<2x128xf32>
    %154 = arith.truncf %148 : vector<2x32xf32> to vector<2x32xbf16>
    %cst_46 = arith.constant dense<0.000000e+00> : vector<2x128xf32>
    %155 = tpu.matmul %154, %138, %cst_46 {dimension_numbers = #tpu.dot_dimension_numbers<[1], [0], [0], [1], [0, 0, 1, 1], [], []>} : vector<2x32xbf16>, vector<32x128xbf16>, vector<2x128xf32> -> vector<2x128xf32>
    %156 = arith.addf %153, %155 : vector<2x128xf32>
    %157 = vector.extract_strided_slice %156 {offsets = [0, 0], sizes = [2, 32], strides = [1, 1]} : vector<2x128xf32> to vector<2x32xf32>
    %158 = arith.negf %157 : vector<2x32xf32>
    %159 = math.exp %158 : vector<2x32xf32>
    %cst_47 = arith.constant 1.000000e+00 : f32
    %160 = vector.broadcast %cst_47 : f32 to vector<2x32xf32>
    %161 = arith.addf %160, %159 : vector<2x32xf32>
    %162 = arith.divf %160, %161 : vector<2x32xf32>
    %163 = vector.extract_strided_slice %156 {offsets = [0, 32], sizes = [2, 32], strides = [1, 1]} : vector<2x128xf32> to vector<2x32xf32>
    %164 = arith.negf %163 : vector<2x32xf32>
    %165 = math.exp %164 : vector<2x32xf32>
    %cst_48 = arith.constant 1.000000e+00 : f32
    %166 = vector.broadcast %cst_48 : f32 to vector<2x32xf32>
    %167 = arith.addf %166, %165 : vector<2x32xf32>
    %168 = arith.divf %166, %167 : vector<2x32xf32>
    %169 = vector.extract_strided_slice %156 {offsets = [0, 64], sizes = [2, 32], strides = [1, 1]} : vector<2x128xf32> to vector<2x32xf32>
    %170 = math.tanh %169 : vector<2x32xf32>
    %171 = vector.extract_strided_slice %156 {offsets = [0, 96], sizes = [2, 32], strides = [1, 1]} : vector<2x128xf32> to vector<2x32xf32>
    %172 = arith.negf %171 : vector<2x32xf32>
    %173 = math.exp %172 : vector<2x32xf32>
    %cst_49 = arith.constant 1.000000e+00 : f32
    %174 = vector.broadcast %cst_49 : f32 to vector<2x32xf32>
    %175 = arith.addf %174, %173 : vector<2x32xf32>
    %176 = arith.divf %174, %175 : vector<2x32xf32>
    %177 = arith.mulf %168, %152 : vector<2x32xf32>
    %178 = arith.mulf %162, %170 : vector<2x32xf32>
    %179 = arith.addf %177, %178 : vector<2x32xf32>
    %180 = math.tanh %179 : vector<2x32xf32>
    %181 = arith.mulf %176, %180 : vector<2x32xf32>
    %182 = vector.extract_strided_slice %144 {offsets = [2, 0], sizes = [2, 128], strides = [1, 1]} : vector<8x128xf32> to vector<2x128xf32>
    %183 = arith.truncf %181 : vector<2x32xf32> to vector<2x32xbf16>
    %cst_50 = arith.constant dense<0.000000e+00> : vector<2x128xf32>
    %184 = tpu.matmul %183, %138, %cst_50 {dimension_numbers = #tpu.dot_dimension_numbers<[1], [0], [0], [1], [0, 0, 1, 1], [], []>} : vector<2x32xbf16>, vector<32x128xbf16>, vector<2x128xf32> -> vector<2x128xf32>
    %185 = arith.addf %182, %184 : vector<2x128xf32>
    %186 = vector.extract_strided_slice %185 {offsets = [0, 0], sizes = [2, 32], strides = [1, 1]} : vector<2x128xf32> to vector<2x32xf32>
    %187 = arith.negf %186 : vector<2x32xf32>
    %188 = math.exp %187 : vector<2x32xf32>
    %cst_51 = arith.constant 1.000000e+00 : f32
    %189 = vector.broadcast %cst_51 : f32 to vector<2x32xf32>
    %190 = arith.addf %189, %188 : vector<2x32xf32>
    %191 = arith.divf %189, %190 : vector<2x32xf32>
    %192 = vector.extract_strided_slice %185 {offsets = [0, 32], sizes = [2, 32], strides = [1, 1]} : vector<2x128xf32> to vector<2x32xf32>
    %193 = arith.negf %192 : vector<2x32xf32>
    %194 = math.exp %193 : vector<2x32xf32>
    %cst_52 = arith.constant 1.000000e+00 : f32
    %195 = vector.broadcast %cst_52 : f32 to vector<2x32xf32>
    %196 = arith.addf %195, %194 : vector<2x32xf32>
    %197 = arith.divf %195, %196 : vector<2x32xf32>
    %198 = vector.extract_strided_slice %185 {offsets = [0, 64], sizes = [2, 32], strides = [1, 1]} : vector<2x128xf32> to vector<2x32xf32>
    %199 = math.tanh %198 : vector<2x32xf32>
    %200 = vector.extract_strided_slice %185 {offsets = [0, 96], sizes = [2, 32], strides = [1, 1]} : vector<2x128xf32> to vector<2x32xf32>
    %201 = arith.negf %200 : vector<2x32xf32>
    %202 = math.exp %201 : vector<2x32xf32>
    %cst_53 = arith.constant 1.000000e+00 : f32
    %203 = vector.broadcast %cst_53 : f32 to vector<2x32xf32>
    %204 = arith.addf %203, %202 : vector<2x32xf32>
    %205 = arith.divf %203, %204 : vector<2x32xf32>
    %206 = arith.mulf %197, %179 : vector<2x32xf32>
    %207 = arith.mulf %191, %199 : vector<2x32xf32>
    %208 = arith.addf %206, %207 : vector<2x32xf32>
    %209 = math.tanh %208 : vector<2x32xf32>
    %210 = arith.mulf %205, %209 : vector<2x32xf32>
    %211 = vector.extract_strided_slice %144 {offsets = [4, 0], sizes = [2, 128], strides = [1, 1]} : vector<8x128xf32> to vector<2x128xf32>
    %212 = arith.truncf %210 : vector<2x32xf32> to vector<2x32xbf16>
    %cst_54 = arith.constant dense<0.000000e+00> : vector<2x128xf32>
    %213 = tpu.matmul %212, %138, %cst_54 {dimension_numbers = #tpu.dot_dimension_numbers<[1], [0], [0], [1], [0, 0, 1, 1], [], []>} : vector<2x32xbf16>, vector<32x128xbf16>, vector<2x128xf32> -> vector<2x128xf32>
    %214 = arith.addf %211, %213 : vector<2x128xf32>
    %215 = vector.extract_strided_slice %214 {offsets = [0, 0], sizes = [2, 32], strides = [1, 1]} : vector<2x128xf32> to vector<2x32xf32>
    %216 = arith.negf %215 : vector<2x32xf32>
    %217 = math.exp %216 : vector<2x32xf32>
    %cst_55 = arith.constant 1.000000e+00 : f32
    %218 = vector.broadcast %cst_55 : f32 to vector<2x32xf32>
    %219 = arith.addf %218, %217 : vector<2x32xf32>
    %220 = arith.divf %218, %219 : vector<2x32xf32>
    %221 = vector.extract_strided_slice %214 {offsets = [0, 32], sizes = [2, 32], strides = [1, 1]} : vector<2x128xf32> to vector<2x32xf32>
    %222 = arith.negf %221 : vector<2x32xf32>
    %223 = math.exp %222 : vector<2x32xf32>
    %cst_56 = arith.constant 1.000000e+00 : f32
    %224 = vector.broadcast %cst_56 : f32 to vector<2x32xf32>
    %225 = arith.addf %224, %223 : vector<2x32xf32>
    %226 = arith.divf %224, %225 : vector<2x32xf32>
    %227 = vector.extract_strided_slice %214 {offsets = [0, 64], sizes = [2, 32], strides = [1, 1]} : vector<2x128xf32> to vector<2x32xf32>
    %228 = math.tanh %227 : vector<2x32xf32>
    %229 = vector.extract_strided_slice %214 {offsets = [0, 96], sizes = [2, 32], strides = [1, 1]} : vector<2x128xf32> to vector<2x32xf32>
    %230 = arith.negf %229 : vector<2x32xf32>
    %231 = math.exp %230 : vector<2x32xf32>
    %cst_57 = arith.constant 1.000000e+00 : f32
    %232 = vector.broadcast %cst_57 : f32 to vector<2x32xf32>
    %233 = arith.addf %232, %231 : vector<2x32xf32>
    %234 = arith.divf %232, %233 : vector<2x32xf32>
    %235 = arith.mulf %226, %208 : vector<2x32xf32>
    %236 = arith.mulf %220, %228 : vector<2x32xf32>
    %237 = arith.addf %235, %236 : vector<2x32xf32>
    %238 = math.tanh %237 : vector<2x32xf32>
    %239 = arith.mulf %234, %238 : vector<2x32xf32>
    %240 = vector.extract_strided_slice %144 {offsets = [6, 0], sizes = [2, 128], strides = [1, 1]} : vector<8x128xf32> to vector<2x128xf32>
    %241 = arith.truncf %239 : vector<2x32xf32> to vector<2x32xbf16>
    %cst_58 = arith.constant dense<0.000000e+00> : vector<2x128xf32>
    %242 = tpu.matmul %241, %138, %cst_58 {dimension_numbers = #tpu.dot_dimension_numbers<[1], [0], [0], [1], [0, 0, 1, 1], [], []>} : vector<2x32xbf16>, vector<32x128xbf16>, vector<2x128xf32> -> vector<2x128xf32>
    %243 = arith.addf %240, %242 : vector<2x128xf32>
    %244 = vector.extract_strided_slice %243 {offsets = [0, 0], sizes = [2, 32], strides = [1, 1]} : vector<2x128xf32> to vector<2x32xf32>
    %245 = arith.negf %244 : vector<2x32xf32>
    %246 = math.exp %245 : vector<2x32xf32>
    %cst_59 = arith.constant 1.000000e+00 : f32
    %247 = vector.broadcast %cst_59 : f32 to vector<2x32xf32>
    %248 = arith.addf %247, %246 : vector<2x32xf32>
    %249 = arith.divf %247, %248 : vector<2x32xf32>
    %250 = vector.extract_strided_slice %243 {offsets = [0, 32], sizes = [2, 32], strides = [1, 1]} : vector<2x128xf32> to vector<2x32xf32>
    %251 = arith.negf %250 : vector<2x32xf32>
    %252 = math.exp %251 : vector<2x32xf32>
    %cst_60 = arith.constant 1.000000e+00 : f32
    %253 = vector.broadcast %cst_60 : f32 to vector<2x32xf32>
    %254 = arith.addf %253, %252 : vector<2x32xf32>
    %255 = arith.divf %253, %254 : vector<2x32xf32>
    %256 = vector.extract_strided_slice %243 {offsets = [0, 64], sizes = [2, 32], strides = [1, 1]} : vector<2x128xf32> to vector<2x32xf32>
    %257 = math.tanh %256 : vector<2x32xf32>
    %258 = vector.extract_strided_slice %243 {offsets = [0, 96], sizes = [2, 32], strides = [1, 1]} : vector<2x128xf32> to vector<2x32xf32>
    %259 = arith.negf %258 : vector<2x32xf32>
    %260 = math.exp %259 : vector<2x32xf32>
    %cst_61 = arith.constant 1.000000e+00 : f32
    %261 = vector.broadcast %cst_61 : f32 to vector<2x32xf32>
    %262 = arith.addf %261, %260 : vector<2x32xf32>
    %263 = arith.divf %261, %262 : vector<2x32xf32>
    %264 = arith.mulf %255, %237 : vector<2x32xf32>
    %265 = arith.mulf %249, %257 : vector<2x32xf32>
    %266 = arith.addf %264, %265 : vector<2x32xf32>
    %267 = math.tanh %266 : vector<2x32xf32>
    %268 = arith.mulf %263, %267 : vector<2x32xf32>
    %c0_62 = arith.constant 0 : index
    %c0_63 = arith.constant 0 : index
    %269 = vector.load %arg8[%c0_62, %c0_63] : memref<32x128xbf16, #tpu.memory_space<vmem>>, vector<32x128xbf16>
    %270 = arith.truncf %268 : vector<2x32xf32> to vector<2x32xbf16>
    %cst_64 = arith.constant dense<0.000000e+00> : vector<2x128xf32>
    %271 = tpu.matmul %270, %269, %cst_64 {dimension_numbers = #tpu.dot_dimension_numbers<[1], [0], [0], [1], [0, 0, 1, 1], [], []>} : vector<2x32xbf16>, vector<32x128xbf16>, vector<2x128xf32> -> vector<2x128xf32>
    %c0_65 = arith.constant 0 : index
    %c0_66 = arith.constant 0 : index
    %272 = vector.load %arg9[%c0_65, %c0_66] : memref<1x128xf32, #tpu.memory_space<vmem>>, vector<1x128xf32>
    %273 = vector.broadcast %272 : vector<1x128xf32> to vector<2x128xf32>
    %274 = arith.addf %271, %273 : vector<2x128xf32>
    %cst_67 = arith.constant dense<0xFF800000> : vector<2xf32>
    %275 = vector.multi_reduction <maximumf>, %274, %cst_67 [1] : vector<2x128xf32> to vector<2xf32>
    %276 = vector.shape_cast %275 : vector<2xf32> to vector<2x1xf32>
    %277 = vector.broadcast %276 : vector<2x1xf32> to vector<2x128xf32>
    %278 = arith.subf %274, %277 : vector<2x128xf32>
    %279 = math.exp %278 : vector<2x128xf32>
    %cst_68 = arith.constant dense<0.000000e+00> : vector<2xf32>
    %280 = vector.multi_reduction <add>, %279, %cst_68 [1] : vector<2x128xf32> to vector<2xf32>
    %281 = vector.shape_cast %280 : vector<2xf32> to vector<2x1xf32>
    %282 = vector.broadcast %281 : vector<2x1xf32> to vector<2x128xf32>
    %283 = arith.divf %279, %282 : vector<2x128xf32>
    %c0_69 = arith.constant 0 : index
    %c0_70 = arith.constant 0 : index
    %284 = vector.load %arg10[%c0_69, %c0_70] : memref<2x128xf32, #tpu.memory_space<vmem>>, vector<2x128xf32>
    tpu.vector_store %arg10[%c0_69, %c0_70], %283 {strides = array<i32>} : memref<2x128xf32, #tpu.memory_space<vmem>>, vector<2x128xf32>,
    return
  }
  func.func @transform_0(%arg0: i32) -> (i32, i32) {
    %c0_i32 = arith.constant 0 : i32
    %c0_i32_0 = arith.constant 0 : i32
    %c0_i32_1 = arith.constant 0 : i32
    return %c0_i32, %c0_i32_0 : i32, i32
  }
  func.func @transform_1(%arg0: i32) -> (i32, i32) {
    %c0_i32 = arith.constant 0 : i32
    %c0_i32_0 = arith.constant 0 : i32
    %c0_i32_1 = arith.constant 0 : i32
    return %c0_i32, %c0_i32_0 : i32, i32
  }
  func.func @transform_2(%arg0: i32) -> (i32, i32, i32) {
    %c0_i32 = arith.constant 0 : i32
    %c0_i32_0 = arith.constant 0 : i32
    %c0_i32_1 = arith.constant 0 : i32
    %c0_i32_2 = arith.constant 0 : i32
    return %c0_i32, %c0_i32_0, %c0_i32_1 : i32, i32, i32
  }
  func.func @transform_3(%arg0: i32) -> (i32, i32, i32) {
    %c0_i32 = arith.constant 0 : i32
    %c0_i32_0 = arith.constant 0 : i32
    %c0_i32_1 = arith.constant 0 : i32
    %c0_i32_2 = arith.constant 0 : i32
    return %c0_i32, %c0_i32_0, %c0_i32_1 : i32, i32, i32
  }
  func.func @transform_4(%arg0: i32) -> (i32, i32, i32) {
    %c0_i32 = arith.constant 0 : i32
    %c0_i32_0 = arith.constant 0 : i32
    %c0_i32_1 = arith.constant 0 : i32
    %c0_i32_2 = arith.constant 0 : i32
    return %c0_i32, %c0_i32_0, %c0_i32_1 : i32, i32, i32
  }
  func.func @transform_5(%arg0: i32) -> (i32, i32, i32) {
    %c0_i32 = arith.constant 0 : i32
    %c0_i32_0 = arith.constant 0 : i32
    %c0_i32_1 = arith.constant 0 : i32
    %c0_i32_2 = arith.constant 0 : i32
    return %c0_i32, %c0_i32_0, %c0_i32_1 : i32, i32, i32
  }
  func.func @transform_6(%arg0: i32) -> (i32, i32, i32) {
    %c0_i32 = arith.constant 0 : i32
    %c0_i32_0 = arith.constant 0 : i32
    %c0_i32_1 = arith.constant 0 : i32
    %c0_i32_2 = arith.constant 0 : i32
    return %c0_i32, %c0_i32_0, %c0_i32_1 : i32, i32, i32
  }
  func.func @transform_7(%arg0: i32) -> (i32, i32) {
    %c0_i32 = arith.constant 0 : i32
    %c0_i32_0 = arith.constant 0 : i32
    %c0_i32_1 = arith.constant 0 : i32
    return %c0_i32, %c0_i32_0 : i32, i32
  }
  func.func @transform_8(%arg0: i32) -> (i32, i32) {
    %c0_i32 = arith.constant 0 : i32
    %c0_i32_0 = arith.constant 0 : i32
    %c0_i32_1 = arith.constant 0 : i32
    return %c0_i32, %c0_i32_0 : i32, i32
  }
  func.func @transform_9(%arg0: i32) -> (i32, i32) {
    %c0_i32 = arith.constant 0 : i32
    %c0_i32_0 = arith.constant 0 : i32
    %c0_i32_1 = arith.constant 0 : i32
    return %c0_i32, %c0_i32_0 : i32, i32
  }
}

</mosaic_0001>

<bundles_post_ra>
// kernel: eq.22
= control target key start
LH: loop header
LB: loop body
LE: loop exit
PB: predicated region body
PF: predicated region fallthrough
CT: control target
= control target key end

     0   :  { %s37_s8 = smov 8   ;;  %s38_s9 = smov 16   ;;  %vm7_vm0 = vcmask 64512   ;;  %vm13_vm1 = vcmask 261312   ;;  %vm19_vm2 = vcmask 195712   ;;  %vm25_vm3 = vcmask 130112   ;;  %s55_s0 = inlined_call_operand.vmem [shape: s32[4,8], index: 0, kind: input, shape index: {}]   ;;  %s56_s1 = inlined_call_operand.vmem [shape: s32[32], index: 1, kind: output, shape index: {}]  }
   0x1   :  { %v4_v0 = vld [vmem:[%s55_s0] sm:$0xf]  ;;  %s36_s0 = smov 24  }
   0x2   :  { %5 = vst [vmem:[#allocation1] sm:$0xf] %v4_v0 }
   0x9   :  { %v10_v1 = vld [vmem:[#allocation1 + $0x3] sm:$0x1]   ;;  %v22_v2 = vld [vmem:[#allocation1 + $0x1] sm:$0x1]   ;;  %v16_v3 = vld [vmem:[#allocation1 + $0x2] sm:$0x1]  }
   0xa   :  { %11 = vrot.lane.b32.xlu0 %v10_v1, %s36_s0  ;;  %23 = vrot.lane.b32.xlu1 %v22_v2, %s37_s8  ;;  %v6_v4 = vld [vmem:[#allocation1] sm:$0x1]  }
   0xb   :  { %8 = vst.msk [vmem:[#allocation0] sm:$0x1] %vm7_vm0, %v6_v4  }
  0x12   :  { %17 = vrot.lane.b32.xlu0 %v16_v3, %s38_s9 }
  0x7c   :  { %v12_v5 = vpop.permute.xlu0 %11   ;;  %v24_v6 = vpop.permute.xlu1 %23  }
  0x7d   :  { %14 = vst.msk [vmem:[#allocation0] sm:$0x1] %vm13_vm1, %v12_v5  }
  0x84   :  { %v18_v7 = vpop.permute.xlu0 %17  }
  0x85   :  { %20 = vst.msk [vmem:[#allocation0] sm:$0x1] %vm19_vm2, %v18_v7  }
  0x86   :  { %26 = vst.msk [vmem:[#allocation0] sm:$0x1] %vm25_vm3, %v24_v6  }
  0x8d   :  { %v29_v8 = vld [vmem:[#allocation0] sm:$0x1] }
  0x8e   :  { %32 = vst [vmem:[%s56_s1] sm:$0x1] %v29_v8 }

// kernel: tile.18
= control target key start
LH: loop header
LB: loop body
LE: loop exit
PB: predicated region body
PF: predicated region fallthrough
CT: control target
= control target key end

     0   :  { %s29_s0 = inlined_call_operand.vmem [shape: pred[8], index: 0, kind: input, shape index: {}]   ;;  %s30_s1 = inlined_call_operand.vmem [shape: pred[4,8], index: 1, kind: output, shape index: {}]  }
   0x1   :  { %v4_v0 = vld [vmem:[%s29_s0] ss:$0 sm:$0xff] }
   0x2   :  { %v7_v1 = vand.u32 255, %v4_v0 }
   0x4   :  { %v8_v2 = vpack.c.b16 0, %v7_v1 }
   0x6   :  { %v9_v3 = vpack.c.b8 0, %v8_v2 }
   0x8   :  { %12 = vst [vmem:[%s30_s1] sm:$0x1] %v9_v3 }

// kernel: _lambda_.3
= control target key start
LH: loop header
LB: loop body
LE: loop exit
PB: predicated region body
PF: predicated region fallthrough
CT: control target
= control target key end

     0   :  { %s1201_s0 = inlined_call_operand.vmem [shape: f32[8,128], index: 0, kind: input, shape index: {}]   ;;  %s1202_s1 = inlined_call_operand.vmem [shape: bf16[128,128], index: 1, kind: input, shape index: {}]   ;;  %s1203_s2 = inlined_call_operand.vmem [shape: bf16[1,32,128], index: 2, kind: input, shape index: {}]   ;;  %s1204_s3 = inlined_call_operand.vmem [shape: bf16[2,32,128], index: 3, kind: input, shape index: {}]   ;;  %s1205_s4 = inlined_call_operand.vmem [shape: f32[2,1,128], index: 4, kind: input, shape index: {}]   ;;  %s1206_s5 = inlined_call_operand.vmem [shape: f32[2,1,32], index: 5, kind: input, shape index: {}]   ;;  %s1207_s6 = inlined_call_operand.vmem [shape: f32[2,1,32], index: 6, kind: input, shape index: {}]   ;;  %s1208_s7 = inlined_call_operand.vmem [shape: bf16[32,128], index: 7, kind: input, shape index: {}]   ;;  %s1209_s8 = inlined_call_operand.vmem [shape: f32[1,128], index: 8, kind: input, shape index: {}]   ;;  %s1210_s9 = inlined_call_operand.hbm [shape: f32[2,128], index: 9, kind: output, shape index: {}]  }
   0x1   :  { %v896_v0 = vld [vmem:[%s1202_s1 + $0x38] sm:$0xff]  ;;  %v898_v1 = vld [vmem:[%s1204_s3 + $0x8] sm:$0xff]  ;;  %v895_v2 = vld [vmem:[%s1202_s1 + $0x30] sm:$0xff] }
   0x2   :  { %108 = vmatpush.bf16.msra.mxu0 %v896_v0  ;;  %151 = vmatpush.bf16.msra.mxu1 %v898_v1  ;;  %v897_v3 = vld [vmem:[%s1204_s3] sm:$0xff]  ;;  %v894_v5 = vld [vmem:[%s1202_s1 + $0x28] sm:$0xff] }
   0x3   :  { %v908_v4 = vld [vmem:[%s1206_s5] ss:$0 sm:$0xff]  ;;  %212 = vmatpush.bf16.msra.mxu2 %v898_v1  ;;  %277 = vmatpush.bf16.msra.mxu3 %v898_v1 }
   0x4   :  { %v128_v6 = vpack.c.bf16 %v908_v4, %v908_v4 }
   0x6   :  { %109 = vmatpush.bf16.msra.mxu0 %v895_v2 }
   0x7   :  { %14 = vsyncpa [#allocation3], 0  ;;  %152 = vmatpush.bf16.msra.mxu1 %v897_v3  ;;  %vm141_vm0 = vcmask 261120   ;;  %213 = vmatpush.bf16.msra.mxu2 %v897_v3  ;;  %v893_v7 = vld [vmem:[%s1202_s1 + $0x20] sm:$0xff]  ;;  %v892_v8 = vld [vmem:[%s1202_s1 + $0x18] sm:$0xff]  ;;  %s1010_s15 = smov 32  }
   0x8   :  { %278 = vmatpush.bf16.msra.mxu3 %v897_v3  ;;  %v891_v9 = vld [vmem:[%s1202_s1 + $0x10] sm:$0xff]  ;;  %v890_v10 = vld [vmem:[%s1202_s1 + $0x8] sm:$0xff]  ;;  %v889_v11 = vld [vmem:[%s1202_s1] sm:$0xff]  ;;  %s1009_s1 = smov 64   ;;  %vm393_vm13 = vcmask 1041408   ;;  %vm395_vm14 = vcmask 1043456  }
   0x9   :  { %v34_v12 = vld [vmem:[%s1201_s0] sm:$0xff]  ;;  %s791_s12 = sshll.u32 %s1210_s9, 4  ;;  %s792_s12 = int_to_ptr.hbm [resolvable:$true] %s791_s12 }
   0xa   :  { %110 = vmatpush.bf16.msra.mxu0 %v894_v5  ;;  %840 = vmatmul.msk.bf16.vlgmr.msra.gmra.mxu1 %vm141_vm0, %v128_v6  ;;  %v56_v13 = vpack.c.bf16 %v34_v12, %v34_v12  ;;  %v909_v16 = vld [vmem:[%s1205_s4] ss:$0 sm:$0xff] }
   0xb   :  { %342 = vmatpush.bf16.msrb.mxu1 %v898_v1  ;;  %v910_v22 = vld [vmem:[%s1207_s6] ss:$0 sm:$0xff] }
   0xe   :  { %111 = vmatpush.bf16.msra.mxu0 %v893_v7 }
   0xf   :  { %343 = vmatpush.bf16.msrb.mxu1 %v897_v3 }
  0x12   :  { %112 = vmatpush.bf16.msra.mxu0 %v892_v8 }
  0x16   :  { %113 = vmatpush.bf16.msra.mxu0 %v891_v9 }
  0x1a   :  { %114 = vmatpush.bf16.msra.mxu0 %v890_v10 }
  0x1e   :  { %115 = vmatpush.bf16.msra.mxu0 %v889_v11 }
  0x21   :  { %116 = vmatmul.bf16.vlgmr.msra.gmra.mxu0 %v56_v13 }
  0x87   :  { %v154_v14 = vpop.f32.mrf.mxu1 }
  0x8f   :  { %v156_v15 = vpop.f32.mrf.mxu1 }
  0x9e   :  { %v117_v17 = vpop.f32.mrf.mxu0 }
  0x9f   :  { %v1102_v18 = vadd.f32 %v909_v16, %v117_v17 }
  0xa1   :  { %v158_v19 = vadd.f32 %v154_v14, %v1102_v18 }
  0xa3   :  { %915 = vtanh.f32 %v158_v19  ;;  %v841_v23 = vmul.f32 -1.442695, %v158_v19 }
  0xa5   :  { %917 = vpow2.f32 %v841_v23 }
  0xa6   :  { %v119_v20 = vpop.f32.mrf.mxu0 }
  0xa9   :  { %v916_v21 = vpop.eup %915 }
  0xaa   :  { %184 = vrot.lane.b32.xlu0 %v916_v21, %s1009_s1 }
  0xab   :  { %v918_v24 = vpop.eup %917 }
  0xac   :  { %v162_v25 = vadd.f32 1.0, %v918_v24 }
  0xae   :  { %919 = vrcp.f32 %v162_v25  ;;  %v174_v31 = vand.u32 2147483648, %v162_v25  ;;  %vm168_vm2 = vweird.f32 %v162_v25  ;;  %v172_v32 = vand.u32 2147483647, %v162_v25 }
  0xb0   :  { %v175_v34 = vor.u32 1.1754944e-38, %v174_v31  ;;  %vm173_vm4 = vcmp.eq.f32.partialorder %v172_v32, 8.507059e+37 }
  0xb2   :  { %179 = vrot.lane.b32.xlu0 %v910_v22, %s1010_s15 }
  0xb4   :  { %v920_v26 = vpop.eup %919 }
  0xb5   :  { %v164_v27 = vmul.f32 %v920_v26, %v162_v25  ;;  %vm169_vm1 = vweird.f32 %v920_v26 }
  0xb6   :  { %vm170_vm3 = vmor %vm168_vm2, %vm169_vm1 }
  0xb7   :  { %v165_v28 = vsub.f32 1.0, %v164_v27 }
  0xb9   :  { %v166_v29 = vmul.f32 %v920_v26, %v165_v28 }
  0xbb   :  { %v167_v30 = vadd.f32 %v920_v26, %v166_v29 }
  0xbd   :  { %v171_v33 = vsel %vm170_vm3, %v920_v26, %v167_v30 }
  0xbe   :  { %v176_v36 = vsel %vm173_vm4, %v175_v34, %v171_v33  ;;  %vm397_vm4 = vcmask 1045504  }
 0x11c   :  { %v185_v35 = vpop.permute.xlu0 %184 }
 0x11d   :  { %v187_v37 = vmul.f32 %v185_v35, %v176_v36 }
 0x11f   :  { %189 = vrot.lane.b32.xlu1 %v187_v37, %s1010_s15 }
 0x124   :  { %v180_v38 = vpop.permute.xlu0 %179 }
 0x125   :  { %v182_v39 = vmul.f32 %v180_v38, %v176_v36 }
 0x191   :  { %v190_v40 = vpop.permute.xlu1 %189 }
 0x192   :  { %v192_v41 = vadd.f32 %v190_v40, %v182_v39 }
 0x194   :  { %921 = vtanh.f32 %v192_v41  ;;  %v244_v3 = vrot.slane %v192_v41, 6 }
 0x19a   :  { %v922_v42 = vpop.eup %921 }
 0x19b   :  { %195 = vrot.lane.b32.xlu1 %v922_v42, %s1009_s1 }
 0x20d   :  { %v196_v43 = vpop.permute.xlu1 %195 }
 0x20e   :  { %v1112_v44 = vmul.f32 %v196_v43, %v176_v36 }
 0x210   :  { %v199_v45 = vpack.c.bf16 %v1112_v44, %v1112_v44 }
 0x212   :  { %201 = vrot.lane.b32.xlu2 %v199_v45, %s1010_s15 }
 0x26c   :  { %v202_v46 = vpop.permute.xlu2 %201 }
 0x26d   :  { %842 = vmatmul.msk.bf16.vlgmr.msra.gmra.mxu2 %vm141_vm0, %v202_v46 }
 0x2f0   :  { %v215_v47 = vpop.f32.mrf.mxu2 }
 0x2f1   :  { %v220_v48 = vrot.slane %v215_v47, 6 }
 0x2f3   :  { %v222_v49 = vadd.f32 %v220_v48, %v1102_v18 }
 0x2f5   :  { %923 = vtanh.f32 %v222_v49  ;;  %v843_v52 = vmul.f32 -1.442695, %v222_v49 }
 0x2f7   :  { %925 = vpow2.f32 %v843_v52 }
 0x2f8   :  { %v217_v50 = vpop.f32.mrf.mxu2 }
 0x2fb   :  { %v924_v51 = vpop.eup %923 }
 0x2fc   :  { %248 = vrot.lane.b32.xlu2 %v924_v51, %s1009_s1 }
 0x2fd   :  { %v926_v53 = vpop.eup %925 }
 0x2fe   :  { %v226_v54 = vadd.f32 1.0, %v926_v53 }
 0x300   :  { %927 = vrcp.f32 %v226_v54  ;;  %v238_v60 = vand.u32 2147483648, %v226_v54  ;;  %vm232_vm6 = vweird.f32 %v226_v54  ;;  %v236_v61 = vand.u32 2147483647, %v226_v54 }
 0x302   :  { %v239_v63 = vor.u32 1.1754944e-38, %v238_v60  ;;  %vm237_vm8 = vcmp.eq.f32.partialorder %v236_v61, 8.507059e+37 }
 0x306   :  { %v928_v55 = vpop.eup %927 }
 0x307   :  { %v228_v56 = vmul.f32 %v928_v55, %v226_v54  ;;  %vm233_vm5 = vweird.f32 %v928_v55 }
 0x308   :  { %vm234_vm7 = vmor %vm232_vm6, %vm233_vm5 }
 0x309   :  { %v229_v57 = vsub.f32 1.0, %v228_v56 }
 0x30b   :  { %v230_v58 = vmul.f32 %v928_v55, %v229_v57 }
 0x30d   :  { %v231_v59 = vadd.f32 %v928_v55, %v230_v58 }
 0x30f   :  { %v235_v62 = vsel %vm234_vm7, %v928_v55, %v231_v59 }
 0x310   :  { %v240_v1 = vsel %vm237_vm8, %v239_v63, %v235_v62 }
 0x311   :  { %v246_v4 = vmul.f32 %v244_v3, %v240_v1 }
 0x356   :  { %v249_v0 = vpop.permute.xlu2 %248 }
 0x357   :  { %v251_v2 = vmul.f32 %v249_v0, %v240_v1 }
 0x359   :  { %253 = vrot.lane.b32.xlu0 %v251_v2, %s1010_s15 }
 0x3cb   :  { %v254_v5 = vpop.permute.xlu0 %253 }
 0x3cc   :  { %v256_v6 = vadd.f32 %v254_v5, %v246_v4 }
 0x3ce   :  { %929 = vtanh.f32 %v256_v6  ;;  %v309_v34 = vrot.slane %v256_v6, 6  ;;  %v900_v6 = vld [vmem:[%s1203_s2 + $0x8] sm:$0xff] }
 0x3cf   :  { %438 = vmatpush.bf16.msrb.mxu2 %v900_v6 }
 0x3d4   :  { %v930_v7 = vpop.eup %929 }
 0x3d5   :  { %259 = vrot.lane.b32.xlu1 %v930_v7, %s1009_s1  ;;  %v902_v7 = vld [vmem:[%s1204_s3 + $0x18] sm:$0xff] }
 0x3d6   :  { %476 = vmatpush.bf16.msrb.mxu3 %v902_v7  ;;  %537 = vmatpush.bf16.msra.mxu1 %v902_v7 }
 0x447   :  { %v260_v8 = vpop.permute.xlu1 %259 }
 0x448   :  { %v262_v9 = vmul.f32 %v260_v8, %v240_v1  ;;  %v911_v8 = vld [vmem:[%s1206_s5 + $0x1] ss:$0 sm:$0xff] }
 0x44a   :  { %v263_v10 = vpack.c.bf16 %v262_v9, %v262_v9  ;;  %v394_v41 = vsel %vm393_vm13, %v1112_v44, %v262_v9  ;;  %v901_v9 = vld [vmem:[%s1204_s3 + $0x10] sm:$0xff] }
 0x44b   :  { %477 = vmatpush.bf16.msrb.mxu3 %v901_v9  ;;  %538 = vmatpush.bf16.msra.mxu1 %v901_v9 }
 0x44c   :  { %v265_v11 = vrot.slane %v263_v10, 1  ;;  %v899_v10 = vld [vmem:[%s1203_s2] sm:$0xff] }
 0x44d   :  { %439 = vmatpush.bf16.msrb.mxu2 %v899_v10 }
 0x44e   :  { %266 = vrot.lane.b32.xlu2 %v265_v11, %s1010_s15  ;;  %v454_v11 = vpack.c.bf16 %v911_v8, %v911_v8 }
 0x451   :  { %602 = vmatpush.bf16.msra.mxu2 %v902_v7 }
 0x455   :  { %603 = vmatpush.bf16.msra.mxu2 %v901_v9 }
 0x4a8   :  { %v267_v12 = vpop.permute.xlu2 %266 }
 0x4a9   :  { %844 = vmatmul.msk.bf16.vlgmr.msra.gmra.mxu3 %vm141_vm0, %v267_v12 }
 0x4aa   :  { %667 = vmatpush.bf16.msra.mxu3 %v902_v7 }
 0x4ae   :  { %668 = vmatpush.bf16.msra.mxu3 %v901_v9 }
 0x4b9   :  { %872 = vmatmul.msk.bf16.vlgmr.msrb.gmra.mxu3 %vm141_vm0, %v454_v11 }
 0x52c   :  { %v280_v13 = vpop.f32.mrf.mxu3 }
 0x52d   :  { %v285_v14 = vrot.slane %v280_v13, 4 }
 0x52f   :  { %v287_v15 = vadd.f32 %v285_v14, %v1102_v18 }
 0x531   :  { %931 = vtanh.f32 %v287_v15  ;;  %v845_v19 = vmul.f32 -1.442695, %v287_v15 }
 0x533   :  { %933 = vpow2.f32 %v845_v19 }
 0x534   :  { %v282_v16 = vpop.f32.mrf.mxu3 }
 0x535   :  { %v912_v16 = vld [vmem:[%s1207_s6 + $0x1] ss:$0 sm:$0xff] }
 0x537   :  { %v932_v17 = vpop.eup %931 }
 0x538   :  { %313 = vrot.lane.b32.xlu0 %v932_v17, %s1009_s1 }
 0x539   :  { %v934_v20 = vpop.eup %933 }
 0x53a   :  { %v291_v21 = vadd.f32 1.0, %v934_v20 }
 0x53c   :  { %935 = vrcp.f32 %v291_v21  ;;  %v303_v27 = vand.u32 2147483648, %v291_v21  ;;  %vm297_vm10 = vweird.f32 %v291_v21  ;;  %v301_v28 = vand.u32 2147483647, %v291_v21  ;;  %v479_v17 = vpop.f32.mrf.mxu3 }
 0x53e   :  { %v304_v30 = vor.u32 1.1754944e-38, %v303_v27  ;;  %vm302_vm12 = vcmp.eq.f32.partialorder %v301_v28, 8.507059e+37 }
 0x542   :  { %v936_v22 = vpop.eup %935 }
 0x543   :  { %v293_v23 = vmul.f32 %v936_v22, %v291_v21  ;;  %vm298_vm9 = vweird.f32 %v936_v22  ;;  %v913_v21 = vld [vmem:[%s1205_s4 + $0x1] ss:$0 sm:$0xff] }
 0x544   :  { %vm299_vm11 = vmor %vm297_vm10, %vm298_vm9  ;;  %v481_v20 = vpop.f32.mrf.mxu3 }
 0x545   :  { %v294_v24 = vsub.f32 1.0, %v293_v23 }
 0x547   :  { %v295_v25 = vmul.f32 %v936_v22, %v294_v24 }
 0x549   :  { %v296_v26 = vadd.f32 %v936_v22, %v295_v25 }
 0x54b   :  { %v300_v29 = vsel %vm299_vm11, %v936_v22, %v296_v26 }
 0x54c   :  { %v305_v32 = vsel %vm302_vm12, %v304_v30, %v300_v29 }
 0x54d   :  { %v311_v35 = vmul.f32 %v309_v34, %v305_v32 }
 0x5aa   :  { %v314_v31 = vpop.permute.xlu0 %313 }
 0x5ab   :  { %v316_v33 = vmul.f32 %v314_v31, %v305_v32 }
 0x5ad   :  { %318 = vrot.lane.b32.xlu1 %v316_v33, %s1010_s15 }
 0x61f   :  { %v319_v36 = vpop.permute.xlu1 %318 }
 0x620   :  { %v321_v37 = vadd.f32 %v319_v36, %v311_v35 }
 0x622   :  { %937 = vtanh.f32 %v321_v37  ;;  %v374_v1 = vrot.slane %v321_v37, 6 }
 0x628   :  { %v938_v38 = vpop.eup %937 }
 0x629   :  { %324 = vrot.lane.b32.xlu2 %v938_v38, %s1009_s1 }
 0x683   :  { %v325_v39 = vpop.permute.xlu2 %324 }
 0x684   :  { %v327_v40 = vmul.f32 %v325_v39, %v305_v32 }
 0x686   :  { %v328_v42 = vpack.c.bf16 %v327_v40, %v327_v40  ;;  %v396_v43 = vsel %vm395_vm14, %v394_v41, %v327_v40 }
 0x688   :  { %v330_v45 = vrot.slane %v328_v42, 2 }
 0x68a   :  { %331 = vrot.lane.b32.xlu0 %v330_v45, %s1010_s15 }
 0x6fc   :  { %v332_v46 = vpop.permute.xlu0 %331 }
 0x6fd   :  { %846 = vmatmul.msk.bf16.vlgmr.msrb.gmra.mxu1 %vm141_vm0, %v332_v46 }
 0x77a   :  { %v345_v47 = vpop.f32.mrf.mxu1 }
 0x77b   :  { %v350_v48 = vrot.slane %v345_v47, 2 }
 0x77d   :  { %v352_v49 = vadd.f32 %v350_v48, %v1102_v18 }
 0x77f   :  { %939 = vtanh.f32 %v352_v49  ;;  %v847_v52 = vmul.f32 -1.442695, %v352_v49 }
 0x781   :  { %941 = vpow2.f32 %v847_v52 }
 0x782   :  { %v347_v50 = vpop.f32.mrf.mxu1 }
 0x785   :  { %v940_v51 = vpop.eup %939 }
 0x786   :  { %378 = vrot.lane.b32.xlu1 %v940_v51, %s1009_s1 }
 0x787   :  { %v942_v44 = vpop.eup %941 }
 0x788   :  { %v356_v53 = vadd.f32 1.0, %v942_v44 }
 0x78a   :  { %943 = vrcp.f32 %v356_v53  ;;  %v368_v59 = vand.u32 2147483648, %v356_v53  ;;  %vm362_vm1 = vweird.f32 %v356_v53  ;;  %v366_v60 = vand.u32 2147483647, %v356_v53 }
 0x78c   :  { %v369_v61 = vor.u32 1.1754944e-38, %v368_v59  ;;  %vm367_vm3 = vcmp.eq.f32.partialorder %v366_v60, 8.507059e+37 }
 0x790   :  { %v944_v54 = vpop.eup %943 }
 0x791   :  { %v358_v55 = vmul.f32 %v944_v54, %v356_v53  ;;  %vm363_vm15 = vweird.f32 %v944_v54 }
 0x792   :  { %vm364_vm2 = vmor %vm362_vm1, %vm363_vm15 }
 0x793   :  { %v359_v56 = vsub.f32 1.0, %v358_v55 }
 0x795   :  { %v360_v57 = vmul.f32 %v944_v54, %v359_v56 }
 0x797   :  { %v361_v58 = vadd.f32 %v944_v54, %v360_v57 }
 0x799   :  { %v365_v18 = vsel %vm364_vm2, %v944_v54, %v361_v58 }
 0x79a   :  { %v370_v63 = vsel %vm367_vm3, %v369_v61, %v365_v18 }
 0x79b   :  { %v376_v2 = vmul.f32 %v374_v1, %v370_v63 }
 0x7f8   :  { %v379_v62 = vpop.permute.xlu1 %378 }
 0x7f9   :  { %v381_v0 = vmul.f32 %v379_v62, %v370_v63 }
 0x7fb   :  { %383 = vrot.lane.b32.xlu2 %v381_v0, %s1010_s15 }
 0x855   :  { %v384_v3 = vpop.permute.xlu2 %383 }
 0x856   :  { %v386_v4 = vadd.f32 %v384_v3, %v376_v2 }
 0x858   :  { %945 = vtanh.f32 %v386_v4 }
 0x85e   :  { %v946_v5 = vpop.eup %945 }
 0x85f   :  { %389 = vrot.lane.b32.xlu0 %v946_v5, %s1009_s1 }
 0x867   :  { %504 = vrot.lane.b32.xlu0 %v912_v16, %s1010_s15 }
 0x8d1   :  { %v390_v12 = vpop.permute.xlu0 %389 }
 0x8d2   :  { %v392_v13 = vmul.f32 %v390_v12, %v370_v63 }
 0x8d4   :  { %v398_v14 = vsel %vm397_vm4, %v396_v43, %v392_v13 }
 0x8d5   :  { %v410_v15 = vpack.c.bf16 %v398_v14, %v398_v14 }
 0x8d7   :  { %415 = vrot.lane.b32.xlu1 %v410_v15, %s1010_s15 }
 0x8d9   :  { %v505_v42 = vpop.permute.xlu0 %504 }
 0x949   :  { %v416_v19 = vpop.permute.xlu1 %415 }
 0x94a   :  { %861 = vmatmul.msk.bf16.vlgmr.msrb.gmra.mxu2 %vm141_vm0, %v416_v19 }
 0x9cd   :  { %v441_v22 = vpop.f32.mrf.mxu2 }
 0x9ce   :  { %v1161_v23 = vadd.f32 %v913_v21, %v441_v22 }
 0x9d0   :  { %v483_v24 = vadd.f32 %v479_v17, %v1161_v23 }
 0x9d2   :  { %947 = vtanh.f32 %v483_v24  ;;  %v873_v27 = vmul.f32 -1.442695, %v483_v24 }
 0x9d4   :  { %949 = vpow2.f32 %v873_v27 }
 0x9d5   :  { %v443_v25 = vpop.f32.mrf.mxu2 }
 0x9d8   :  { %v948_v26 = vpop.eup %947 }
 0x9d9   :  { %509 = vrot.lane.b32.xlu2 %v948_v26, %s1009_s1 }
 0x9da   :  { %v950_v28 = vpop.eup %949 }
 0x9db   :  { %v487_v29 = vadd.f32 1.0, %v950_v28 }
 0x9dd   :  { %951 = vrcp.f32 %v487_v29  ;;  %v499_v35 = vand.u32 2147483648, %v487_v29  ;;  %vm493_vm6 = vweird.f32 %v487_v29  ;;  %v497_v36 = vand.u32 2147483647, %v487_v29 }
 0x9df   :  { %v500_v38 = vor.u32 1.1754944e-38, %v499_v35  ;;  %vm498_vm8 = vcmp.eq.f32.partialorder %v497_v36, 8.507059e+37 }
 0x9e3   :  { %v952_v30 = vpop.eup %951 }
 0x9e4   :  { %v489_v31 = vmul.f32 %v952_v30, %v487_v29  ;;  %vm494_vm5 = vweird.f32 %v952_v30 }
 0x9e5   :  { %vm495_vm7 = vmor %vm493_vm6, %vm494_vm5 }
 0x9e6   :  { %v490_v32 = vsub.f32 1.0, %v489_v31 }
 0x9e8   :  { %v491_v33 = vmul.f32 %v952_v30, %v490_v32 }
 0x9ea   :  { %v492_v34 = vadd.f32 %v952_v30, %v491_v33 }
 0x9ec   :  { %v496_v37 = vsel %vm495_vm7, %v952_v30, %v492_v34 }
 0x9ed   :  { %v501_v39 = vsel %vm498_vm8, %v500_v38, %v496_v37 }
 0x9ee   :  { %v507_v43 = vmul.f32 %v505_v42, %v501_v39 }
 0xa33   :  { %v510_v40 = vpop.permute.xlu2 %509 }
 0xa34   :  { %v512_v41 = vmul.f32 %v510_v40, %v501_v39 }
 0xa36   :  { %514 = vrot.lane.b32.xlu1 %v512_v41, %s1010_s15 }
 0xaa8   :  { %v515_v45 = vpop.permute.xlu1 %514 }
 0xaa9   :  { %v517_v46 = vadd.f32 %v515_v45, %v507_v43 }
 0xaab   :  { %953 = vtanh.f32 %v517_v46  ;;  %v569_v6 = vrot.slane %v517_v46, 6 }
 0xab1   :  { %v954_v47 = vpop.eup %953 }
 0xab2   :  { %520 = vrot.lane.b32.xlu2 %v954_v47, %s1009_s1 }
 0xb0c   :  { %v521_v48 = vpop.permute.xlu2 %520 }
 0xb0d   :  { %v523_v49 = vmul.f32 %v521_v48, %v501_v39 }
 0xb0f   :  { %v524_v50 = vpack.c.bf16 %v523_v49, %v523_v49 }
 0xb11   :  { %526 = vrot.lane.b32.xlu0 %v524_v50, %s1010_s15 }
 0xb83   :  { %v527_v51 = vpop.permute.xlu0 %526 }
 0xb84   :  { %874 = vmatmul.msk.bf16.vlgmr.msra.gmra.mxu1 %vm141_vm0, %v527_v51 }
 0xc01   :  { %v540_v52 = vpop.f32.mrf.mxu1 }
 0xc02   :  { %v545_v44 = vrot.slane %v540_v52, 6 }
 0xc04   :  { %v547_v53 = vadd.f32 %v545_v44, %v1161_v23 }
 0xc06   :  { %955 = vtanh.f32 %v547_v53  ;;  %v875_v56 = vmul.f32 -1.442695, %v547_v53 }
 0xc08   :  { %957 = vpow2.f32 %v875_v56 }
 0xc09   :  { %v542_v54 = vpop.f32.mrf.mxu1 }
 0xc0c   :  { %v956_v55 = vpop.eup %955 }
 0xc0d   :  { %573 = vrot.lane.b32.xlu1 %v956_v55, %s1009_s1 }
 0xc0e   :  { %v958_v57 = vpop.eup %957 }
 0xc0f   :  { %v551_v58 = vadd.f32 1.0, %v958_v57 }
 0xc11   :  { %959 = vrcp.f32 %v551_v58  ;;  %v563_v63 = vand.u32 2147483648, %v551_v58  ;;  %vm557_vm10 = vweird.f32 %v551_v58  ;;  %v561_v0 = vand.u32 2147483647, %v551_v58 }
 0xc13   :  { %v564_v2 = vor.u32 1.1754944e-38, %v563_v63  ;;  %vm562_vm12 = vcmp.eq.f32.partialorder %v561_v0, 8.507059e+37 }
 0xc17   :  { %v960_v59 = vpop.eup %959 }
 0xc18   :  { %v553_v60 = vmul.f32 %v960_v59, %v551_v58  ;;  %vm558_vm9 = vweird.f32 %v960_v59 }
 0xc19   :  { %vm559_vm11 = vmor %vm557_vm10, %vm558_vm9 }
 0xc1a   :  { %v554_v18 = vsub.f32 1.0, %v553_v60 }
 0xc1c   :  { %v555_v61 = vmul.f32 %v960_v59, %v554_v18 }
 0xc1e   :  { %v556_v62 = vadd.f32 %v960_v59, %v555_v61 }
 0xc20   :  { %v560_v1 = vsel %vm559_vm11, %v960_v59, %v556_v62 }
 0xc21   :  { %v565_v4 = vsel %vm562_vm12, %v564_v2, %v560_v1 }
 0xc22   :  { %v571_v7 = vmul.f32 %v569_v6, %v565_v4 }
 0xc7f   :  { %v574_v3 = vpop.permute.xlu1 %573 }
 0xc80   :  { %v576_v5 = vmul.f32 %v574_v3, %v565_v4 }
 0xc82   :  { %578 = vrot.lane.b32.xlu2 %v576_v5, %s1010_s15 }
 0xcdc   :  { %v579_v8 = vpop.permute.xlu2 %578 }
 0xcdd   :  { %v581_v9 = vadd.f32 %v579_v8, %v571_v7  ;;  %v904_v7 = vld [vmem:[%s1208_s7 + $0x8] sm:$0xff]  ;;  %v903_v8 = vld [vmem:[%s1208_s7] sm:$0xff]  ;;  %s1011_s7 = smov [#allocation2]  }
 0xcde   :  { %752 = vmatpush.bf16.msrb.mxu0 %v904_v7 }
 0xcdf   :  { %961 = vtanh.f32 %v581_v9  ;;  %v634_v38 = vrot.slane %v581_v9, 6 }
 0xce2   :  { %753 = vmatpush.bf16.msrb.mxu0 %v903_v8 }
 0xce5   :  { %v962_v10 = vpop.eup %961 }
 0xce6   :  { %584 = vrot.lane.b32.xlu0 %v962_v10, %s1009_s1 }
 0xd58   :  { %v585_v11 = vpop.permute.xlu0 %584 }
 0xd59   :  { %v587_v12 = vmul.f32 %v585_v11, %v565_v4 }
 0xd5b   :  { %v588_v13 = vpack.c.bf16 %v587_v12, %v587_v12 }
 0xd5d   :  { %v590_v14 = vrot.slane %v588_v13, 1 }
 0xd5f   :  { %591 = vrot.lane.b32.xlu1 %v590_v14, %s1010_s15  ;;  %v914_v14 = vld [vmem:[%s1209_s8] ss:$0 sm:$0xff]  ;;  %s789_s8 = sshll.u32 %s1011_s7, 4  ;;  %s790_s8 = int_to_ptr.vmem [resolvable:$true] %s789_s8 }
 0xdd1   :  { %v592_v15 = vpop.permute.xlu1 %591 }
 0xdd2   :  { %876 = vmatmul.msk.bf16.vlgmr.msra.gmra.mxu2 %vm141_vm0, %v592_v15 }
 0xe55   :  { %v605_v16 = vpop.f32.mrf.mxu2 }
 0xe56   :  { %v610_v17 = vrot.slane %v605_v16, 4 }
 0xe58   :  { %v612_v19 = vadd.f32 %v610_v17, %v1161_v23 }
 0xe5a   :  { %963 = vtanh.f32 %v612_v19  ;;  %v877_v22 = vmul.f32 -1.442695, %v612_v19 }
 0xe5c   :  { %965 = vpow2.f32 %v877_v22 }
 0xe5d   :  { %v607_v20 = vpop.f32.mrf.mxu2 }
 0xe60   :  { %v964_v21 = vpop.eup %963 }
 0xe61   :  { %638 = vrot.lane.b32.xlu2 %v964_v21, %s1009_s1 }
 0xe62   :  { %v966_v24 = vpop.eup %965 }
 0xe63   :  { %v616_v25 = vadd.f32 1.0, %v966_v24 }
 0xe65   :  { %967 = vrcp.f32 %v616_v25  ;;  %v628_v31 = vand.u32 2147483648, %v616_v25  ;;  %vm622_vm15 = vweird.f32 %v616_v25  ;;  %v626_v32 = vand.u32 2147483647, %v616_v25 }
 0xe67   :  { %v629_v34 = vor.u32 1.1754944e-38, %v628_v31  ;;  %vm627_vm2 = vcmp.eq.f32.partialorder %v626_v32, 8.507059e+37 }
 0xe6b   :  { %v968_v26 = vpop.eup %967 }
 0xe6c   :  { %v618_v27 = vmul.f32 %v968_v26, %v616_v25  ;;  %vm623_vm14 = vweird.f32 %v968_v26 }
 0xe6d   :  { %vm624_vm1 = vmor %vm622_vm15, %vm623_vm14 }
 0xe6e   :  { %v619_v28 = vsub.f32 1.0, %v618_v27 }
 0xe70   :  { %v620_v29 = vmul.f32 %v968_v26, %v619_v28 }
 0xe72   :  { %v621_v30 = vadd.f32 %v968_v26, %v620_v29 }
 0xe74   :  { %v625_v33 = vsel %vm624_vm1, %v968_v26, %v621_v30 }
 0xe75   :  { %v630_v36 = vsel %vm627_vm2, %v629_v34, %v625_v33 }
 0xe76   :  { %v636_v39 = vmul.f32 %v634_v38, %v630_v36 }
 0xebb   :  { %v639_v35 = vpop.permute.xlu2 %638 }
 0xebc   :  { %v641_v37 = vmul.f32 %v639_v35, %v630_v36 }
 0xebe   :  { %643 = vrot.lane.b32.xlu0 %v641_v37, %s1010_s15 }
 0xf30   :  { %v644_v40 = vpop.permute.xlu0 %643 }
 0xf31   :  { %v646_v41 = vadd.f32 %v644_v40, %v636_v39 }
 0xf33   :  { %969 = vtanh.f32 %v646_v41  ;;  %v699_v2 = vrot.slane %v646_v41, 6 }
 0xf39   :  { %v970_v42 = vpop.eup %969 }
 0xf3a   :  { %649 = vrot.lane.b32.xlu1 %v970_v42, %s1009_s1 }
 0xfac   :  { %v650_v43 = vpop.permute.xlu1 %649 }
 0xfad   :  { %v652_v45 = vmul.f32 %v650_v43, %v630_v36 }
 0xfaf   :  { %v653_v46 = vpack.c.bf16 %v652_v45, %v652_v45 }
 0xfb1   :  { %v655_v47 = vrot.slane %v653_v46, 2 }
 0xfb3   :  { %656 = vrot.lane.b32.xlu2 %v655_v47, %s1010_s15 }
0x100d   :  { %v657_v48 = vpop.permute.xlu2 %656 }
0x100e   :  { %878 = vmatmul.msk.bf16.vlgmr.msra.gmra.mxu3 %vm141_vm0, %v657_v48 }
0x1091   :  { %v670_v49 = vpop.f32.mrf.mxu3 }
0x1092   :  { %v675_v50 = vrot.slane %v670_v49, 2 }
0x1094   :  { %v677_v51 = vadd.f32 %v675_v50, %v1161_v23 }
0x1096   :  { %971 = vtanh.f32 %v677_v51  ;;  %v879_v53 = vmul.f32 -1.442695, %v677_v51 }
0x1098   :  { %973 = vpow2.f32 %v879_v53 }
0x1099   :  { %v672_v52 = vpop.f32.mrf.mxu3 }
0x109c   :  { %v972_v44 = vpop.eup %971 }
0x109d   :  { %703 = vrot.lane.b32.xlu0 %v972_v44, %s1009_s1 }
0x109e   :  { %v974_v54 = vpop.eup %973 }
0x109f   :  { %v681_v55 = vadd.f32 1.0, %v974_v54 }
0x10a1   :  { %975 = vrcp.f32 %v681_v55  ;;  %v693_v18 = vand.u32 2147483648, %v681_v55  ;;  %vm687_vm4 = vweird.f32 %v681_v55  ;;  %v691_v61 = vand.u32 2147483647, %v681_v55 }
0x10a3   :  { %v694_v62 = vor.u32 1.1754944e-38, %v693_v18  ;;  %vm692_vm6 = vcmp.eq.f32.partialorder %v691_v61, 8.507059e+37 }
0x10a7   :  { %v976_v56 = vpop.eup %975 }
0x10a8   :  { %v683_v57 = vmul.f32 %v976_v56, %v681_v55  ;;  %vm688_vm3 = vweird.f32 %v976_v56 }
0x10a9   :  { %vm689_vm5 = vmor %vm687_vm4, %vm688_vm3 }
0x10aa   :  { %v684_v58 = vsub.f32 1.0, %v683_v57 }
0x10ac   :  { %v685_v59 = vmul.f32 %v976_v56, %v684_v58 }
0x10ae   :  { %v686_v60 = vadd.f32 %v976_v56, %v685_v59 }
0x10b0   :  { %v690_v23 = vsel %vm689_vm5, %v976_v56, %v686_v60 }
0x10b1   :  { %v695_v0 = vsel %vm692_vm6, %v694_v62, %v690_v23 }
0x10b2   :  { %v701_v3 = vmul.f32 %v699_v2, %v695_v0 }
0x110f   :  { %v704_v63 = vpop.permute.xlu0 %703 }
0x1110   :  { %v706_v1 = vmul.f32 %v704_v63, %v695_v0 }
0x1112   :  { %708 = vrot.lane.b32.xlu1 %v706_v1, %s1010_s15 }
0x1184   :  { %v709_v4 = vpop.permute.xlu1 %708 }
0x1185   :  { %v711_v5 = vadd.f32 %v709_v4, %v701_v3 }
0x1187   :  { %977 = vtanh.f32 %v711_v5 }
0x118d   :  { %v978_v6 = vpop.eup %977 }
0x118e   :  { %714 = vrot.lane.b32.xlu2 %v978_v6, %s1009_s1 }
0x11e8   :  { %v715_v9 = vpop.permute.xlu2 %714 }
0x11e9   :  { %v717_v10 = vmul.f32 %v715_v9, %v695_v0 }
0x11eb   :  { %v722_v11 = vpack.c.bf16 %v717_v10, %v717_v10 }
0x11ed   :  { %v728_v12 = vrot.slane %v722_v11, 3 }
0x11ef   :  { %729 = vrot.lane.b32.xlu0 %v728_v12, %s1010_s15 }
0x1261   :  { %v730_v13 = vpop.permute.xlu0 %729 }
0x1262   :  { %888 = vmatmul.msk.bf16.vlgmr.msrb.gmra.mxu0 %vm141_vm0, %v730_v13 }
0x12df   :  { %v755_v15 = vpop.f32.mrf.mxu0 }
0x12e0   :  { %v756_v16 = vadd.f32 %v914_v14, %v755_v15 }
0x12e2   :  { %v759_v17 = vsel %vm393_vm13, %v756_v16, -inf }
0x12e3   :  { %760 = vmax.xlane.f32.xlu1 %v759_v17 }
0x12e7   :  { %v757_v19 = vpop.f32.mrf.mxu0 }
0x1356   :  { %v761_v20 = vpop.xlane.xlu1 %760 }
0x1357   :  { %v762_v21 = vsub.f32 %v756_v16, %v761_v20 }
0x1359   :  { %v763_v22 = vmul.f32 1.442695, %v762_v21 }
0x135b   :  { %979 = vpow2.f32 %v763_v22 }
0x1361   :  { %v980_v24 = vpop.eup %979 }
0x1362   :  { %v765_v25 = vsel %vm393_vm13, %v980_v24, 0.0 }
0x1363   :  { %766 = vadd.xlane.f32.xlu2 %v765_v25 }
0x13d6   :  { %v767_v26 = vpop.xlane.xlu2 %766 }
0x13d7   :  { %981 = vrcp.f32 %v767_v26  ;;  %v779_v30 = vand.u32 2147483648, %v767_v26  ;;  %v777_v32 = vand.u32 2147483647, %v767_v26  ;;  %vm773_vm7 = vweird.f32 %v767_v26 }
0x13d9   :  { %v780_v34 = vor.u32 1.1754944e-38, %v779_v30  ;;  %vm778_vm13 = vcmp.eq.f32.partialorder %v777_v32, 8.507059e+37 }
0x13dd   :  { %v982_v27 = vpop.eup %981 }
0x13de   :  { %v769_v28 = vmul.f32 %v982_v27, %v767_v26  ;;  %vm774_vm0 = vweird.f32 %v982_v27 }
0x13df   :  { %vm775_vm8 = vmor %vm773_vm7, %vm774_vm0 }
0x13e0   :  { %v770_v29 = vsub.f32 1.0, %v769_v28 }
0x13e2   :  { %v771_v31 = vmul.f32 %v982_v27, %v770_v29 }
0x13e4   :  { %v772_v33 = vadd.f32 %v982_v27, %v771_v31 }
0x13e6   :  { %v776_v35 = vsel %vm775_vm8, %v982_v27, %v772_v33 }
0x13e7   :  { %v781_v36 = vsel %vm778_vm13, %v780_v34, %v776_v35 }
0x13e8   :  { %v782_v37 = vmul.f32 %v980_v24, %v781_v36 }
0x13ea   :  { %783 = vst [vmem:[#allocation2] sm:$0x3] %v782_v37 }
0x13eb   :  { %794 = dma.vmem_to_hbm [thread:$0]  %s790_s8, 32, %s792_s12, [#allocation3]  }
0x13ec   :  { %1007 = dma.done.wait [#allocation3], 32  }
0x13ed   :  { %1008 = vsyncadd [#allocation3], 4294967264 }
0x13ee   :  { %799 = vsyncpa [#allocation3], 1 }

// kernel: _lambda_.2
= control target key start
LH: loop header
LB: loop body
LE: loop exit
PB: predicated region body
PF: predicated region fallthrough
CT: control target
= control target key end

     0   :  { %s3452_s24 = smov 0   ;;  %s4489_s0 = inlined_call_operand.vmem [shape: bf16[64,192], index: 0, kind: input, shape index: {}]   ;;  %s4490_s1 = inlined_call_operand.vmem [shape: f32[32,32], index: 1, kind: input, shape index: {}]   ;;  %s4491_s2 = inlined_call_operand.vmem [shape: f32[32,32], index: 2, kind: input, shape index: {}]   ;;  %s4492_s3 = inlined_call_operand.vmem [shape: f32[4,32], index: 3, kind: input, shape index: {}]   ;;  %s4493_s4 = inlined_call_operand.vmem [shape: f32[4,32], index: 4, kind: input, shape index: {}]   ;;  %s4494_s5 = inlined_call_operand.vmem [shape: bf16[192,32], index: 5, kind: input, shape index: {}]   ;;  %s4495_s6 = inlined_call_operand.vmem [shape: f32[1,32], index: 6, kind: input, shape index: {}]   ;;  %s4496_s7 = inlined_call_operand.vmem [shape: bf16[2,32,96], index: 7, kind: input, shape index: {}]   ;;  %s4497_s8 = inlined_call_operand.vmem [shape: f32[2,1,96], index: 8, kind: input, shape index: {}]   ;;  %s4498_s9 = inlined_call_operand.vmem [shape: bf16[2,32,32], index: 9, kind: input, shape index: {}]   ;;  %s4499_s10 = inlined_call_operand.vmem [shape: bf16[2,32,64], index: 10, kind: input, shape index: {}]   ;;  %s4500_s11 = inlined_call_operand.vmem [shape: f32[2,1,64], index: 11, kind: input, shape index: {}]   ;;  %s4501_s12 = inlined_call_operand.vmem [shape: bf16[2,64,32], index: 12, kind: input, shape index: {}]   ;;  %s4502_s13 = inlined_call_operand.vmem [shape: f32[2,6,32], index: 13, kind: input, shape index: {}]   ;;  %s4503_s14 = inlined_call_operand.vmem [shape: f32[2,32], index: 14, kind: input, shape index: {}]   ;;  %s4504_s15 = inlined_call_operand.vmem [shape: bf16[32,128], index: 15, kind: input, shape index: {}]   ;;  %s4505_s16 = inlined_call_operand.vmem [shape: f32[1,128], index: 16, kind: input, shape index: {}]   ;;  %s4506_s17 = inlined_call_operand.vmem [shape: f32[2,4,128], index: 17, kind: output, shape index: {}]  }
   0x1   :  { %4508 = sst [smem:[#allocation2_spill]] %s4489_s0 }
   0x2   :  { %4509 = sst [smem:[#allocation3_spill]] %s4490_s1 }
   0x3 LB: > { %s3458_s25 = sadd.s32 4294967295, %s3356_s24   ;;  %p2885_p0 = scmp.ge.s32.totalorder %s3356_s24, 1  ;;  %s3356_s24 = sphi %s3452_s24, %s27_s24  }
   0x4   : > { %p489_p1 = scmp.lt.s32.totalorder %s3356_s24, 3 }
   0x6   : > { %p490_p2 = pnand %p2885_p0, %p489_p1 }
   0x7   : > { %s2886_s28 = sshll.u32 (!%p490_p2), %s3458_s25, 2  ;;  %s4510_s0 = sld [smem:[#allocation2_spill]] (!%p490_p2) }
   0x8   : > { %493 = sbr.rel (%p490_p2) target bundleno = 5491 (0x1573), region = 88  ;;  %p542_p3 = scmp.lt.s32.totalorder (!%p490_p2), %s2886_s28, 7 }
   0x9   : > { %s3358_s23 = smov (!%p490_p2), 32   ;;  %s4511_s29 = sld [smem:[#allocation3_spill]] (!%p490_p2) }
   0xa   : > { %s3360_s26 = smov (!%p490_p2), 64   ;;  %p548_p4 = scmp.lt.s32.totalorder (!%p490_p2), %s3458_s25, 1 }
   0xd   : > { %v3131_v0 = vld [vmem:[%s4494_s5 + $0x38] sm:$0xff]  ;;  %v3130_v2 = vld [vmem:[%s4494_s5 + $0x30] sm:$0xff]  ;;  %s4513_s28 = smov (!%p542_p3, %s2886_s28), 7  ;;  %v3129_v4 = vld [vmem:[%s4494_s5 + $0x28] sm:$0xff]  ;;  %vm685_vm0 = vcmask 523264   ;;  %vm761_vm1 = vcmask 261120  }
   0xe   : > { %v3135_v1 = vld [vmem:[%s4494_s5 + $0x58] sm:$0xff]  ;;  %692 = vmatpush.bf16.msra.mxu0 %v3131_v0  ;;  %v3134_v3 = vld [vmem:[%s4494_s5 + $0x50] sm:$0xff]  ;;  %s3119_s20 = sshll.u32 %s4513_s28, 3  ;;  %v3133_v5 = vld [vmem:[%s4494_s5 + $0x48] sm:$0xff]  ;;  %s4515_s25 = smov (!%p548_p4, %s3458_s25), 1 }
   0xf   : > { %715 = vmatpush.bf16.msra.mxu1 %v3135_v1  ;;  %s546_s30 = scalar_lea.vmem %s4510_s0, %s3119_s20  ;;  %v3128_v6 = vld [vmem:[%s4494_s5 + $0x20] sm:$0xff]  ;;  %v3127_v10 = vld [vmem:[%s4494_s5 + $0x18] sm:$0xff]  ;;  %v3126_v12 = vld [vmem:[%s4494_s5 + $0x10] sm:$0xff]  ;;  %s3359_s20 = smov 96  }
  0x10   : > { %v3132_v7 = vld [vmem:[%s4494_s5 + $0x40] sm:$0xff]  ;;  %v2894_v9 = vld [vmem:[%s546_s30 + $0x8] sm:$0xf0]  ;;  %v3121_v16 = vld [vmem:[%s546_s30 + $0x4] sm:$0xf0]  ;;  %s2889_s1 = sshll.u32 %s4515_s25, 2 }
  0x11   : > { %v3120_v8 = vld [vmem:[%s546_s30 + $0x4] sm:$0xf]  ;;  %v3125_v13 = vld [vmem:[%s4494_s5 + $0x8] sm:$0xff]  ;;  %v2892_v15 = vld [vmem:[%s546_s30] sm:$0xf] }
  0x12   : > { %693 = vmatpush.bf16.msra.mxu0 %v3130_v2  ;;  %v2897_v11 = vor.u32 %v3120_v8, %v2894_v9  ;;  %v3124_v14 = vld [vmem:[%s4494_s5] sm:$0xff]  ;;  %v3122_v17 = vld [vmem:[%s546_s30 + $0x14] sm:$0xf]  ;;  %v2902_v18 = vld [vmem:[%s546_s30 + $0x18] sm:$0xf0]  ;;  %v2893_v19 = vor.u32 %v3121_v16, %v2892_v15 }
  0x13   : > { %716 = vmatpush.bf16.msra.mxu1 %v3134_v3  ;;  %v2905_v20 = vor.u32 %v3122_v17, %v2902_v18  ;;  %v2900_v21 = vld [vmem:[%s546_s30 + $0x10] sm:$0xf]  ;;  %v3123_v22 = vld [vmem:[%s546_s30 + $0x14] sm:$0xf0]  ;;  %v3137_v24 = vld [vmem:[%s4496_s7 + $0x8] sm:$0xff]  ;;  %s551_s30 = scalar_lea.vmem %s4506_s17, %s2889_s1 }
  0x14   : > { %v2901_v23 = vor.u32 %v3123_v22, %v2900_v21  ;;  %774 = vmatpush.bf16.msra.mxu2 %v3137_v24  ;;  %v3136_v25 = vld [vmem:[%s4496_s7] sm:$0xff]  ;;  %v560_v40 = vld [vmem:[%s4511_s29 + $0x8] sm:$0xff]  ;;  %v561_v54 = vld [vmem:[%s4511_s29 + $0x10] sm:$0xff] }
  0x15   : > { %v3170_v27 = vld [vmem:[%s4495_s6] ss:$0 sm:$0xff]  ;;  %v562_v55 = vld [vmem:[%s4511_s29 + $0x18] sm:$0xff] }
  0x16   : > { %694 = vmatpush.bf16.msra.mxu0 %v3129_v4  ;;  %v3516_v30 = vld [vmem:[%s4492_s3] sm:$0xf] }
  0x17   : > { %717 = vmatpush.bf16.msra.mxu1 %v3133_v5  ;;  %v900_v31 = vperm.slane %v3516_v30, 1  ;;  %v1213_v32 = vperm.slane %v3516_v30, 3  ;;  %v559_v39 = vld [vmem:[%s4511_s29] sm:$0xff] }
  0x18   : > { %775 = vmatpush.bf16.msra.mxu2 %v3136_v25  ;;  %v3171_v61 = vld [vmem:[%s4497_s8] ss:$0 sm:$0xff] }
  0x19   : > { %902 = vrot.lane.b32.xlu0 %v900_v31, %s3358_s23  ;;  %1215 = vrot.lane.b32.xlu2 %v1213_v32, %s3358_s23 }
  0x1a   : > { %695 = vmatpush.bf16.msra.mxu0 %v3128_v6  ;;  %v787_v6 = vperm.slane %v3516_v30, 0 }
  0x1b   : > { %718 = vmatpush.bf16.msra.mxu1 %v3132_v7 }
  0x1e   : > { %696 = vmatpush.bf16.msra.mxu0 %v3127_v10  ;;  %2954 = vmatmul.msk.bf16.vlgmr.msra.gmra.mxu1 %vm685_vm0, %v2897_v11 }
  0x22   : > { %697 = vmatpush.bf16.msra.mxu0 %v3126_v12 }
  0x26   : > { %698 = vmatpush.bf16.msra.mxu0 %v3125_v13  ;;  %v1071_v13 = vperm.slane %v3516_v30, 2 }
  0x2a   : > { %699 = vmatpush.bf16.msra.mxu0 %v3124_v14 }
  0x2d   : > { %700 = vmatmul.bf16.vlgmr.msra.gmra.mxu0 %v2893_v19 }
  0x2e   : > { %2955 = vmatmul.msk.bf16.gmra.mxu1 %vm685_vm0, %v2905_v20 }
  0x3d   : > { %705 = vmatmul.bf16.gmra.mxu0 %v2901_v23 }
  0x8b   : > { %v3555_v63 = vpop.permute.xlu0 %902 }
  0x9b   : > { %v720_v26 = vpop.f32.mrf.mxu1 }
  0xa3   : > { %v722_v33 = vpop.f32.mrf.mxu1 }
  0xaa   : > { %v701_v28 = vpop.f32.mrf.mxu0 }
  0xab   : > { %v702_v29 = vadd.f32 %v3170_v27, %v701_v28  ;;  %v725_v44 = vpop.f32.mrf.mxu1 }
  0xad   : > { %v721_v34 = vadd.f32 %v720_v26, %v702_v29 }
  0xaf   : > { %v730_v37 = vmax.f32 %v721_v34, 0.0 }
  0xb1   : > { %v3530_v42 = vadd.f32 %v730_v37, %v559_v39 }
  0xb2   : > { %v703_v35 = vpop.f32.mrf.mxu0 }
  0xb3   : > { %v704_v36 = vadd.f32 %v3170_v27, %v703_v35  ;;  %v727_v51 = vpop.f32.mrf.mxu1 }
  0xb5   : > { %v723_v38 = vadd.f32 %v722_v33, %v704_v36  ;;  %v3619_v36 = vld [vmem:[%s4491_s2] sm:$0xff] }
  0xb7   : > { %v731_v41 = vmax.f32 %v723_v38, 0.0 }
  0xb9   : > { %v3532_v43 = vadd.f32 %v731_v41, %v560_v40  ;;  %v3628_v41 = vld [vmem:[%s4491_s2 + $0x8] sm:$0xff] }
  0xba   : > { %v706_v45 = vpop.f32.mrf.mxu0 }
  0xbb   : > { %v743_v46 = vpack.c.bf16 %v3532_v43, %v3530_v42  ;;  %v707_v47 = vadd.f32 %v3170_v27, %v706_v45 }
  0xbd   : > { %2964 = vmatmul.msk.bf16.vlgmr.msra.gmra.mxu2 %vm761_vm1, %v743_v46  ;;  %v726_v48 = vadd.f32 %v725_v44, %v707_v47 }
  0xbf   : > { %v732_v52 = vmax.f32 %v726_v48, 0.0  ;;  %v3635_v48 = vld [vmem:[%s4491_s2 + $0x10] sm:$0xff] }
  0xc1   : > { %v3543_v57 = vadd.f32 %v732_v52, %v561_v54 }
  0xc2   : > { %v708_v49 = vpop.f32.mrf.mxu0 }
  0xc3   : > { %v709_v50 = vadd.f32 %v3170_v27, %v708_v49 }
  0xc5   : > { %v728_v53 = vadd.f32 %v727_v51, %v709_v50 }
  0xc7   : > { %v733_v56 = vmax.f32 %v728_v53, 0.0  ;;  %v3645_v53 = vld [vmem:[%s4491_s2 + $0x18] sm:$0xff] }
  0xc9   : > { %v3545_v58 = vadd.f32 %v733_v56, %v562_v55 }
  0xcb   : > { %v744_v59 = vpack.c.bf16 %v3545_v58, %v3543_v57 }
  0xcd   : > { %2965 = vmatmul.msk.bf16.gmra.mxu2 %vm761_vm1, %v744_v59 }
 0x140   : > { %v777_v60 = vpop.f32.mrf.mxu2 }
 0x141   : > { %v3553_v62 = vadd.f32 %v3171_v61, %v777_v60 }
 0x143   : > { %v905_v2 = vmul.f32 %v3555_v63, %v3553_v62 }
 0x148   : > { %v779_v0 = vpop.f32.mrf.mxu2 }
 0x149   : > { %v3557_v1 = vadd.f32 %v3171_v61, %v779_v0 }
 0x14b   : > { %v906_v3 = vmul.f32 %v3555_v63, %v3557_v1  ;;  %v3598_v25 = vpack.c.bf16 %v3557_v1, %v3553_v62 }
 0x14d   : > { %v909_v4 = vpack.c.bf16 %v906_v3, %v905_v2 }
 0x14f   : > { %913 = vrot.lane.b32.xlu1 %v909_v4, %s3359_s20 }
 0x150   : > { %v782_v5 = vpop.f32.mrf.mxu2 }
 0x151   : > { %v3565_v7 = vadd.f32 %v3171_v61, %v782_v5 }
 0x153   : > { %v907_v10 = vmul.f32 %v3555_v63, %v3565_v7 }
 0x157   : > { %789 = vrot.lane.b32.xlu1 %v787_v6, %s3358_s23 }
 0x158   : > { %v784_v8 = vpop.f32.mrf.mxu2 }
 0x159   : > { %v3570_v9 = vadd.f32 %v3171_v61, %v784_v8 }
 0x15b   : > { %v908_v11 = vmul.f32 %v3555_v63, %v3570_v9  ;;  %v3604_v26 = vpack.c.bf16 %v3570_v9, %v3565_v7 }
 0x15d   : > { %v910_v12 = vpack.c.bf16 %v908_v11, %v907_v10  ;;  %v3664_v10 = vpop.permute.xlu2 %1215 }
 0x15e   : > { %v1219_v11 = vmul.f32 %v3664_v10, %v3557_v1 }
 0x15f   : > { %915 = vrot.lane.b32.xlu0 %v910_v12, %s3359_s20  ;;  %v1218_v12 = vmul.f32 %v3664_v10, %v3553_v62 }
 0x167   : > { %994 = vrot.lane.b32.xlu0 %v900_v31, %s3360_s26 }
 0x16f   : > { %1073 = vrot.lane.b32.xlu0 %v1071_v13, %s3358_s23 }
 0x1c1   : > { %v914_v14 = vpop.permute.xlu1 %913 }
 0x1c2   : > { %v918_v24 = vsel %vm761_vm1, %v914_v14, 0  ;;  %v1222_v14 = vpack.c.bf16 %v1219_v11, %v1218_v12 }
 0x1c9   : > { %v3582_v15 = vpop.permute.xlu1 %789 }
 0x1ca   : > { %v792_v16 = vmul.f32 %v3582_v15, %v3553_v62  ;;  %v793_v17 = vmul.f32 %v3582_v15, %v3557_v1  ;;  %v794_v19 = vmul.f32 %v3582_v15, %v3565_v7  ;;  %v795_v20 = vmul.f32 %v3582_v15, %v3570_v9 }
 0x1cc   : > { %v798_v18 = vpack.c.bf16 %v793_v17, %v792_v16  ;;  %v799_v23 = vpack.c.bf16 %v795_v20, %v794_v19 }
 0x1ce   : > { %802 = vrot.lane.b32.xlu0 %v798_v18, %s3359_s20 }
 0x1d1   : > { %v916_v21 = vpop.permute.xlu0 %915 }
 0x1d2   : > { %v921_v22 = vsel %vm761_vm1, %v916_v21, 0 }
 0x1d3   : > { %929 = vmatpush.bf16.xpose.msrb.mxu2 %v921_v22 }
 0x1d6   : > { %804 = vrot.lane.b32.xlu0 %v799_v23, %s3359_s20 }
 0x1d9   : > { %v3608_v27 = vpop.permute.xlu0 %994 }
 0x1da   : > { %v999_v59 = vmul.f32 %v3608_v27, %v3565_v7  ;;  %v1000_v60 = vmul.f32 %v3608_v27, %v3570_v9  ;;  %v997_v0 = vmul.f32 %v3608_v27, %v3553_v62  ;;  %v998_v2 = vmul.f32 %v3608_v27, %v3557_v1 }
 0x1db   : > { %930 = vmatpush.bf16.xpose.msrb.mxu2 %v918_v24 }
 0x1dc   : > { %v1004_v61 = vpack.c.bf16 %v1000_v60, %v999_v59  ;;  %v1003_v3 = vpack.c.bf16 %v998_v2, %v997_v0  ;;  %v1220_v59 = vmul.f32 %v3664_v10, %v3565_v7 }
 0x1e1   : > { %v3610_v28 = vpop.permute.xlu0 %1073 }
 0x1e2   : > { %2968 = vmatmul.msk.bf16.vlgmr.msrb.gmra.mxu2 %vm761_vm1, %v3598_v25  ;;  %v1078_v4 = vmul.f32 %v3610_v28, %v3565_v7  ;;  %v1079_v5 = vmul.f32 %v3610_v28, %v3570_v9  ;;  %v1076_v0 = vmul.f32 %v3610_v28, %v3553_v62  ;;  %v1077_v2 = vmul.f32 %v3610_v28, %v3557_v1 }
 0x1e4   : > { %v1081_v8 = vpack.c.bf16 %v1079_v5, %v1078_v4 }
 0x1f2   : > { %2969 = vmatmul.msk.bf16.gmra.mxu2 %vm761_vm1, %v3604_v26 }
 0x240   : > { %v803_v29 = vpop.permute.xlu0 %802 }
 0x241   : > { %v813_v34 = vsel %vm761_vm1, %v803_v29, 0 }
 0x248   : > { %v805_v31 = vpop.permute.xlu0 %804 }
 0x249   : > { %v816_v33 = vsel %vm761_vm1, %v805_v31, 0 }
 0x24a   : > { %824 = vmatpush.bf16.xpose.msra.mxu3 %v816_v33 }
 0x252   : > { %825 = vmatpush.bf16.xpose.msra.mxu3 %v813_v34 }
 0x259   : > { %2966 = vmatmul.msk.bf16.vlgmr.msra.gmra.mxu3 %vm761_vm1, %v3598_v25 }
 0x265   : > { %v932_v35 = vpop.f32.mrf.mxu2 }
 0x266   : > { %v942_v37 = vmul.f32 0.35355338, %v932_v35 }
 0x268   : > { %v946_v38 = vadd.f32 %v942_v37, %v3619_v36 }
 0x269   : > { %2967 = vmatmul.msk.bf16.gmra.mxu3 %vm761_vm1, %v3604_v26 }
 0x26a   : > { %v950_v39 = vsel %vm761_vm1, %v946_v38, -inf }
 0x26b   : > { %951 = vmax.xlane.f32.xlu2 %v950_v39 }
 0x26d   : > { %v934_v40 = vpop.f32.mrf.mxu2 }
 0x26e   : > { %v943_v44 = vmul.f32 0.35355338, %v934_v40 }
 0x270   : > { %v947_v45 = vadd.f32 %v943_v44, %v3628_v41 }
 0x272   : > { %v953_v46 = vsel %vm761_vm1, %v947_v45, -inf }
 0x273   : > { %954 = vmax.xlane.f32.xlu2 %v953_v46 }
 0x275   : > { %v937_v47 = vpop.f32.mrf.mxu2 }
 0x276   : > { %v944_v49 = vmul.f32 0.35355338, %v937_v47 }
 0x278   : > { %v3638_v50 = vadd.f32 %v944_v49, %v3635_v48 }
 0x27a   : > { %v956_v51 = vsel %vm761_vm1, %v3638_v50, -inf }
 0x27b   : > { %957 = vmax.xlane.f32.xlu1 %v956_v51 }
 0x27d   : > { %v939_v52 = vpop.f32.mrf.mxu2 }
 0x27e   : > { %v945_v54 = vmul.f32 0.35355338, %v939_v52 }
 0x280   : > { %v949_v55 = vadd.f32 %v945_v54, %v3645_v53 }
 0x282   : > { %v959_v56 = vsel %vm761_vm1, %v949_v55, -inf }
 0x283   : > { %960 = vmax.xlane.f32.xlu2 %v959_v56  ;;  %v1221_v56 = vmul.f32 %v3664_v10, %v3570_v9 }
 0x285   : > { %v1223_v60 = vpack.c.bf16 %v1221_v56, %v1220_v59 }
 0x294   : > { %1009 = vrot.lane.b32.xlu1 %v1004_v61, %s3360_s26 }
 0x29c   : > { %1007 = vrot.lane.b32.xlu1 %v1003_v3, %s3360_s26  ;;  %v1080_v3 = vpack.c.bf16 %v1077_v2, %v1076_v0 }
 0x2a4   : > { %1086 = vrot.lane.b32.xlu1 %v1081_v8, %s3359_s20 }
 0x2ac   : > { %1226 = vrot.lane.b32.xlu1 %v1222_v14, %s3359_s20 }
 0x2dc   : > { %v827_v16 = vpop.f32.mrf.mxu3 }
 0x2dd   : > { %v837_v17 = vmul.f32 0.35355338, %v827_v16 }
 0x2de   : > { %v952_v18 = vpop.xlane.xlu2 %951 }
 0x2df   : > { %v962_v19 = vsub.f32 %v946_v38, %v952_v18  ;;  %v3672_v20 = vadd.f32 %v837_v17, %v3619_v36 }
 0x2e1   : > { %v966_v21 = vmul.f32 1.442695, %v962_v19  ;;  %v845_v22 = vsel %vm761_vm1, %v3672_v20, -inf }
 0x2e2   : > { %846 = vmax.xlane.f32.xlu1 %v845_v22 }
 0x2e3   : > { %3176 = vpow2.f32 %v966_v21 }
 0x2e4   : > { %v829_v23 = vpop.f32.mrf.mxu3 }
 0x2e5   : > { %v838_v16 = vmul.f32 0.35355338, %v829_v23 }
 0x2e6   : > { %v955_v24 = vpop.xlane.xlu2 %954 }
 0x2e7   : > { %v963_v29 = vsub.f32 %v947_v45, %v955_v24  ;;  %v3701_v17 = vadd.f32 %v838_v16, %v3628_v41 }
 0x2e9   : > { %v3177_v31 = vpop.eup %3176  ;;  %v968_v33 = vmul.f32 1.442695, %v963_v29  ;;  %v848_v18 = vsel %vm761_vm1, %v3701_v17, -inf }
 0x2ea   : > { %v974_v34 = vsel %vm761_vm1, %v3177_v31, 0.0 }
 0x2eb   : > { %3178 = vpow2.f32 %v968_v33  ;;  %975 = vadd.xlane.f32.xlu0 %v974_v34 }
 0x2ec   : > { %v832_v35 = vpop.f32.mrf.mxu3 }
 0x2ed   : > { %v839_v22 = vmul.f32 0.35355338, %v832_v35 }
 0x2ee   : > { %v958_v51 = vpop.xlane.xlu1 %957 }
 0x2ef   : > { %v964_v8 = vsub.f32 %v3638_v50, %v958_v51 }
 0x2f1   : > { %v3179_v37 = vpop.eup %3178  ;;  %v970_v11 = vmul.f32 1.442695, %v964_v8 }
 0x2f2   : > { %v977_v38 = vsel %vm761_vm1, %v3179_v37, 0.0 }
 0x2f3   : > { %978 = vadd.xlane.f32.xlu2 %v977_v38 }
 0x2f4   : > { %v834_v39 = vpop.f32.mrf.mxu3 }
 0x2f5   : > { %v840_v40 = vmul.f32 0.35355338, %v834_v39  ;;  %v3710_v39 = vadd.f32 %v839_v22, %v3635_v48 }
 0x2f6   : > { %v961_v44 = vpop.xlane.xlu2 %960 }
 0x2f7   : > { %v965_v46 = vsub.f32 %v949_v55, %v961_v44  ;;  %v3679_v47 = vadd.f32 %v840_v40, %v3645_v53  ;;  %v851_v40 = vsel %vm761_vm1, %v3710_v39, -inf }
 0x2f9   : > { %v972_v49 = vmul.f32 1.442695, %v965_v46  ;;  %v854_v45 = vsel %vm761_vm1, %v3679_v47, -inf }
 0x2fa   : > { %855 = vmax.xlane.f32.xlu1 %v854_v45 }
 0x2fb   : > { %3180 = vpow2.f32 %v972_v49 }
 0x2fc   : > { %3182 = vpow2.f32 %v970_v11 }
 0x301   : > { %v3683_v52 = vpop.eup %3180 }
 0x302   : > { %v983_v54 = vsel %vm761_vm1, %v3683_v52, 0.0  ;;  %v3183_v12 = vpop.eup %3182 }
 0x303   : > { %984 = vadd.xlane.f32.xlu0 %v983_v54  ;;  %v980_v14 = vsel %vm761_vm1, %v3183_v12, 0.0 }
 0x306   : > { %v1010_v55 = vpop.permute.xlu1 %1009 }
 0x307   : > { %1025 = vmatpush.bf16.msrb.mxu1 %v1010_v55 }
 0x30b   : > { %1228 = vrot.lane.b32.xlu2 %v1223_v60, %s3359_s20 }
 0x30e   : > { %v1008_v61 = vpop.permute.xlu1 %1007 }
 0x30f   : > { %1026 = vmatpush.bf16.msrb.mxu1 %v1008_v61 }
 0x316   : > { %v1087_v4 = vpop.permute.xlu1 %1086 }
 0x317   : > { %1084 = vrot.lane.b32.xlu0 %v1080_v3, %s3359_s20  ;;  %v1092_v5 = vsel %vm761_vm1, %v1087_v4, 0 }
 0x318   : > { %1100 = vmatpush.bf16.xpose.msrb.mxu0 %v1092_v5 }
 0x334   : > { %981 = vadd.xlane.f32.xlu2 %v980_v14 }
 0x341   : > { %849 = vmax.xlane.f32.xlu0 %v848_v18 }
 0x34c   : > { %889 = vrot.lane.b32.xlu2 %v787_v6, %s3360_s26  ;;  %v1227_v6 = vpop.permute.xlu1 %1226 }
 0x34d   : > { %v1231_v35 = vsel %vm761_vm1, %v1227_v6, 0 }
 0x355   : > { %v847_v46 = vpop.xlane.xlu1 %846 }
 0x356   : > { %v857_v49 = vsub.f32 %v3672_v20, %v847_v46 }
 0x358   : > { %v861_v51 = vmul.f32 1.442695, %v857_v49 }
 0x35e   : > { %v976_v19 = vpop.xlane.xlu0 %975 }
 0x35f   : > { %3184 = vrcp.f32 %v976_v19 }
 0x365   : > { %v3185_v21 = vpop.eup %3184 }
 0x366   : > { %v979_v50 = vpop.xlane.xlu2 %978  ;;  %v990_v29 = vmul.f32 %v3185_v21, %v3177_v31 }
 0x367   : > { %3186 = vrcp.f32 %v979_v50 }
 0x36d   : > { %v3187_v24 = vpop.eup %3186 }
 0x36e   : > { %v991_v23 = vmul.f32 %v3187_v24, %v3179_v37  ;;  %v1229_v33 = vpop.permute.xlu2 %1228 }
 0x36f   : > { %v1234_v34 = vsel %vm761_vm1, %v1229_v33, 0 }
 0x370   : > { %1242 = vmatpush.bf16.xpose.msra.mxu1 %v1234_v34  ;;  %v1001_v38 = vpack.c.bf16 %v991_v23, %v990_v29 }
 0x372   : > { %2970 = vmatmul.msk.bf16.vlgmr.msrb.gmra.mxu1 %vm761_vm1, %v1001_v38 }
 0x375   : > { %852 = vmax.xlane.f32.xlu2 %v851_v40 }
 0x376   : > { %v985_v31 = vpop.xlane.xlu0 %984 }
 0x377   : > { %3188 = vrcp.f32 %v985_v31 }
 0x378   : > { %1243 = vmatpush.bf16.xpose.msra.mxu1 %v1231_v35 }
 0x37d   : > { %v3189_v54 = vpop.eup %3188 }
 0x37e   : > { %v993_v59 = vmul.f32 %v3189_v54, %v3683_v52 }
 0x389   : > { %v1085_v37 = vpop.permute.xlu0 %1084 }
 0x38a   : > { %v1089_v44 = vsel %vm761_vm1, %v1085_v37, 0 }
 0x38b   : > { %1101 = vmatpush.bf16.xpose.msrb.mxu0 %v1089_v44  ;;  %v856_v44 = vpop.xlane.xlu1 %855 }
 0x38c   : > { %v860_v49 = vsub.f32 %v3679_v47, %v856_v44 }
 0x38d   : > { %1165 = vrot.lane.b32.xlu2 %v1071_v13, %s3360_s26 }
 0x38e   : > { %v867_v54 = vmul.f32 1.442695, %v860_v49 }
 0x392   : > { %2974 = vmatmul.msk.bf16.vlgmr.msrb.gmra.mxu0 %vm761_vm1, %v3598_v25 }
 0x3a2   : > { %2975 = vmatmul.msk.bf16.gmra.mxu0 %vm761_vm1, %v3604_v26 }
 0x3a7   : > { %v982_v45 = vpop.xlane.xlu2 %981 }
 0x3a8   : > { %3190 = vrcp.f32 %v982_v45 }
 0x3a9   : > { %3192 = vpow2.f32 %v861_v51 }
 0x3ae   : > { %v3191_v56 = vpop.eup %3190 }
 0x3af   : > { %v992_v55 = vmul.f32 %v3191_v56, %v3183_v12  ;;  %v3726_v60 = vpop.eup %3192  ;;  %v3762_v23 = vpop.permute.xlu2 %889 }
 0x3b0   : > { %v869_v61 = vsel %vm761_vm1, %v3726_v60, 0.0  ;;  %v894_v33 = vmul.f32 %v3762_v23, %v3565_v7  ;;  %v895_v34 = vmul.f32 %v3762_v23, %v3570_v9  ;;  %v892_v38 = vmul.f32 %v3762_v23, %v3553_v62 }
 0x3b1   : > { %v1002_v13 = vpack.c.bf16 %v993_v59, %v992_v55  ;;  %v893_v6 = vmul.f32 %v3762_v23, %v3557_v1 }
 0x3b2   : > { %v899_v40 = vpack.c.bf16 %v895_v34, %v894_v33 }
 0x3b3   : > { %2971 = vmatmul.msk.bf16.gmra.mxu1 %vm761_vm1, %v1002_v13  ;;  %v898_v31 = vpack.c.bf16 %v893_v6, %v892_v38 }
 0x3b6   : > { %870 = vadd.xlane.f32.xlu2 %v869_v61 }
 0x3c3   : > { %2978 = vmatmul.msk.bf16.vlgmr.msra.gmra.mxu1 %vm761_vm1, %v3598_v25 }
 0x3d3   : > { %2979 = vmatmul.msk.bf16.gmra.mxu1 %vm761_vm1, %v3604_v26  ;;  %v850_v26 = vpop.xlane.xlu0 %849 }
 0x3d4   : > { %v858_v14 = vsub.f32 %v3701_v17, %v850_v26 }
 0x3d6   : > { %v863_v18 = vmul.f32 1.442695, %v858_v14 }
 0x3d8   : > { %3194 = vpow2.f32 %v863_v18 }
 0x3de   : > { %v3756_v24 = vpop.eup %3194 }
 0x3df   : > { %v872_v17 = vsel %vm761_vm1, %v3756_v24, 0.0 }
 0x3e8   : > { %v853_v37 = vpop.xlane.xlu2 %852 }
 0x3e9   : > { %v859_v46 = vsub.f32 %v3710_v39, %v853_v37 }
 0x3eb   : > { %v865_v51 = vmul.f32 1.442695, %v859_v46 }
 0x3ed   : > { %3196 = vpow2.f32 %v865_v51 }
 0x3ee   : > { %3198 = vpow2.f32 %v867_v54 }
 0x3ef   : > { %v3760_v29 = vpop.f32.mrf.mxu1 }
 0x3f3   : > { %v3785_v55 = vpop.eup %3196 }
 0x3f4   : > { %v3787_v59 = vpop.eup %3198  ;;  %v875_v61 = vsel %vm761_vm1, %v3785_v55, 0.0 }
 0x3f5   : > { %v878_v39 = vsel %vm761_vm1, %v3787_v59, 0.0 }
 0x3f7   : > { %v3775_v35 = vpop.f32.mrf.mxu1 }
 0x40f   : > { %v1103_v20 = vpop.f32.mrf.mxu0 }
 0x410   : > { %v1113_v0 = vmul.f32 0.35355338, %v1103_v20 }
 0x412   : > { %v3736_v2 = vadd.f32 %v1113_v0, %v3619_v36 }
 0x414   : > { %v1121_v52 = vsel %vm761_vm1, %v3736_v2, -inf }
 0x415   : > { %1122 = vmax.xlane.f32.xlu1 %v1121_v52 }
 0x417   : > { %v1105_v3 = vpop.f32.mrf.mxu0 }
 0x418   : > { %v1114_v4 = vmul.f32 0.35355338, %v1105_v3 }
 0x41a   : > { %v3741_v5 = vadd.f32 %v1114_v4, %v3628_v41 }
 0x41c   : > { %v1124_v25 = vsel %vm761_vm1, %v3741_v5, -inf }
 0x41d   : > { %1125 = vmax.xlane.f32.xlu0 %v1124_v25 }
 0x41f   : > { %v1108_v8 = vpop.f32.mrf.mxu0 }
 0x420   : > { %v1115_v11 = vmul.f32 0.35355338, %v1108_v8 }
 0x422   : > { %v3746_v12 = vadd.f32 %v1115_v11, %v3635_v48 }
 0x424   : > { %v1127_v16 = vsel %vm761_vm1, %v3746_v12, -inf }
 0x425   : > { %1128 = vmax.xlane.f32.xlu1 %v1127_v16 }
 0x427   : > { %v1110_v19 = vpop.f32.mrf.mxu0 }
 0x428   : > { %v1116_v50 = vmul.f32 0.35355338, %v1110_v19 }
 0x42a   : > { %v3752_v21 = vadd.f32 %v1116_v50, %v3645_v53 }
 0x42c   : > { %v1130_v22 = vsel %vm761_vm1, %v3752_v21, -inf }
 0x42d   : > { %1131 = vmax.xlane.f32.xlu0 %v1130_v22 }
 0x430   : > { %v3779_v30 = vpop.f32.mrf.mxu1 }
 0x435   : > { %873 = vadd.xlane.f32.xlu0 %v872_v17 }
 0x43e   : > { %1307 = vrot.lane.b32.xlu1 %v1213_v32, %s3360_s26  ;;  %v3781_v32 = vpop.f32.mrf.mxu1 }
 0x446   : > { %1042 = vrot.lane.b32.xlu1 %v899_v40, %s3360_s26  ;;  %v1245_v45 = vpop.f32.mrf.mxu1 }
 0x447   : > { %v1255_v13 = vmul.f32 0.35355338, %v1245_v45 }
 0x449   : > { %1040 = vrot.lane.b32.xlu0 %v898_v31, %s3360_s26  ;;  %v3794_v47 = vadd.f32 %v1255_v13, %v3619_v36 }
 0x44b   : > { %v1263_v3 = vsel %vm761_vm1, %v3794_v47, -inf }
 0x44e   : > { %v1247_v56 = vpop.f32.mrf.mxu1 }
 0x44f   : > { %v1256_v20 = vmul.f32 0.35355338, %v1247_v56 }
 0x451   : > { %v3797_v52 = vadd.f32 %v1256_v20, %v3628_v41 }
 0x453   : > { %v1266_v25 = vsel %vm761_vm1, %v3797_v52, -inf }
 0x456   : > { %v1250_v0 = vpop.f32.mrf.mxu1 }
 0x457   : > { %v1257_v4 = vmul.f32 0.35355338, %v1250_v0 }
 0x459   : > { %v3804_v8 = vadd.f32 %v1257_v4, %v3635_v48 }
 0x45b   : > { %v1269_v36 = vsel %vm761_vm1, %v3804_v8, -inf }
 0x45e   : > { %v1252_v26 = vpop.f32.mrf.mxu1 }
 0x45f   : > { %v1258_v11 = vmul.f32 0.35355338, %v1252_v26 }
 0x461   : > { %v3809_v41 = vadd.f32 %v1258_v11, %v3645_v53  ;;  %v3819_v53 = vpop.permute.xlu2 %1165 }
 0x462   : > { %v1169_v34 = vmul.f32 %v3819_v53, %v3557_v1  ;;  %v1170_v44 = vmul.f32 %v3819_v53, %v3565_v7  ;;  %v1171_v46 = vmul.f32 %v3819_v53, %v3570_v9 }
 0x463   : > { %v1272_v18 = vsel %vm761_vm1, %v3809_v41, -inf }
 0x464   : > { %v1175_v56 = vpack.c.bf16 %v1171_v46, %v1170_v44 }
 0x469   : > { %v871_v49 = vpop.xlane.xlu2 %870 }
 0x470   : > { %876 = vadd.xlane.f32.xlu1 %v875_v61 }
 0x473   : > { %879 = vadd.xlane.f32.xlu0 %v878_v39 }
 0x478   : > { %1264 = vmax.xlane.f32.xlu1 %v1263_v3 }
 0x47b   : > { %1267 = vmax.xlane.f32.xlu0 %v1266_v25 }
 0x483   : > { %1270 = vmax.xlane.f32.xlu0 %v1269_v36 }
 0x488   : > { %v1123_v14 = vpop.xlane.xlu1 %1122 }
 0x489   : > { %v1133_v16 = vsub.f32 %v3736_v2, %v1123_v14  ;;  %v1168_v2 = vmul.f32 %v3819_v53, %v3553_v62 }
 0x48b   : > { %v1137_v19 = vmul.f32 1.442695, %v1133_v16  ;;  %1273 = vmax.xlane.f32.xlu0 %v1272_v18  ;;  %v1174_v6 = vpack.c.bf16 %v1169_v34, %v1168_v2 }
 0x48d   : > { %3200 = vpow2.f32 %v1137_v19 }
 0x490   : > { %v1126_v48 = vpop.xlane.xlu0 %1125 }
 0x491   : > { %v1134_v50 = vsub.f32 %v3741_v5, %v1126_v48 }
 0x493   : > { %v3815_v22 = vpop.eup %3200  ;;  %v1139_v17 = vmul.f32 1.442695, %v1134_v50 }
 0x494   : > { %v1145_v33 = vsel %vm761_vm1, %v3815_v22, 0.0 }
 0x495   : > { %3202 = vpow2.f32 %v1139_v17  ;;  %1146 = vadd.xlane.f32.xlu2 %v1145_v33 }
 0x498   : > { %v1129_v31 = vpop.xlane.xlu1 %1128 }
 0x499   : > { %v1135_v2 = vsub.f32 %v3746_v12, %v1129_v31 }
 0x49b   : > { %v3825_v38 = vpop.eup %3202 }
 0x49c   : > { %v1148_v5 = vsel %vm761_vm1, %v3825_v38, 0.0 }
 0x49d   : > { %1149 = vadd.xlane.f32.xlu2 %v1148_v5  ;;  %v1141_v5 = vmul.f32 1.442695, %v1135_v2 }
 0x49f   : > { %1178 = vrot.lane.b32.xlu0 %v1174_v6, %s3360_s26 }
 0x4a0   : > { %v1132_v40 = vpop.xlane.xlu0 %1131 }
 0x4a1   : > { %v1136_v20 = vsub.f32 %v3752_v21, %v1132_v40 }
 0x4a3   : > { %v1143_v4 = vmul.f32 1.442695, %v1136_v20 }
 0x4a8   : > { %v874_v37 = vpop.xlane.xlu0 %873 }
 0x4a9   : > { %3204 = vrcp.f32 %v874_v37 }
 0x4aa   : > { %3206 = vrcp.f32 %v871_v49 }
 0x4ab   : > { %3208 = vpow2.f32 %v1143_v4 }
 0x4af   : > { %v3205_v61 = vpop.eup %3204 }
 0x4b0   : > { %v3834_v45 = vpop.permute.xlu1 %1307  ;;  %v3207_v0 = vpop.eup %3206  ;;  %v886_v3 = vmul.f32 %v3205_v61, %v3756_v24 }
 0x4b1   : > { %v1312_v51 = vmul.f32 %v3834_v45, %v3565_v7  ;;  %v1313_v54 = vmul.f32 %v3834_v45, %v3570_v9  ;;  %v885_v25 = vmul.f32 %v3207_v0, %v3726_v60  ;;  %v3846_v26 = vpop.eup %3208 }
 0x4b2   : > { %v1154_v11 = vsel %vm761_vm1, %v3846_v26, 0.0 }
 0x4b3   : > { %v1317_v13 = vpack.c.bf16 %v1313_v54, %v1312_v51  ;;  %v896_v9 = vpack.c.bf16 %v886_v3, %v885_v25  ;;  %v1310_v54 = vmul.f32 %v3834_v45, %v3553_v62 }
 0x4b5   : > { %1180 = vrot.lane.b32.xlu2 %v1175_v56, %s3360_s26  ;;  %1322 = vrot.lane.b32.xlu1 %v1317_v13, %s3360_s26  ;;  %v1311_v56 = vmul.f32 %v3834_v45, %v3557_v1 }
 0x4b7   : > { %v1316_v13 = vpack.c.bf16 %v1311_v56, %v1310_v54 }
 0x4b8   : > { %v1043_v39 = vpop.permute.xlu1 %1042 }
 0x4b9   : > { %1058 = vmatpush.bf16.msrb.mxu3 %v1043_v39 }
 0x4bb   : > { %v1041_v7 = vpop.permute.xlu0 %1040 }
 0x4bd   : > { %1059 = vmatpush.bf16.msrb.mxu3 %v1041_v7 }
 0x4c0   : > { %2972 = vmatmul.msk.bf16.vlgmr.msrb.gmra.mxu3 %vm761_vm1, %v896_v9 }
 0x4c9   : > { %1155 = vadd.xlane.f32.xlu0 %v1154_v11 }
 0x4e3   : > { %v877_v21 = vpop.xlane.xlu1 %876 }
 0x4e4   : > { %3210 = vrcp.f32 %v877_v21 }
 0x4e6   : > { %v880_v36 = vpop.xlane.xlu0 %879 }
 0x4e7   : > { %3212 = vrcp.f32 %v880_v36 }
 0x4ea   : > { %v3211_v24 = vpop.eup %3210 }
 0x4eb   : > { %v1265_v14 = vpop.xlane.xlu1 %1264  ;;  %v887_v48 = vmul.f32 %v3211_v24, %v3785_v55 }
 0x4ec   : > { %v1275_v16 = vsub.f32 %v3794_v47, %v1265_v14 }
 0x4ed   : > { %v3213_v60 = vpop.eup %3212 }
 0x4ee   : > { %v1279_v18 = vmul.f32 1.442695, %v1275_v16  ;;  %v1268_v19 = vpop.xlane.xlu0 %1267  ;;  %v888_v50 = vmul.f32 %v3213_v60, %v3787_v59 }
 0x4ef   : > { %v1276_v17 = vsub.f32 %v3797_v52, %v1268_v19 }
 0x4f0   : > { %3214 = vpow2.f32 %v1279_v18  ;;  %v897_v33 = vpack.c.bf16 %v888_v50, %v887_v48 }
 0x4f1   : > { %v1281_v34 = vmul.f32 1.442695, %v1276_v17 }
 0x4f2   : > { %2973 = vmatmul.msk.bf16.gmra.mxu3 %vm761_vm1, %v897_v33 }
 0x4f3   : > { %3216 = vpow2.f32 %v1281_v34 }
 0x4f4   : > { %3218 = vpow2.f32 %v1141_v5 }
 0x4f6   : > { %v3215_v6 = vpop.eup %3214  ;;  %v1271_v47 = vpop.xlane.xlu0 %1270 }
 0x4f7   : > { %v1287_v40 = vsel %vm761_vm1, %v3215_v6, 0.0  ;;  %v1277_v1 = vsub.f32 %v3804_v8, %v1271_v47 }
 0x4f8   : > { %1288 = vadd.xlane.f32.xlu2 %v1287_v40 }
 0x4f9   : > { %v3217_v37 = vpop.eup %3216  ;;  %v1283_v25 = vmul.f32 1.442695, %v1277_v1 }
 0x4fa   : > { %v1290_v55 = vsel %vm761_vm1, %v3217_v37, 0.0  ;;  %v3219_v52 = vpop.eup %3218 }
 0x4fb   : > { %1291 = vadd.xlane.f32.xlu1 %v1290_v55  ;;  %v1151_v31 = vsel %vm761_vm1, %v3219_v52, 0.0 }
 0x4fe   : > { %v1274_v59 = vpop.xlane.xlu0 %1273 }
 0x4ff   : > { %v1278_v44 = vsub.f32 %v3809_v41, %v1274_v59  ;;  %v3139_v59 = vld [vmem:[%s4498_s9 + $0x8] sm:$0xff] }
 0x500   : > { %1386 = vmatpush.bf16.msra.mxu0 %v3139_v59 }
 0x501   : > { %v1285_v12 = vmul.f32 1.442695, %v1278_v44 }
 0x503   : > { %3220 = vpow2.f32 %v1285_v12  ;;  %1152 = vadd.xlane.f32.xlu1 %v1151_v31 }
 0x508   : > { %v1147_v46 = vpop.xlane.xlu2 %1146 }
 0x509   : > { %v3221_v49 = vpop.eup %3220 }
 0x50a   : > { %v1296_v51 = vsel %vm761_vm1, %v3221_v49, 0.0 }
 0x50b   : > { %1297 = vadd.xlane.f32.xlu1 %v1296_v51 }
 0x510   : > { %v1150_v61 = vpop.xlane.xlu2 %1149  ;;  %1320 = vrot.lane.b32.xlu2 %v1316_v13, %s3360_s26 }
 0x511   : > { %3222 = vrcp.f32 %v1150_v61  ;;  %v1179_v4 = vpop.permute.xlu0 %1178 }
 0x512   : > { %3224 = vrcp.f32 %v1147_v46 }
 0x513   : > { %3226 = vpow2.f32 %v1283_v25 }
 0x517   : > { %v3223_v41 = vpop.eup %3222 }
 0x518   : > { %v1181_v20 = vpop.permute.xlu2 %1180  ;;  %v3225_v39 = vpop.eup %3224  ;;  %v1162_v0 = vmul.f32 %v3223_v41, %v3825_v38 }
 0x519   : > { %1196 = vmatpush.bf16.msra.mxu2 %v1181_v20  ;;  %v1161_v3 = vmul.f32 %v3225_v39, %v3815_v22  ;;  %v3227_v9 = vpop.eup %3226 }
 0x51a   : > { %v1293_v11 = vsel %vm761_vm1, %v3227_v9, 0.0 }
 0x51b   : > { %v1172_v62 = vpack.c.bf16 %v1162_v0, %v1161_v3 }
 0x51d   : > { %1197 = vmatpush.bf16.msra.mxu2 %v1179_v4 }
 0x520   : > { %2976 = vmatmul.msk.bf16.vlgmr.msra.gmra.mxu2 %vm761_vm1, %v1172_v62 }
 0x527   : > { %v1323_v7 = vpop.permute.xlu1 %1322 }
 0x528   : > { %1338 = vmatpush.bf16.msra.mxu3 %v1323_v7 }
 0x539   : > { %1294 = vadd.xlane.f32.xlu2 %v1293_v11 }
 0x53c   : > { %v1156_v22 = vpop.xlane.xlu0 %1155 }
 0x543   : > { %v1061_v55 = vpop.f32.mrf.mxu3 }
 0x544   : > { %v1062_v51 = vadd.f32 %v1061_v55, %v3760_v29 }
 0x56b   : > { %v1289_v21 = vpop.xlane.xlu2 %1288 }
 0x56c   : > { %3228 = vrcp.f32 %v1289_v21  ;;  %v3890_v21 = vld [vmem:[%s4502_s13] sm:$0x3f] }
 0x56e   : > { %v1292_v38 = vpop.xlane.xlu1 %1291 }
 0x56f   : > { %3230 = vrcp.f32 %v1292_v38  ;;  %v1361_v38 = vperm.slane %v3890_v21, 0 }
 0x570   : > { %3232 = vrcp.f32 %v1156_v22 }
 0x572   : > { %v3229_v36 = vpop.eup %3228 }
 0x573   : > { %v1321_v24 = vpop.permute.xlu2 %1320  ;;  %v1303_v16 = vmul.f32 %v3229_v36, %v3215_v6 }
 0x574   : > { %1339 = vmatpush.bf16.msra.mxu3 %v1321_v24 }
 0x575   : > { %v3231_v14 = vpop.eup %3230 }
 0x576   : > { %v1304_v8 = vmul.f32 %v3231_v14, %v3217_v37  ;;  %v1153_v60 = vpop.xlane.xlu1 %1152  ;;  %v3233_v19 = vpop.eup %3232 }
 0x577   : > { %3234 = vrcp.f32 %v1153_v60  ;;  %v1164_v17 = vmul.f32 %v3233_v19, %v3846_v26  ;;  %v1063_v26 = vpop.f32.mrf.mxu3 }
 0x578   : > { %v1314_v18 = vpack.c.bf16 %v1304_v8, %v1303_v16  ;;  %v1064_v54 = vadd.f32 %v1063_v26, %v3775_v35 }
 0x57a   : > { %2980 = vmatmul.msk.bf16.vlgmr.msra.gmra.mxu3 %vm761_vm1, %v1314_v18 }
 0x57d   : > { %v3235_v48 = vpop.eup %3234 }
 0x57e   : > { %v1163_v50 = vmul.f32 %v3235_v48, %v3219_v52  ;;  %v1298_v2 = vpop.xlane.xlu1 %1297  ;;  %v3138_v52 = vld [vmem:[%s4498_s9] sm:$0xff] }
 0x57f   : > { %3236 = vrcp.f32 %v1298_v2  ;;  %1387 = vmatpush.bf16.msra.mxu0 %v3138_v52  ;;  %v1066_v44 = vpop.f32.mrf.mxu3  ;;  %v3361_v2 = vmov 32.0  }
 0x580   : > { %v1173_v33 = vpack.c.bf16 %v1164_v17, %v1163_v50  ;;  %v1067_v62 = vadd.f32 %v1066_v44, %v3779_v30 }
 0x582   : > { %2977 = vmatmul.msk.bf16.gmra.mxu2 %vm761_vm1, %v1173_v33 }
 0x585   : > { %v3237_v5 = vpop.eup %3236 }
 0x586   : > { %v1306_v40 = vmul.f32 %v3237_v5, %v3221_v49 }
 0x587   : > { %v1068_v12 = vpop.f32.mrf.mxu3 }
 0x588   : > { %v1069_v1 = vadd.f32 %v1068_v12, %v3781_v32 }
 0x5a3   : > { %v1199_v31 = vpop.f32.mrf.mxu2 }
 0x5a4   : > { %v1209_v56 = vadd.f32 %v1199_v31, %v1062_v51 }
 0x5ab   : > { %v1201_v49 = vpop.f32.mrf.mxu2 }
 0x5ac   : > { %v1295_v34 = vpop.xlane.xlu2 %1294  ;;  %v1210_v13 = vadd.f32 %v1201_v49, %v1064_v54 }
 0x5ad   : > { %3238 = vrcp.f32 %v1295_v34 }
 0x5ae   : > { %3240 = vrcp.f32 %v3361_v2 }
 0x5b3   : > { %v3239_v6 = vpop.eup %3238 }
 0x5b4   : > { %v1305_v47 = vmul.f32 %v3239_v6, %v3227_v9 }
 0x5b6   : > { %v1315_v37 = vpack.c.bf16 %v1306_v40, %v1305_v47 }
 0x5b8   : > { %2981 = vmatmul.msk.bf16.gmra.mxu3 %vm761_vm1, %v1315_v37 }
 0x5fd   : > { %v1341_v46 = vpop.f32.mrf.mxu3 }
 0x5fe   : > { %v1351_v41 = vadd.f32 %v1341_v46, %v1209_v56 }
 0x605   : > { %v1343_v61 = vpop.f32.mrf.mxu3  ;;  %v1204_v0 = vpop.f32.mrf.mxu2 }
 0x606   : > { %v1352_v20 = vadd.f32 %v1343_v61, %v1210_v13  ;;  %v1211_v7 = vadd.f32 %v1204_v0, %v1067_v62  ;;  %v3141_v0 = vld [vmem:[%s4499_s10 + $0x8] sm:$0xff]  ;;  %v3140_v62 = vld [vmem:[%s4499_s10] sm:$0xff] }
 0x607   : > { %1542 = vmatpush.bf16.msrb.mxu2 %v3141_v0 }
 0x608   : > { %v1359_v39 = vpack.c.bf16 %v1352_v20, %v1351_v41 }
 0x60a   : > { %2990 = vmatmul.msk.bf16.vlgmr.msra.gmra.mxu0 %vm761_vm1, %v1359_v39 }
 0x60b   : > { %1543 = vmatpush.bf16.msrb.mxu2 %v3140_v62 }
 0x60d   : > { %v1206_v4 = vpop.f32.mrf.mxu2 }
 0x60e   : > { %v1212_v25 = vadd.f32 %v1206_v4, %v1069_v1 }
 0x63b   : > { %v1346_v3 = vpop.f32.mrf.mxu3 }
 0x63c   : > { %v1353_v9 = vadd.f32 %v1346_v3, %v1211_v7 }
 0x643   : > { %v1348_v29 = vpop.f32.mrf.mxu3 }
 0x644   : > { %v1354_v35 = vadd.f32 %v1348_v29, %v1212_v25 }
 0x646   : > { %v1360_v11 = vpack.c.bf16 %v1354_v35, %v1353_v9 }
 0x648   : > { %2991 = vmatmul.msk.bf16.gmra.mxu0 %vm761_vm1, %v1360_v11 }
 0x687   : > { %v1389_v22 = vpop.f32.mrf.mxu0 }
 0x688   : > { %v1390_v36 = vadd.f32 %v1389_v22, %v1361_v38 }
 0x68a   : > { %v1399_v30 = vadd.f32 %v1390_v36, %v3530_v42 }
 0x68c   : > { %v1403_v32 = vsel %vm761_vm1, %v1399_v30, 0.0 }
 0x68d   : > { %1404 = vadd.xlane.f32.xlu0 %v1403_v32 }
 0x68f   : > { %v1391_v24 = vpop.f32.mrf.mxu0 }
 0x690   : > { %v1392_v14 = vadd.f32 %v1391_v24, %v1361_v38 }
 0x692   : > { %v1400_v16 = vadd.f32 %v1392_v14, %v3532_v43  ;;  %v3241_v43 = vpop.eup %3240 }
 0x693   : > { %v1416_v34 = vmul.f32 32.0, %v3241_v43  ;;  %vm1420_vm2 = vweird.f32 %v3241_v43 }
 0x694   : > { %v1406_v8 = vsel %vm761_vm1, %v1400_v16, 0.0 }
 0x695   : > { %1407 = vadd.xlane.f32.xlu2 %v1406_v8  ;;  %v1417_v5 = vsub.f32 1.0, %v1416_v34 }
 0x697   : > { %v1418_v6 = vmul.f32 %v3241_v43, %v1417_v5 }
 0x699   : > { %v1419_v47 = vadd.f32 %v3241_v43, %v1418_v6 }
 0x69b   : > { %v3901_v40 = vsel %vm1420_vm2, %v3241_v43, %v1419_v47 }
 0x6c5   : > { %v1394_v60 = vpop.f32.mrf.mxu0 }
 0x6c6   : > { %v1395_v18 = vadd.f32 %v1394_v60, %v1361_v38  ;;  %v1498_v60 = vperm.slane %v3890_v21, 1 }
 0x6c8   : > { %v1401_v19 = vadd.f32 %v1395_v18, %v3543_v57 }
 0x6ca   : > { %v1409_v48 = vsel %vm761_vm1, %v1401_v19, 0.0 }
 0x6cb   : > { %1410 = vadd.xlane.f32.xlu1 %v1409_v48 }
 0x6cd   : > { %v1396_v50 = vpop.f32.mrf.mxu0 }
 0x6ce   : > { %v1397_v17 = vadd.f32 %v1396_v50, %v1361_v38  ;;  %v1503_v50 = vperm.slane %v3890_v21, 2 }
 0x6d0   : > { %v1402_v42 = vadd.f32 %v1397_v17, %v3545_v58 }
 0x6d2   : > { %v1412_v33 = vsel %vm761_vm1, %v1402_v42, 0.0 }
 0x6d3   : > { %1413 = vadd.xlane.f32.xlu0 %v1412_v33 }
 0x700   : > { %v1405_v57 = vpop.xlane.xlu0 %1404 }
 0x701   : > { %v1422_v37 = vmul.f32 %v3901_v40, %v1405_v57 }
 0x703   : > { %v1426_v55 = vsub.f32 %v1399_v30, %v1422_v37 }
 0x705   : > { %v1430_v59 = vmul.f32 %v1426_v55, %v1426_v55 }
 0x707   : > { %v1434_v58 = vsel %vm761_vm1, %v1430_v59, 0.0 }
 0x708   : > { %v1408_v26 = vpop.xlane.xlu2 %1407  ;;  %1435 = vadd.xlane.f32.xlu2 %v1434_v58 }
 0x709   : > { %v1423_v52 = vmul.f32 %v3901_v40, %v1408_v26 }
 0x70b   : > { %v1427_v44 = vsub.f32 %v1400_v16, %v1423_v52 }
 0x70d   : > { %v1431_v12 = vmul.f32 %v1427_v44, %v1427_v44 }
 0x70f   : > { %v1437_v31 = vsel %vm761_vm1, %v1431_v12, 0.0 }
 0x710   : > { %1438 = vadd.xlane.f32.xlu1 %v1437_v31 }
 0x73e   : > { %v1411_v46 = vpop.xlane.xlu1 %1410 }
 0x73f   : > { %v1424_v49 = vmul.f32 %v3901_v40, %v1411_v46 }
 0x741   : > { %v3908_v51 = vsub.f32 %v1401_v19, %v1424_v49 }
 0x743   : > { %v1432_v54 = vmul.f32 %v3908_v51, %v3908_v51 }
 0x745   : > { %v1440_v56 = vsel %vm761_vm1, %v1432_v54, 0.0 }
 0x746   : > { %v1414_v13 = vpop.xlane.xlu0 %1413  ;;  %1441 = vadd.xlane.f32.xlu0 %v1440_v56 }
 0x747   : > { %v1425_v61 = vmul.f32 %v3901_v40, %v1414_v13 }
 0x749   : > { %v3914_v41 = vsub.f32 %v1402_v42, %v1425_v61 }
 0x74b   : > { %v1433_v20 = vmul.f32 %v3914_v41, %v3914_v41 }
 0x74d   : > { %v1443_v39 = vsel %vm761_vm1, %v1433_v20, 0.0 }
 0x74e   : > { %1444 = vadd.xlane.f32.xlu2 %v1443_v39 }
 0x77b   : > { %v1436_v3 = vpop.xlane.xlu2 %1435 }
 0x77c   : > { %v1446_v4 = vmul.f32 %v1436_v3, %v3901_v40 }
 0x77e   : > { %v1450_v1 = vadd.f32 1e-05, %v1446_v4 }
 0x780   : > { %3242 = vrsqrt.f32 %v1450_v1  ;;  %vm1460_vm4 = vweird.f32 %v1450_v1 }
 0x783   : > { %v1439_v7 = vpop.xlane.xlu1 %1438 }
 0x784   : > { %v1447_v25 = vmul.f32 %v1439_v7, %v3901_v40 }
 0x786   : > { %v3243_v29 = vpop.eup %3242  ;;  %v1451_v9 = vadd.f32 1e-05, %v1447_v25  ;;  %v3145_v25 = vld [vmem:[%s4501_s12 + $0x18] sm:$0xff] }
 0x787   : > { %v1455_v35 = vmul.f32 %v3243_v29, %v1450_v1  ;;  %vm1461_vm3 = vweird.f32 %v3243_v29  ;;  %1604 = vmatpush.bf16.msrb.mxu1 %v3145_v25 }
 0x788   : > { %3244 = vrsqrt.f32 %v1451_v9  ;;  %vm1462_vm5 = vmor %vm1460_vm4, %vm1461_vm3  ;;  %vm1470_vm7 = vweird.f32 %v1451_v9 }
 0x789   : > { %v1456_v11 = vmul.f32 %v3243_v29, %v1455_v35  ;;  %v3172_v35 = vld [vmem:[%s4500_s11] ss:$0 sm:$0xff] }
 0x78b   : > { %v1457_v38 = vmul.f32 0.5, %v1456_v11 }
 0x78d   : > { %v1458_v22 = vsub.f32 1.5, %v1457_v38 }
 0x78e   : > { %v3245_v36 = vpop.eup %3244 }
 0x78f   : > { %v1459_v30 = vmul.f32 %v3243_v29, %v1458_v22  ;;  %v1465_v32 = vmul.f32 %v3245_v36, %v1451_v9  ;;  %vm1471_vm6 = vweird.f32 %v3245_v36 }
 0x790   : > { %vm1472_vm8 = vmor %vm1470_vm7, %vm1471_vm6 }
 0x791   : > { %v1466_v24 = vmul.f32 %v3245_v36, %v1465_v32  ;;  %v1463_v14 = vsel %vm1462_vm5, %v3243_v29, %v1459_v30  ;;  %v3142_v29 = vld [vmem:[%s4501_s12] sm:$0xff] }
 0x792   : > { %v1494_v18 = vmul.f32 %v1463_v14, %v1426_v55 }
 0x793   : > { %v1467_v16 = vmul.f32 0.5, %v1466_v24 }
 0x794   : > { %v1499_v17 = vmul.f32 %v1498_v60, %v1494_v18 }
 0x795   : > { %v1468_v8 = vsub.f32 1.5, %v1467_v16 }
 0x796   : > { %v3929_v2 = vadd.f32 %v1503_v50, %v1499_v17 }
 0x797   : > { %v1469_v19 = vmul.f32 %v3245_v36, %v1468_v8 }
 0x799   : > { %v1473_v48 = vsel %vm1472_vm8, %v3245_v36, %v1469_v19 }
 0x79a   : > { %v1495_v42 = vmul.f32 %v1473_v48, %v1427_v44  ;;  %v1569_v48 = vperm.slane %v3890_v21, 3 }
 0x79c   : > { %v1500_v33 = vmul.f32 %v1498_v60, %v1495_v42 }
 0x79e   : > { %v3931_v43 = vadd.f32 %v1503_v50, %v1500_v33 }
 0x7a0   : > { %v1512_v34 = vpack.c.bf16 %v3931_v43, %v3929_v2 }
 0x7a2   : > { %3000 = vmatmul.msk.bf16.vlgmr.msrb.gmra.mxu2 %vm761_vm1, %v1512_v34 }
 0x7b9   : > { %v1442_v5 = vpop.xlane.xlu0 %1441 }
 0x7ba   : > { %v1448_v6 = vmul.f32 %v1442_v5, %v3901_v40 }
 0x7bc   : > { %v1452_v47 = vadd.f32 1e-05, %v1448_v6 }
 0x7be   : > { %3246 = vrsqrt.f32 %v1452_v47  ;;  %vm1480_vm10 = vweird.f32 %v1452_v47 }
 0x7c1   : > { %v1445_v57 = vpop.xlane.xlu2 %1444 }
 0x7c2   : > { %v1449_v37 = vmul.f32 %v1445_v57, %v3901_v40 }
 0x7c4   : > { %v3247_v55 = vpop.eup %3246  ;;  %v1453_v59 = vadd.f32 1e-05, %v1449_v37 }
 0x7c5   : > { %v1475_v58 = vmul.f32 %v3247_v55, %v1452_v47  ;;  %vm1481_vm9 = vweird.f32 %v3247_v55 }
 0x7c6   : > { %3248 = vrsqrt.f32 %v1453_v59  ;;  %vm1482_vm11 = vmor %vm1480_vm10, %vm1481_vm9  ;;  %vm1490_vm13 = vweird.f32 %v1453_v59 }
 0x7c7   : > { %v1476_v26 = vmul.f32 %v3247_v55, %v1475_v58 }
 0x7c9   : > { %v1477_v52 = vmul.f32 0.5, %v1476_v26 }
 0x7cb   : > { %v1478_v44 = vsub.f32 1.5, %v1477_v52 }
 0x7cc   : > { %v3249_v12 = vpop.eup %3248 }
 0x7cd   : > { %v1479_v31 = vmul.f32 %v3247_v55, %v1478_v44  ;;  %v1485_v46 = vmul.f32 %v3249_v12, %v1453_v59  ;;  %vm1491_vm12 = vweird.f32 %v3249_v12 }
 0x7ce   : > { %vm1492_vm14 = vmor %vm1490_vm13, %vm1491_vm12 }
 0x7cf   : > { %v1486_v49 = vmul.f32 %v3249_v12, %v1485_v46  ;;  %v1483_v54 = vsel %vm1482_vm11, %v3247_v55, %v1479_v31 }
 0x7d0   : > { %v1496_v61 = vmul.f32 %v1483_v54, %v3908_v51  ;;  %v3144_v51 = vld [vmem:[%s4501_s12 + $0x10] sm:$0xff] }
 0x7d1   : > { %v1487_v56 = vmul.f32 0.5, %v1486_v49  ;;  %1605 = vmatpush.bf16.msrb.mxu1 %v3144_v51 }
 0x7d2   : > { %v1501_v3 = vmul.f32 %v1498_v60, %v1496_v61 }
 0x7d3   : > { %v1488_v13 = vsub.f32 1.5, %v1487_v56 }
 0x7d4   : > { %v1506_v62 = vadd.f32 %v1503_v50, %v1501_v3 }
 0x7d5   : > { %v1489_v20 = vmul.f32 %v3249_v12, %v1488_v13 }
 0x7d7   : > { %v1493_v39 = vsel %vm1492_vm14, %v3249_v12, %v1489_v20 }
 0x7d8   : > { %v1497_v0 = vmul.f32 %v1493_v39, %v3914_v41  ;;  %v3143_v41 = vld [vmem:[%s4501_s12 + $0x8] sm:$0xff] }
 0x7d9   : > { %1606 = vmatpush.bf16.msrb.mxu1 %v3143_v41  ;;  %v3147_v41 = vld [vmem:[%s4496_s7 + $0x18] sm:$0xff] }
 0x7da   : > { %v1502_v4 = vmul.f32 %v1498_v60, %v1497_v0  ;;  %1759 = vmatpush.bf16.msrb.mxu3 %v3147_v41 }
 0x7dc   : > { %v1507_v1 = vadd.f32 %v1503_v50, %v1502_v4 }
 0x7dd   : > { %1607 = vmatpush.bf16.msrb.mxu1 %v3142_v29 }
 0x7de   : > { %v1513_v7 = vpack.c.bf16 %v1507_v1, %v1506_v62 }
 0x7e0   : > { %3001 = vmatmul.msk.bf16.gmra.mxu2 %vm761_vm1, %v1513_v7 }
 0x825   : > { %v1545_v9 = vpop.f32.mrf.mxu2 }
 0x826   : > { %v1546_v11 = vadd.f32 %v3172_v35, %v1545_v9 }
 0x828   : > { %v1555_v36 = vmax.f32 %v1546_v11, 0.0 }
 0x82d   : > { %v1547_v38 = vpop.f32.mrf.mxu2 }
 0x82e   : > { %v1548_v22 = vadd.f32 %v3172_v35, %v1547_v38 }
 0x830   : > { %v1556_v30 = vmax.f32 %v1548_v22, 0.0 }
 0x832   : > { %v1567_v32 = vpack.c.bf16 %v1556_v30, %v1555_v36 }
 0x834   : > { %3018 = vmatmul.msk.bf16.vlgmr.msrb.gmra.mxu1 %vm685_vm0, %v1567_v32 }
 0x863   : > { %v1550_v24 = vpop.f32.mrf.mxu2 }
 0x864   : > { %v1551_v14 = vadd.f32 %v3172_v35, %v1550_v24 }
 0x866   : > { %v1557_v60 = vmax.f32 %v1551_v14, 0.0 }
 0x86b   : > { %v1552_v16 = vpop.f32.mrf.mxu2 }
 0x86c   : > { %v1553_v8 = vadd.f32 %v3172_v35, %v1552_v16  ;;  %v3146_v35 = vld [vmem:[%s4496_s7 + $0x10] sm:$0xff] }
 0x86d   : > { %1760 = vmatpush.bf16.msrb.mxu3 %v3146_v35 }
 0x86e   : > { %v1558_v18 = vmax.f32 %v1553_v8, 0.0 }
 0x870   : > { %v1568_v19 = vpack.c.bf16 %v1558_v18, %v1557_v60 }
 0x872   : > { %3019 = vmatmul.msk.bf16.gmra.mxu1 %vm685_vm0, %v1568_v19 }
 0x8b1   : > { %v1609_v50 = vpop.f32.mrf.mxu1 }
 0x8b2   : > { %v1610_v17 = vadd.f32 %v1609_v50, %v1569_v48 }
 0x8b4   : > { %v1619_v42 = vadd.f32 %v1610_v17, %v3929_v2 }
 0x8b6   : > { %v1623_v33 = vsel %vm761_vm1, %v1619_v42, 0.0 }
 0x8b7   : > { %1624 = vadd.xlane.f32.xlu1 %v1623_v33 }
 0x8b9   : > { %v1611_v34 = vpop.f32.mrf.mxu1 }
 0x8ba   : > { %v1612_v5 = vadd.f32 %v1611_v34, %v1569_v48 }
 0x8bc   : > { %v1620_v6 = vadd.f32 %v1612_v5, %v3931_v43 }
 0x8be   : > { %v1626_v47 = vsel %vm761_vm1, %v1620_v6, 0.0 }
 0x8bf   : > { %1627 = vadd.xlane.f32.xlu0 %v1626_v47 }
 0x8ef   : > { %v1614_v57 = vpop.f32.mrf.mxu1 }
 0x8f0   : > { %v1615_v37 = vadd.f32 %v1614_v57, %v1569_v48 }
 0x8f2   : > { %v1621_v55 = vadd.f32 %v1615_v37, %v1506_v62 }
 0x8f4   : > { %v1629_v59 = vsel %vm761_vm1, %v1621_v55, 0.0 }
 0x8f5   : > { %1630 = vadd.xlane.f32.xlu2 %v1629_v59 }
 0x8f7   : > { %v1616_v58 = vpop.f32.mrf.mxu1 }
 0x8f8   : > { %v1617_v26 = vadd.f32 %v1616_v58, %v1569_v48 }
 0x8fa   : > { %v1622_v52 = vadd.f32 %v1617_v26, %v1507_v1 }
 0x8fc   : > { %v1632_v2 = vsel %vm761_vm1, %v1622_v52, 0.0 }
 0x8fd   : > { %1633 = vadd.xlane.f32.xlu1 %v1632_v2 }
 0x92a   : > { %v1625_v44 = vpop.xlane.xlu1 %1624 }
 0x92b   : > { %v1635_v12 = vmul.f32 %v1625_v44, %v3901_v40 }
 0x92d   : > { %v1639_v31 = vsub.f32 %v1619_v42, %v1635_v12  ;;  %v1711_v42 = vperm.slane %v3890_v21, 4 }
 0x92f   : > { %v1643_v43 = vmul.f32 %v1639_v31, %v1639_v31 }
 0x931   : > { %v1647_v46 = vsel %vm761_vm1, %v1643_v43, 0.0 }
 0x932   : > { %v1628_v49 = vpop.xlane.xlu0 %1627  ;;  %1648 = vadd.xlane.f32.xlu0 %v1647_v46 }
 0x933   : > { %v1636_v54 = vmul.f32 %v1628_v49, %v3901_v40 }
 0x935   : > { %v1640_v56 = vsub.f32 %v1620_v6, %v1636_v54  ;;  %v1716_v6 = vperm.slane %v3890_v21, 5 }
 0x937   : > { %v1644_v13 = vmul.f32 %v1640_v56, %v1640_v56 }
 0x939   : > { %v1650_v61 = vsel %vm761_vm1, %v1644_v13, 0.0 }
 0x93a   : > { %1651 = vadd.xlane.f32.xlu2 %v1650_v61 }
 0x968   : > { %v1631_v20 = vpop.xlane.xlu2 %1630 }
 0x969   : > { %v1637_v39 = vmul.f32 %v1631_v20, %v3901_v40 }
 0x96b   : > { %v3970_v0 = vsub.f32 %v1621_v55, %v1637_v39 }
 0x96d   : > { %v1645_v3 = vmul.f32 %v3970_v0, %v3970_v0 }
 0x96f   : > { %v1653_v4 = vsel %vm761_vm1, %v1645_v3, 0.0 }
 0x970   : > { %1654 = vadd.xlane.f32.xlu1 %v1653_v4  ;;  %v1634_v62 = vpop.xlane.xlu1 %1633 }
 0x971   : > { %v1638_v1 = vmul.f32 %v1634_v62, %v3901_v40 }
 0x973   : > { %v3976_v7 = vsub.f32 %v1622_v52, %v1638_v1 }
 0x975   : > { %v1646_v25 = vmul.f32 %v3976_v7, %v3976_v7 }
 0x977   : > { %v1656_v51 = vsel %vm761_vm1, %v1646_v25, 0.0 }
 0x978   : > { %1657 = vadd.xlane.f32.xlu0 %v1656_v51 }
 0x9a5   : > { %v1649_v29 = vpop.xlane.xlu0 %1648 }
 0x9a6   : > { %v1659_v9 = vmul.f32 %v1649_v29, %v3901_v40 }
 0x9a8   : > { %v1663_v11 = vadd.f32 1e-05, %v1659_v9 }
 0x9aa   : > { %3250 = vrsqrt.f32 %v1663_v11  ;;  %vm1673_vm2 = vweird.f32 %v1663_v11 }
 0x9ad   : > { %v1652_v38 = vpop.xlane.xlu2 %1651 }
 0x9ae   : > { %v1660_v22 = vmul.f32 %v1652_v38, %v3901_v40 }
 0x9b0   : > { %v3251_v36 = vpop.eup %3250  ;;  %v1664_v30 = vadd.f32 1e-05, %v1660_v22 }
 0x9b1   : > { %v1668_v32 = vmul.f32 %v3251_v36, %v1663_v11  ;;  %vm1674_vm15 = vweird.f32 %v3251_v36 }
 0x9b2   : > { %3252 = vrsqrt.f32 %v1664_v30  ;;  %vm1675_vm3 = vmor %vm1673_vm2, %vm1674_vm15  ;;  %vm1683_vm5 = vweird.f32 %v1664_v30 }
 0x9b3   : > { %v1669_v24 = vmul.f32 %v3251_v36, %v1668_v32 }
 0x9b5   : > { %v1670_v14 = vmul.f32 0.5, %v1669_v24 }
 0x9b7   : > { %v1671_v16 = vsub.f32 1.5, %v1670_v14 }
 0x9b8   : > { %v3253_v8 = vpop.eup %3252 }
 0x9b9   : > { %v1672_v60 = vmul.f32 %v3251_v36, %v1671_v16  ;;  %v1678_v18 = vmul.f32 %v3253_v8, %v1664_v30  ;;  %vm1684_vm4 = vweird.f32 %v3253_v8 }
 0x9ba   : > { %vm1685_vm6 = vmor %vm1683_vm5, %vm1684_vm4 }
 0x9bb   : > { %v1679_v19 = vmul.f32 %v3253_v8, %v1678_v18  ;;  %v1676_v48 = vsel %vm1675_vm3, %v3251_v36, %v1672_v60 }
 0x9bc   : > { %v1707_v33 = vmul.f32 %v1676_v48, %v1639_v31 }
 0x9bd   : > { %v1680_v50 = vmul.f32 0.5, %v1679_v19 }
 0x9be   : > { %v1712_v47 = vmul.f32 %v1711_v42, %v1707_v33 }
 0x9bf   : > { %v1681_v17 = vsub.f32 1.5, %v1680_v50 }
 0x9c0   : > { %v3991_v55 = vadd.f32 %v1716_v6, %v1712_v47 }
 0x9c1   : > { %v1682_v34 = vmul.f32 %v3253_v8, %v1681_v17 }
 0x9c3   : > { %v1686_v5 = vsel %vm1685_vm6, %v3253_v8, %v1682_v34 }
 0x9c4   : > { %v1708_v57 = vmul.f32 %v1686_v5, %v1640_v56 }
 0x9c6   : > { %v1713_v37 = vmul.f32 %v1711_v42, %v1708_v57 }
 0x9c8   : > { %v3993_v59 = vadd.f32 %v1716_v6, %v1713_v37 }
 0x9ca   : > { %v1728_v58 = vpack.c.bf16 %v3993_v59, %v3991_v55 }
 0x9cc   : > { %3034 = vmatmul.msk.bf16.vlgmr.msrb.gmra.mxu3 %vm761_vm1, %v1728_v58 }
 0x9e3   : > { %v1655_v26 = vpop.xlane.xlu1 %1654 }
 0x9e4   : > { %v1661_v52 = vmul.f32 %v1655_v26, %v3901_v40 }
 0x9e6   : > { %v1665_v2 = vadd.f32 1e-05, %v1661_v52 }
 0x9e8   : > { %3254 = vrsqrt.f32 %v1665_v2  ;;  %vm1693_vm8 = vweird.f32 %v1665_v2 }
 0x9eb   : > { %v1658_v44 = vpop.xlane.xlu0 %1657 }
 0x9ec   : > { %v1662_v21 = vmul.f32 %v1658_v44, %v3901_v40 }
 0x9ee   : > { %v3255_v12 = vpop.eup %3254  ;;  %v1666_v31 = vadd.f32 1e-05, %v1662_v21 }
 0x9ef   : > { %v1688_v43 = vmul.f32 %v3255_v12, %v1665_v2  ;;  %vm1694_vm7 = vweird.f32 %v3255_v12 }
 0x9f0   : > { %3256 = vrsqrt.f32 %v1666_v31  ;;  %vm1695_vm9 = vmor %vm1693_vm8, %vm1694_vm7  ;;  %vm1703_vm11 = vweird.f32 %v1666_v31 }
 0x9f1   : > { %v1689_v46 = vmul.f32 %v3255_v12, %v1688_v43 }
 0x9f3   : > { %v1690_v49 = vmul.f32 0.5, %v1689_v46 }
 0x9f5   : > { %v1691_v54 = vsub.f32 1.5, %v1690_v49 }
 0x9f6   : > { %v3257_v56 = vpop.eup %3256 }
 0x9f7   : > { %v1692_v13 = vmul.f32 %v3255_v12, %v1691_v54  ;;  %v1698_v61 = vmul.f32 %v3257_v56, %v1666_v31  ;;  %vm1704_vm10 = vweird.f32 %v3257_v56 }
 0x9f8   : > { %vm1705_vm12 = vmor %vm1703_vm11, %vm1704_vm10 }
 0x9f9   : > { %v1699_v20 = vmul.f32 %v3257_v56, %v1698_v61  ;;  %v1696_v39 = vsel %vm1695_vm9, %v3255_v12, %v1692_v13 }
 0x9fa   : > { %v1709_v62 = vmul.f32 %v1696_v39, %v3970_v0  ;;  %v3173_v0 = vld [vmem:[%s4497_s8 + $0x1] ss:$0 sm:$0xff] }
 0x9fb   : > { %v1700_v3 = vmul.f32 0.5, %v1699_v20 }
 0x9fc   : > { %v1714_v41 = vmul.f32 %v1711_v42, %v1709_v62 }
 0x9fd   : > { %v1701_v4 = vsub.f32 1.5, %v1700_v3 }
 0x9fe   : > { %v4002_v9 = vadd.f32 %v1716_v6, %v1714_v41 }
 0x9ff   : > { %v1702_v1 = vmul.f32 %v3257_v56, %v1701_v4 }
 0xa01   : > { %v1706_v25 = vsel %vm1705_vm12, %v3257_v56, %v1702_v1 }
 0xa02   : > { %v1710_v51 = vmul.f32 %v1706_v25, %v3976_v7 }
 0xa04   : > { %v1715_v29 = vmul.f32 %v1711_v42, %v1710_v51 }
 0xa06   : > { %v4004_v35 = vadd.f32 %v1716_v6, %v1715_v29 }
 0xa08   : > { %v1729_v11 = vpack.c.bf16 %v4004_v35, %v4002_v9 }
 0xa0a   : > { %3035 = vmatmul.msk.bf16.gmra.mxu3 %vm761_vm1, %v1729_v11 }
 0xa4f   : > { %v1762_v38 = vpop.f32.mrf.mxu3 }
 0xa50   : > { %v1763_v22 = vadd.f32 %v3173_v0, %v1762_v38 }
 0xa52   : > { %v1877_v7 = vmul.f32 %v1763_v22, %v3555_v63  ;;  %v1772_v32 = vmul.f32 %v1763_v22, %v3582_v15  ;;  %v4015_v24 = vmul.f32 %v1763_v22, %v3608_v27  ;;  %v4018_v14 = vmul.f32 %v1763_v22, %v3610_v28 }
 0xa53   : > { %v4021_v16 = vmul.f32 %v1763_v22, %v3664_v10  ;;  %v4024_v8 = vmul.f32 %v1763_v22, %v3762_v23  ;;  %v4027_v60 = vmul.f32 %v1763_v22, %v3819_v53  ;;  %v4030_v18 = vmul.f32 %v1763_v22, %v3834_v45 }
 0xa57   : > { %v1764_v36 = vpop.f32.mrf.mxu3 }
 0xa58   : > { %v1765_v30 = vadd.f32 %v3173_v0, %v1764_v36 }
 0xa5a   : > { %v1878_v19 = vmul.f32 %v1765_v30, %v3555_v63  ;;  %v1773_v48 = vmul.f32 %v1765_v30, %v3582_v15  ;;  %v4034_v50 = vpack.c.bf16 %v1765_v30, %v1763_v22  ;;  %v4037_v17 = vmul.f32 %v1765_v30, %v3608_v27 }
 0xa5b   : > { %v4040_v42 = vmul.f32 %v1765_v30, %v3610_v28  ;;  %v4043_v33 = vmul.f32 %v1765_v30, %v3664_v10  ;;  %v4046_v34 = vmul.f32 %v1765_v30, %v3762_v23  ;;  %v4049_v5 = vmul.f32 %v1765_v30, %v3819_v53 }
 0xa5c   : > { %v1881_v6 = vpack.c.bf16 %v1878_v19, %v1877_v7  ;;  %v1778_v47 = vpack.c.bf16 %v1773_v48, %v1772_v32  ;;  %v1972_v57 = vpack.c.bf16 %v4037_v17, %v4015_v24  ;;  %v4054_v37 = vmul.f32 %v1765_v30, %v3834_v45  ;;  %v4127_v19 = vld [vmem:[%s4491_s2] sm:$0xff] }
 0xa5d   : > { %v2044_v58 = vpack.c.bf16 %v4040_v42, %v4018_v14  ;;  %v2178_v26 = vpack.c.bf16 %v4043_v33, %v4021_v16  ;;  %v1875_v52 = vpack.c.bf16 %v4046_v34, %v4024_v8  ;;  %v2135_v2 = vpack.c.bf16 %v4049_v5, %v4027_v60 }
 0xa5e   : > { %1885 = vrot.lane.b32.xlu1 %v1881_v6, %s3359_s20  ;;  %v2269_v44 = vpack.c.bf16 %v4054_v37, %v4030_v18 }
 0xa8d   : > { %v1767_v21 = vpop.f32.mrf.mxu3 }
 0xa8e   : > { %v1768_v12 = vadd.f32 %v3173_v0, %v1767_v21 }
 0xa90   : > { %v1968_v43 = vmul.f32 %v1768_v12, %v3608_v27  ;;  %v1879_v49 = vmul.f32 %v1768_v12, %v3555_v63  ;;  %v1774_v54 = vmul.f32 %v1768_v12, %v3582_v15  ;;  %v4071_v56 = vmul.f32 %v1768_v12, %v3610_v28 }
 0xa91   : > { %v4074_v13 = vmul.f32 %v1768_v12, %v3664_v10  ;;  %v4077_v61 = vmul.f32 %v1768_v12, %v3762_v23  ;;  %v4080_v20 = vmul.f32 %v1768_v12, %v3819_v53  ;;  %v4083_v39 = vmul.f32 %v1768_v12, %v3834_v45 }
 0xa95   : > { %v1769_v31 = vpop.f32.mrf.mxu3 }
 0xa96   : > { %v1770_v46 = vadd.f32 %v3173_v0, %v1769_v31 }
 0xa98   : > { %v1969_v3 = vmul.f32 %v1770_v46, %v3608_v27  ;;  %v1880_v4 = vmul.f32 %v1770_v46, %v3555_v63  ;;  %v4087_v62 = vpack.c.bf16 %v1770_v46, %v1768_v12  ;;  %v1775_v1 = vmul.f32 %v1770_v46, %v3582_v15  ;;  %v4134_v12 = vld [vmem:[%s4491_s2 + $0x8] sm:$0xff] }
 0xa99   : > { %v4091_v25 = vmul.f32 %v1770_v46, %v3610_v28  ;;  %v4094_v51 = vmul.f32 %v1770_v46, %v3664_v10  ;;  %v4097_v41 = vmul.f32 %v1770_v46, %v3762_v23  ;;  %v4100_v29 = vmul.f32 %v1770_v46, %v3819_v53 }
 0xa9a   : > { %v1973_v11 = vpack.c.bf16 %v1969_v3, %v1968_v43  ;;  %v1882_v27 = vpack.c.bf16 %v1880_v4, %v1879_v49  ;;  %v1779_v0 = vpack.c.bf16 %v1775_v1, %v1774_v54  ;;  %v4103_v63 = vmul.f32 %v1770_v46, %v3834_v45  ;;  %v4141_v54 = vld [vmem:[%s4491_s2 + $0x10] sm:$0xff] }
 0xa9b   : > { %v2045_v15 = vpack.c.bf16 %v4091_v25, %v4071_v56  ;;  %v2179_v28 = vpack.c.bf16 %v4094_v51, %v4074_v13  ;;  %v1876_v10 = vpack.c.bf16 %v4097_v41, %v4077_v61  ;;  %v2136_v23 = vpack.c.bf16 %v4100_v29, %v4080_v20 }
 0xa9c   : > { %1978 = vrot.lane.b32.xlu1 %v1973_v11, %s3360_s26  ;;  %1887 = vrot.lane.b32.xlu2 %v1882_v27, %s3359_s20  ;;  %v2270_v53 = vpack.c.bf16 %v4103_v63, %v4083_v39  ;;  %v4148_v27 = vld [vmem:[%s4491_s2 + $0x18] sm:$0xff] }
 0xaa4   : > { %1782 = vrot.lane.b32.xlu2 %v1778_v47, %s3359_s20 }
 0xad0   : > { %v1886_v22 = vpop.permute.xlu1 %1885 }
 0xad1   : > { %v1890_v36 = vsel %vm761_vm1, %v1886_v22, 0 }
 0xaf6   : > { %v1888_v45 = vpop.permute.xlu2 %1887 }
 0xaf7   : > { %v1893_v38 = vsel %vm761_vm1, %v1888_v45, 0 }
 0xaf8   : > { %1901 = vmatpush.bf16.xpose.msra.mxu2 %v1893_v38 }
 0xb00   : > { %1902 = vmatpush.bf16.xpose.msra.mxu2 %v1890_v36 }
 0xb07   : > { %3038 = vmatmul.msk.bf16.vlgmr.msra.gmra.mxu2 %vm761_vm1, %v4034_v50 }
 0xb0e   : > { %v1979_v7 = vpop.permute.xlu1 %1978 }
 0xb0f   : > { %1994 = vmatpush.bf16.msra.mxu1 %v1979_v7 }
 0xb17   : > { %3039 = vmatmul.msk.bf16.gmra.mxu2 %vm761_vm1, %v4087_v62 }
 0xb8a   : > { %v1904_v30 = vpop.f32.mrf.mxu2 }
 0xb8b   : > { %v1914_v32 = vmul.f32 0.35355338, %v1904_v30 }
 0xb8d   : > { %v1918_v48 = vadd.f32 %v4127_v19, %v1914_v32 }
 0xb8f   : > { %v1922_v6 = vsel %vm761_vm1, %v1918_v48, -inf }
 0xb90   : > { %1923 = vmax.xlane.f32.xlu0 %v1922_v6 }
 0xb92   : > { %v1906_v47 = vpop.f32.mrf.mxu2 }
 0xb93   : > { %v1915_v21 = vmul.f32 0.35355338, %v1906_v47 }
 0xb95   : > { %v1919_v31 = vadd.f32 %v4134_v12, %v1915_v21 }
 0xb97   : > { %v1925_v43 = vsel %vm761_vm1, %v1919_v31, -inf }
 0xb98   : > { %1926 = vmax.xlane.f32.xlu0 %v1925_v43  ;;  %v1783_v43 = vpop.permute.xlu2 %1782 }
 0xb9a   : > { %v1909_v46 = vpop.f32.mrf.mxu2 }
 0xb9b   : > { %v1916_v49 = vmul.f32 0.35355338, %v1909_v46 }
 0xb9d   : > { %v1920_v3 = vadd.f32 %v4141_v54, %v1916_v49 }
 0xb9f   : > { %v1928_v4 = vsel %vm761_vm1, %v1920_v3, -inf }
 0xba0   : > { %1929 = vmax.xlane.f32.xlu0 %v1928_v4 }
 0xba2   : > { %v1911_v1 = vpop.f32.mrf.mxu2 }
 0xba3   : > { %v1917_v11 = vmul.f32 0.35355338, %v1911_v1 }
 0xba5   : > { %v1921_v45 = vadd.f32 %v4148_v27, %v1917_v11 }
 0xba7   : > { %v1931_v38 = vsel %vm761_vm1, %v1921_v45, -inf }
 0xba8   : > { %1932 = vmax.xlane.f32.xlu2 %v1931_v38 }
 0xbb4   : > { %1784 = vrot.lane.b32.xlu0 %v1779_v0, %s3359_s20 }
 0xbc0   : > { %1976 = vrot.lane.b32.xlu2 %v1972_v57, %s3360_s26 }
 0xc03   : > { %v1924_v22 = vpop.xlane.xlu0 %1923 }
 0xc04   : > { %v1934_v36 = vsub.f32 %v1918_v48, %v1924_v22 }
 0xc06   : > { %v1938_v7 = vmul.f32 1.442695, %v1934_v36 }
 0xc08   : > { %3258 = vpow2.f32 %v1938_v7 }
 0xc0b   : > { %v1927_v30 = vpop.xlane.xlu0 %1926 }
 0xc0c   : > { %v1935_v32 = vsub.f32 %v1919_v31, %v1927_v30 }
 0xc0e   : > { %v3259_v6 = vpop.eup %3258  ;;  %v1940_v47 = vmul.f32 1.442695, %v1935_v32 }
 0xc0f   : > { %v1946_v21 = vsel %vm761_vm1, %v3259_v6, 0.0 }
 0xc10   : > { %3260 = vpow2.f32 %v1940_v47  ;;  %1947 = vadd.xlane.f32.xlu1 %v1946_v21 }
 0xc13   : > { %v1930_v46 = vpop.xlane.xlu0 %1929 }
 0xc14   : > { %v1936_v0 = vsub.f32 %v1920_v3, %v1930_v46 }
 0xc16   : > { %v3261_v49 = vpop.eup %3260  ;;  %v1942_v4 = vmul.f32 1.442695, %v1936_v0 }
 0xc17   : > { %v1949_v24 = vsel %vm761_vm1, %v3261_v49, 0.0 }
 0xc18   : > { %3262 = vpow2.f32 %v1942_v4  ;;  %1950 = vadd.xlane.f32.xlu0 %v1949_v24 }
 0xc1b   : > { %v1933_v17 = vpop.xlane.xlu2 %1932 }
 0xc1c   : > { %v1937_v57 = vsub.f32 %v1921_v45, %v1933_v17  ;;  %v1793_v45 = vsel %vm761_vm1, %v1783_v43, 0 }
 0xc1e   : > { %v3263_v48 = vpop.eup %3262  ;;  %v1944_v1 = vmul.f32 1.442695, %v1937_v57 }
 0xc1f   : > { %v1952_v31 = vsel %vm761_vm1, %v3263_v48, 0.0 }
 0xc20   : > { %3264 = vpow2.f32 %v1944_v1  ;;  %1953 = vadd.xlane.f32.xlu0 %v1952_v31 }
 0xc23   : > { %v1977_v11 = vpop.permute.xlu2 %1976 }
 0xc24   : > { %1995 = vmatpush.bf16.msra.mxu1 %v1977_v11 }
 0xc26   : > { %v3265_v38 = vpop.eup %3264  ;;  %v1785_v22 = vpop.permute.xlu0 %1784 }
 0xc27   : > { %v1796_v3 = vsel %vm761_vm1, %v1785_v22, 0  ;;  %v1955_v36 = vsel %vm761_vm1, %v3265_v38, 0.0 }
 0xc28   : > { %1804 = vmatpush.bf16.xpose.msrb.mxu0 %v1796_v3  ;;  %1956 = vadd.xlane.f32.xlu2 %v1955_v36 }
 0xc29   : > { %2050 = vrot.lane.b32.xlu1 %v2045_v15, %s3359_s20 }
 0xc30   : > { %1805 = vmatpush.bf16.xpose.msrb.mxu0 %v1793_v45 }
 0xc31   : > { %2048 = vrot.lane.b32.xlu1 %v2044_v58, %s3359_s20 }
 0xc34   : > { %2184 = vrot.lane.b32.xlu0 %v2179_v28, %s3359_s20 }
 0xc37   : > { %3036 = vmatmul.msk.bf16.vlgmr.msrb.gmra.mxu0 %vm761_vm1, %v4034_v50 }
 0xc39   : > { %2182 = vrot.lane.b32.xlu1 %v2178_v26, %s3359_s20 }
 0xc47   : > { %3037 = vmatmul.msk.bf16.gmra.mxu0 %vm761_vm1, %v4087_v62 }
 0xc83   : > { %v1948_v56 = vpop.xlane.xlu1 %1947 }
 0xc84   : > { %3266 = vrcp.f32 %v1948_v56 }
 0xc8a   : > { %v3267_v42 = vpop.eup %3266 }
 0xc8b   : > { %v1951_v14 = vpop.xlane.xlu0 %1950  ;;  %v1962_v25 = vmul.f32 %v3267_v42, %v3259_v6 }
 0xc8c   : > { %3268 = vrcp.f32 %v1951_v14 }
 0xc92   : > { %v3269_v58 = vpop.eup %3268 }
 0xc93   : > { %v1963_v13 = vmul.f32 %v3269_v58, %v3261_v49  ;;  %v1954_v15 = vpop.xlane.xlu0 %1953 }
 0xc94   : > { %3270 = vrcp.f32 %v1954_v15 }
 0xc95   : > { %v1970_v51 = vpack.c.bf16 %v1963_v13, %v1962_v25 }
 0xc97   : > { %3040 = vmatmul.msk.bf16.vlgmr.msra.gmra.mxu1 %vm761_vm1, %v1970_v51 }
 0xc9a   : > { %v3271_v33 = vpop.eup %3270 }
 0xc9b   : > { %v1957_v28 = vpop.xlane.xlu2 %1956  ;;  %v2051_v7 = vpop.permute.xlu1 %2050  ;;  %v1964_v32 = vmul.f32 %v3271_v33, %v3263_v48 }
 0xc9c   : > { %3272 = vrcp.f32 %v1957_v28  ;;  %v2056_v16 = vsel %vm761_vm1, %v2051_v7, 0 }
 0xc9d   : > { %2064 = vmatpush.bf16.xpose.msra.mxu0 %v2056_v16 }
 0xca2   : > { %v3273_v26 = vpop.eup %3272 }
 0xca3   : > { %v2049_v30 = vpop.permute.xlu1 %2048  ;;  %v1965_v47 = vmul.f32 %v3273_v26, %v3265_v38 }
 0xca4   : > { %v2053_v21 = vsel %vm761_vm1, %v2049_v30, 0 }
 0xca5   : > { %2065 = vmatpush.bf16.xpose.msra.mxu0 %v2053_v21  ;;  %v1971_v6 = vpack.c.bf16 %v1965_v47, %v1964_v32 }
 0xca6   : > { %v2185_v43 = vpop.permute.xlu0 %2184 }
 0xca7   : > { %v2190_v46 = vsel %vm761_vm1, %v2185_v43, 0  ;;  %3041 = vmatmul.msk.bf16.gmra.mxu1 %vm761_vm1, %v1971_v6 }
 0xca8   : > { %2198 = vmatpush.bf16.xpose.msrb.mxu1 %v2190_v46 }
 0xcab   : > { %v2183_v0 = vpop.permute.xlu1 %2182 }
 0xcac   : > { %3044 = vmatmul.msk.bf16.vlgmr.msra.gmra.mxu0 %vm761_vm1, %v4034_v50  ;;  %v2187_v49 = vsel %vm761_vm1, %v2183_v0, 0 }
 0xcb0   : > { %2199 = vmatpush.bf16.xpose.msrb.mxu1 %v2187_v49 }
 0xcb4   : > { %v1807_v4 = vpop.f32.mrf.mxu0 }
 0xcb5   : > { %v1817_v24 = vmul.f32 0.35355338, %v1807_v4 }
 0xcb7   : > { %3048 = vmatmul.msk.bf16.vlgmr.msrb.gmra.mxu1 %vm761_vm1, %v4034_v50  ;;  %v1821_v17 = vadd.f32 %v4127_v19, %v1817_v24 }
 0xcb9   : > { %v1825_v57 = vsel %vm761_vm1, %v1821_v17, -inf }
 0xcba   : > { %1826 = vmax.xlane.f32.xlu0 %v1825_v57 }
 0xcbc   : > { %v1809_v48 = vpop.f32.mrf.mxu0  ;;  %3045 = vmatmul.msk.bf16.gmra.mxu0 %vm761_vm1, %v4087_v62 }
 0xcbd   : > { %v1818_v1 = vmul.f32 0.35355338, %v1809_v48 }
 0xcbf   : > { %v1822_v31 = vadd.f32 %v4134_v12, %v1818_v1 }
 0xcc1   : > { %v1828_v11 = vsel %vm761_vm1, %v1822_v31, -inf }
 0xcc2   : > { %1829 = vmax.xlane.f32.xlu1 %v1828_v11 }
 0xcc4   : > { %v1812_v38 = vpop.f32.mrf.mxu0 }
 0xcc5   : > { %v1819_v22 = vmul.f32 0.35355338, %v1812_v38 }
 0xcc7   : > { %3049 = vmatmul.msk.bf16.gmra.mxu1 %vm761_vm1, %v4087_v62  ;;  %v1823_v50 = vadd.f32 %v4141_v54, %v1819_v22 }
 0xcc9   : > { %v1831_v3 = vsel %vm761_vm1, %v1823_v50, -inf }
 0xcca   : > { %1832 = vmax.xlane.f32.xlu2 %v1831_v3 }
 0xccc   : > { %v1814_v36 = vpop.f32.mrf.mxu0 }
 0xccd   : > { %v1820_v45 = vmul.f32 0.35355338, %v1814_v36 }
 0xccf   : > { %v1824_v56 = vadd.f32 %v4148_v27, %v1820_v45 }
 0xcd1   : > { %v1834_v14 = vsel %vm761_vm1, %v1824_v56, -inf }
 0xcd2   : > { %1835 = vmax.xlane.f32.xlu2 %v1834_v14 }
 0xd14   : > { %v4208_v13 = vpop.f32.mrf.mxu1 }
 0xd1c   : > { %v4217_v26 = vpop.f32.mrf.mxu1 }
 0xd29   : > { %v2067_v42 = vpop.f32.mrf.mxu0 }
 0xd2a   : > { %v2077_v58 = vmul.f32 0.35355338, %v2067_v42 }
 0xd2c   : > { %v4206_v25 = vadd.f32 %v4127_v19, %v2077_v58 }
 0xd2d   : > { %v1827_v47 = vpop.xlane.xlu0 %1826 }
 0xd2e   : > { %v2085_v62 = vsel %vm761_vm1, %v4206_v25, -inf  ;;  %v1837_v43 = vsub.f32 %v1821_v17, %v1827_v47 }
 0xd2f   : > { %2086 = vmax.xlane.f32.xlu2 %v2085_v62 }
 0xd30   : > { %v1841_v57 = vmul.f32 1.442695, %v1837_v43 }
 0xd31   : > { %v2069_v51 = vpop.f32.mrf.mxu0 }
 0xd32   : > { %v2078_v15 = vmul.f32 0.35355338, %v2069_v51 }
 0xd34   : > { %v4213_v28 = vadd.f32 %v4134_v12, %v2078_v15 }
 0xd35   : > { %v1830_v7 = vpop.xlane.xlu1 %1829 }
 0xd36   : > { %v1838_v16 = vsub.f32 %v1822_v31, %v1830_v7  ;;  %v2088_v33 = vsel %vm761_vm1, %v4213_v28, -inf  ;;  %v4228_v31 = vpop.f32.mrf.mxu1 }
 0xd37   : > { %2089 = vmax.xlane.f32.xlu2 %v2088_v33 }
 0xd38   : > { %v1843_v30 = vmul.f32 1.442695, %v1838_v16 }
 0xd39   : > { %v2072_v32 = vpop.f32.mrf.mxu0 }
 0xd3a   : > { %3274 = vpow2.f32 %v1843_v30  ;;  %v2079_v21 = vmul.f32 0.35355338, %v2072_v32 }
 0xd3c   : > { %v4220_v6 = vadd.f32 %v4141_v54, %v2079_v21 }
 0xd3d   : > { %v1833_v46 = vpop.xlane.xlu2 %1832 }
 0xd3e   : > { %v1839_v0 = vsub.f32 %v1823_v50, %v1833_v46  ;;  %v2091_v49 = vsel %vm761_vm1, %v4220_v6, -inf  ;;  %v4239_v42 = vpop.f32.mrf.mxu1 }
 0xd3f   : > { %2092 = vmax.xlane.f32.xlu2 %v2091_v49 }
 0xd40   : > { %v4224_v4 = vpop.eup %3274  ;;  %v1845_v24 = vmul.f32 1.442695, %v1839_v0 }
 0xd41   : > { %v2074_v48 = vpop.f32.mrf.mxu0  ;;  %v1852_v1 = vsel %vm761_vm1, %v4224_v4, 0.0 }
 0xd42   : > { %3276 = vpow2.f32 %v1845_v24  ;;  %v2080_v11 = vmul.f32 0.35355338, %v2074_v48  ;;  %1853 = vadd.xlane.f32.xlu1 %v1852_v1 }
 0xd43   : > { %3278 = vpow2.f32 %v1841_v57 }
 0xd44   : > { %v4231_v17 = vadd.f32 %v4148_v27, %v2080_v11 }
 0xd45   : > { %v1836_v38 = vpop.xlane.xlu2 %1835 }
 0xd46   : > { %v1840_v22 = vsub.f32 %v1824_v56, %v1836_v38  ;;  %v2094_v50 = vsel %vm761_vm1, %v4231_v17, -inf  ;;  %v2201_v51 = vpop.f32.mrf.mxu1 }
 0xd47   : > { %2095 = vmax.xlane.f32.xlu0 %v2094_v50  ;;  %v2211_v47 = vmul.f32 0.35355338, %v2201_v51 }
 0xd48   : > { %v4235_v3 = vpop.eup %3276  ;;  %v1847_v36 = vmul.f32 1.442695, %v1840_v22 }
 0xd49   : > { %v1855_v45 = vsel %vm761_vm1, %v4235_v3, 0.0  ;;  %v3279_v14 = vpop.eup %3278  ;;  %v2215_v61 = vadd.f32 %v4127_v19, %v2211_v47 }
 0xd4a   : > { %3280 = vpow2.f32 %v1847_v36  ;;  %1856 = vadd.xlane.f32.xlu1 %v1855_v45  ;;  %v1849_v58 = vsel %vm761_vm1, %v3279_v14, 0.0 }
 0xd4b   : > { %v2219_v41 = vsel %vm761_vm1, %v2215_v61, -inf }
 0xd4e   : > { %v2203_v15 = vpop.f32.mrf.mxu1 }
 0xd4f   : > { %1850 = vadd.xlane.f32.xlu0 %v1849_v58 }
 0xd50   : > { %v3281_v62 = vpop.eup %3280 }
 0xd51   : > { %v1858_v56 = vsel %vm761_vm1, %v3281_v62, 0.0 }
 0xd52   : > { %1859 = vadd.xlane.f32.xlu1 %v1858_v56 }
 0xd56   : > { %v2206_v7 = vpop.f32.mrf.mxu1 }
 0xd57   : > { %2011 = vrot.lane.b32.xlu2 %v1876_v10, %s3360_s26  ;;  %v2213_v51 = vmul.f32 0.35355338, %v2206_v7 }
 0xd5e   : > { %v2208_v16 = vpop.f32.mrf.mxu1 }
 0xd5f   : > { %v2214_v33 = vmul.f32 0.35355338, %v2208_v16 }
 0xd61   : > { %v4252_v30 = vadd.f32 %v4148_v27, %v2214_v33 }
 0xd63   : > { %2009 = vrot.lane.b32.xlu0 %v1875_v52, %s3360_s26  ;;  %v2228_v32 = vsel %vm761_vm1, %v4252_v30, -inf }
 0xd80   : > { %2229 = vmax.xlane.f32.xlu2 %v2228_v32 }
 0xd8d   : > { %2220 = vmax.xlane.f32.xlu0 %v2219_v41 }
 0xda2   : > { %v2087_v10 = vpop.xlane.xlu2 %2086 }
 0xda3   : > { %v2097_v8 = vsub.f32 %v4206_v25, %v2087_v10 }
 0xda5   : > { %v2101_v34 = vmul.f32 1.442695, %v2097_v8 }
 0xda7   : > { %3282 = vpow2.f32 %v2101_v34 }
 0xdaa   : > { %v2090_v52 = vpop.xlane.xlu2 %2089 }
 0xdab   : > { %v2098_v21 = vsub.f32 %v4213_v28, %v2090_v52 }
 0xdad   : > { %v4260_v27 = vpop.eup %3282  ;;  %v2103_v43 = vmul.f32 1.442695, %v2098_v21 }
 0xdae   : > { %v2109_v46 = vsel %vm761_vm1, %v4260_v27, 0.0 }
 0xdaf   : > { %3284 = vpow2.f32 %v2103_v43  ;;  %2110 = vadd.xlane.f32.xlu1 %v2109_v46 }
 0xdb2   : > { %v4264_v19 = vpop.xlane.xlu2 %2092 }
 0xdb3   : > { %v2099_v18 = vsub.f32 %v4220_v6, %v4264_v19 }
 0xdb5   : > { %v3285_v0 = vpop.eup %3284  ;;  %v1854_v57 = vpop.xlane.xlu1 %1853 }
 0xdb6   : > { %v2112_v49 = vsel %vm761_vm1, %v3285_v0, 0.0 }
 0xdb7   : > { %2113 = vadd.xlane.f32.xlu0 %v2112_v49 }
 0xdba   : > { %v2012_v25 = vpop.permute.xlu2 %2011  ;;  %v2096_v24 = vpop.xlane.xlu0 %2095 }
 0xdbb   : > { %2027 = vmatpush.bf16.msra.mxu3 %v2012_v25  ;;  %v2100_v60 = vsub.f32 %v4231_v17, %v2096_v24 }
 0xdbd   : > { %v1857_v28 = vpop.xlane.xlu1 %1856 }
 0xdc2   : > { %v1851_v48 = vpop.xlane.xlu0 %1850 }
 0xdc3   : > { %3286 = vrcp.f32 %v1851_v48 }
 0xdc4   : > { %3288 = vrcp.f32 %v1854_v57 }
 0xdc5   : > { %v1860_v45 = vpop.xlane.xlu1 %1859 }
 0xdc6   : > { %3290 = vrcp.f32 %v1860_v45 }
 0xdc7   : > { %3292 = vrcp.f32 %v1857_v28 }
 0xdc8   : > { %2141 = vrot.lane.b32.xlu1 %v2136_v23, %s3360_s26  ;;  %v2107_v23 = vmul.f32 1.442695, %v2100_v60 }
 0xdc9   : > { %v3287_v1 = vpop.eup %3286 }
 0xdca   : > { %v3289_v11 = vpop.eup %3288  ;;  %v1865_v38 = vmul.f32 %v3287_v1, %v3279_v14  ;;  %v2212_v14 = vmul.f32 0.35355338, %v2203_v15  ;;  %3294 = vpow2.f32 %v2107_v23 }
 0xdcb   : > { %2139 = vrot.lane.b32.xlu0 %v2135_v2, %s3360_s26  ;;  %v1866_v22 = vmul.f32 %v3289_v11, %v4224_v4 }
 0xdcc   : > { %v3291_v20 = vpop.eup %3290  ;;  %v2216_v4 = vadd.f32 %v4134_v12, %v2212_v14 }
 0xdcd   : > { %v1873_v36 = vpack.c.bf16 %v1866_v22, %v1865_v38  ;;  %v3293_v29 = vpop.eup %3292  ;;  %v1868_v5 = vmul.f32 %v3291_v20, %v3281_v62 }
 0xdce   : > { %v1867_v2 = vmul.f32 %v3293_v29, %v4235_v3  ;;  %v2222_v16 = vsel %vm761_vm1, %v2216_v4, -inf  ;;  %v2217_v3 = vadd.f32 %v4141_v54, %v2213_v51 }
 0xdd0   : > { %v1874_v58 = vpack.c.bf16 %v1868_v5, %v1867_v2  ;;  %v4281_v56 = vpop.eup %3294  ;;  %v2225_v62 = vsel %vm761_vm1, %v2217_v3, -inf }
 0xdd1   : > { %v2118_v17 = vsel %vm761_vm1, %v4281_v56, 0.0 }
 0xdd5   : > { %v2010_v50 = vpop.permute.xlu0 %2009 }
 0xdd6   : > { %2028 = vmatpush.bf16.msra.mxu3 %v2010_v50 }
 0xdd9   : > { %3042 = vmatmul.msk.bf16.vlgmr.msra.gmra.mxu3 %vm761_vm1, %v1873_v36 }
 0xde9   : > { %3043 = vmatmul.msk.bf16.gmra.mxu3 %vm761_vm1, %v1874_v58 }
 0xdf2   : > { %2223 = vmax.xlane.f32.xlu1 %v2222_v16 }
 0xdf3   : > { %v2230_v21 = vpop.xlane.xlu2 %2229 }
 0xdf5   : > { %2119 = vadd.xlane.f32.xlu0 %v2118_v17 }
 0xdfa   : > { %2226 = vmax.xlane.f32.xlu1 %v2225_v62 }
 0xe00   : > { %v2221_v15 = vpop.xlane.xlu0 %2220 }
 0xe01   : > { %v2231_v33 = vsub.f32 %v2215_v61, %v2221_v15 }
 0xe03   : > { %v2235_v32 = vmul.f32 1.442695, %v2231_v33 }
 0xe05   : > { %3296 = vpow2.f32 %v2235_v32 }
 0xe0b   : > { %v3297_v12 = vpop.eup %3296 }
 0xe0c   : > { %v2243_v47 = vsel %vm761_vm1, %v3297_v12, 0.0 }
 0xe0d   : > { %2244 = vadd.xlane.f32.xlu2 %v2243_v47 }
 0xe13   : > { %2275 = vrot.lane.b32.xlu1 %v2270_v53, %s3360_s26 }
 0xe22   : > { %v2111_v7 = vpop.xlane.xlu1 %2110 }
 0xe25   : > { %2273 = vrot.lane.b32.xlu2 %v2269_v44, %s3360_s26  ;;  %v2105_v44 = vmul.f32 1.442695, %v2099_v18 }
 0xe2a   : > { %v2114_v54 = vpop.xlane.xlu0 %2113 }
 0xe2b   : > { %3298 = vrcp.f32 %v2114_v54 }
 0xe2c   : > { %3300 = vrcp.f32 %v2111_v7 }
 0xe31   : > { %v3299_v61 = vpop.eup %3298 }
 0xe32   : > { %v3301_v10 = vpop.eup %3300  ;;  %v2126_v8 = vmul.f32 %v3299_v61, %v3285_v0  ;;  %v2234_v0 = vsub.f32 %v4252_v30, %v2230_v21 }
 0xe33   : > { %v2125_v52 = vmul.f32 %v3301_v10, %v4260_v27 }
 0xe34   : > { %v2241_v24 = vmul.f32 1.442695, %v2234_v0 }
 0xe35   : > { %v2133_v39 = vpack.c.bf16 %v2126_v8, %v2125_v52 }
 0xe3a   : > { %v2142_v41 = vpop.permute.xlu1 %2141 }
 0xe3b   : > { %2157 = vmatpush.bf16.msrb.mxu2 %v2142_v41 }
 0xe3d   : > { %v2140_v34 = vpop.permute.xlu0 %2139 }
 0xe3f   : > { %2158 = vmatpush.bf16.msrb.mxu2 %v2140_v34 }
 0xe42   : > { %3046 = vmatmul.msk.bf16.vlgmr.msrb.gmra.mxu2 %vm761_vm1, %v2133_v39 }
 0xe5c   : > { %v2030_v32 = vpop.f32.mrf.mxu3 }
 0xe5d   : > { %v2031_v8 = vadd.f32 %v2030_v32, %v4208_v13 }
 0xe64   : > { %v2032_v47 = vpop.f32.mrf.mxu3 }
 0xe65   : > { %v2224_v63 = vpop.xlane.xlu1 %2223  ;;  %v2033_v34 = vadd.f32 %v2032_v47, %v4217_v26 }
 0xe66   : > { %v2232_v53 = vsub.f32 %v2216_v4, %v2224_v63 }
 0xe68   : > { %v2237_v37 = vmul.f32 1.442695, %v2232_v53  ;;  %v2120_v36 = vpop.xlane.xlu0 %2119 }
 0xe6a   : > { %3302 = vpow2.f32 %v2237_v37 }
 0xe6b   : > { %3304 = vpow2.f32 %v2105_v44 }
 0xe6c   : > { %v2035_v54 = vpop.f32.mrf.mxu3 }
 0xe6d   : > { %v2227_v43 = vpop.xlane.xlu1 %2226 }
 0xe6e   : > { %v2233_v46 = vsub.f32 %v2217_v3, %v2227_v43 }
 0xe70   : > { %v3303_v49 = vpop.eup %3302  ;;  %v2239_v27 = vmul.f32 1.442695, %v2233_v46  ;;  %v2036_v46 = vadd.f32 %v2035_v54, %v4228_v31  ;;  %v3151_v54 = vld [vmem:[%s4499_s10 + $0x18] sm:$0xff] }
 0xe71   : > { %v2246_v25 = vsel %vm761_vm1, %v3303_v49, 0.0  ;;  %v3305_v57 = vpop.eup %3304  ;;  %2491 = vmatpush.bf16.msra.mxu2 %v3151_v54  ;;  %v3174_v54 = vld [vmem:[%s4500_s11 + $0x1] ss:$0 sm:$0xff] }
 0xe72   : > { %3306 = vpow2.f32 %v2239_v27  ;;  %2247 = vadd.xlane.f32.xlu1 %v2246_v25  ;;  %v2115_v6 = vsel %vm761_vm1, %v3305_v57, 0.0 }
 0xe73   : > { %3308 = vpow2.f32 %v2241_v24 }
 0xe74   : > { %v2037_v7 = vpop.f32.mrf.mxu3 }
 0xe78   : > { %v3307_v48 = vpop.eup %3306 }
 0xe79   : > { %v2249_v19 = vsel %vm761_vm1, %v3307_v48, 0.0  ;;  %v3309_v28 = vpop.eup %3308 }
 0xe7a   : > { %2116 = vadd.xlane.f32.xlu1 %v2115_v6  ;;  %2250 = vadd.xlane.f32.xlu2 %v2249_v19  ;;  %v2252_v11 = vsel %vm761_vm1, %v3309_v28, 0.0 }
 0xe80   : > { %v2245_v1 = vpop.xlane.xlu2 %2244 }
 0xe81   : > { %3310 = vrcp.f32 %v2245_v1 }
 0xe82   : > { %2253 = vadd.xlane.f32.xlu1 %v2252_v11 }
 0xe85   : > { %v2276_v30 = vpop.permute.xlu1 %2275 }
 0xe86   : > { %2291 = vmatpush.bf16.msrb.mxu3 %v2276_v30 }
 0xe87   : > { %v3311_v50 = vpop.eup %3310 }
 0xe88   : > { %v2274_v38 = vpop.permute.xlu2 %2273  ;;  %v2259_v20 = vmul.f32 %v3311_v50, %v3297_v12  ;;  %v3149_v12 = vld [vmem:[%s4498_s9 + $0x18] sm:$0xff] }
 0xe89   : > { %2340 = vmatpush.bf16.msrb.mxu0 %v3149_v12 }
 0xe8a   : > { %2292 = vmatpush.bf16.msrb.mxu3 %v2274_v38 }
 0xec5   : > { %v2160_v61 = vpop.f32.mrf.mxu2 }
 0xec6   : > { %v2170_v52 = vadd.f32 %v2160_v61, %v2031_v8 }
 0xecd   : > { %v2162_v10 = vpop.f32.mrf.mxu2 }
 0xece   : > { %v2171_v39 = vadd.f32 %v2162_v10, %v2033_v34 }
 0xee5   : > { %v2248_v22 = vpop.xlane.xlu1 %2247 }
 0xee6   : > { %3312 = vrcp.f32 %v2248_v22 }
 0xee7   : > { %3314 = vrcp.f32 %v2120_v36 }
 0xeec   : > { %v3313_v45 = vpop.eup %3312 }
 0xeed   : > { %v2260_v29 = vmul.f32 %v3313_v45, %v3303_v49  ;;  %v2117_v60 = vpop.xlane.xlu1 %2116  ;;  %v2251_v2 = vpop.xlane.xlu2 %2250  ;;  %v2038_v49 = vadd.f32 %v2037_v7, %v4239_v42 }
 0xeee   : > { %3316 = vrcp.f32 %v2117_v60  ;;  %v3315_v23 = vpop.eup %3314 }
 0xeef   : > { %v2267_v5 = vpack.c.bf16 %v2260_v29, %v2259_v20  ;;  %3318 = vrcp.f32 %v2251_v2  ;;  %v2128_v51 = vmul.f32 %v3315_v23, %v4281_v56  ;;  %v3148_v56 = vld [vmem:[%s4498_s9 + $0x10] sm:$0xff] }
 0xef0   : > { %2341 = vmatpush.bf16.msrb.mxu0 %v3148_v56 }
 0xef1   : > { %3050 = vmatmul.msk.bf16.vlgmr.msrb.gmra.mxu3 %vm761_vm1, %v2267_v5 }
 0xef4   : > { %v3317_v58 = vpop.eup %3316 }
 0xef5   : > { %v2254_v14 = vpop.xlane.xlu1 %2253  ;;  %v2127_v4 = vmul.f32 %v3317_v58, %v3305_v57  ;;  %v3319_v17 = vpop.eup %3318  ;;  %v4325_v57 = vld [vmem:[%s4502_s13 + $0x8] sm:$0x3f] }
 0xef6   : > { %3320 = vrcp.f32 %v2254_v14  ;;  %v2261_v62 = vmul.f32 %v3319_v17, %v3307_v48  ;;  %v2315_v48 = vperm.slane %v4325_v57, 0 }
 0xef7   : > { %v2134_v16 = vpack.c.bf16 %v2128_v51, %v2127_v4 }
 0xef9   : > { %3047 = vmatmul.msk.bf16.gmra.mxu2 %vm761_vm1, %v2134_v16 }
 0xefc   : > { %v3321_v3 = vpop.eup %3320 }
 0xefd   : > { %v2262_v15 = vmul.f32 %v3321_v3, %v3309_v28 }
 0xeff   : > { %v2268_v33 = vpack.c.bf16 %v2262_v15, %v2261_v62 }
 0xf01   : > { %3051 = vmatmul.msk.bf16.gmra.mxu3 %vm761_vm1, %v2268_v33 }
 0xf74   : > { %v2294_v41 = vpop.f32.mrf.mxu3 }
 0xf75   : > { %v2304_v53 = vadd.f32 %v2294_v41, %v2170_v52  ;;  %v3150_v41 = vld [vmem:[%s4499_s10 + $0x10] sm:$0xff] }
 0xf76   : > { %2492 = vmatpush.bf16.msra.mxu2 %v3150_v41 }
 0xf7c   : > { %v2296_v63 = vpop.f32.mrf.mxu3  ;;  %v2165_v37 = vpop.f32.mrf.mxu2 }
 0xf7d   : > { %v2305_v18 = vadd.f32 %v2296_v63, %v2171_v39  ;;  %v2172_v0 = vadd.f32 %v2165_v37, %v2036_v46 }
 0xf7f   : > { %v2313_v44 = vpack.c.bf16 %v2305_v18, %v2304_v53 }
 0xf81   : > { %3064 = vmatmul.msk.bf16.vlgmr.msrb.gmra.mxu0 %vm761_vm1, %v2313_v44 }
 0xf84   : > { %v2299_v21 = vpop.f32.mrf.mxu3  ;;  %v2167_v43 = vpop.f32.mrf.mxu2 }
 0xf85   : > { %v2173_v27 = vadd.f32 %v2167_v43, %v2038_v49  ;;  %v2306_v25 = vadd.f32 %v2299_v21, %v2172_v0 }
 0xf8c   : > { %v2301_v13 = vpop.f32.mrf.mxu3 }
 0xf8d   : > { %v2307_v26 = vadd.f32 %v2301_v13, %v2173_v27 }
 0xf8f   : > { %v2314_v24 = vpack.c.bf16 %v2307_v26, %v2306_v25 }
 0xf91   : > { %3065 = vmatmul.msk.bf16.gmra.mxu0 %vm761_vm1, %v2314_v24 }
 0xffe   : > { %v2343_v6 = vpop.f32.mrf.mxu0 }
 0xfff   : > { %v2344_v19 = vadd.f32 %v2343_v6, %v2315_v48  ;;  %v2445_v6 = vperm.slane %v4325_v57, 1 }
0x1001   : > { %v2353_v31 = vadd.f32 %v2344_v19, %v3991_v55 }
0x1003   : > { %v2357_v42 = vsel %vm761_vm1, %v2353_v31, 0.0 }
0x1004   : > { %2358 = vadd.xlane.f32.xlu1 %v2357_v42 }
0x1006   : > { %v2345_v28 = vpop.f32.mrf.mxu0 }
0x1007   : > { %v2346_v1 = vadd.f32 %v2345_v28, %v2315_v48 }
0x1009   : > { %v2354_v11 = vadd.f32 %v2346_v1, %v3993_v59 }
0x100b   : > { %v2360_v30 = vsel %vm761_vm1, %v2354_v11, 0.0 }
0x100c   : > { %2361 = vadd.xlane.f32.xlu0 %v2360_v30  ;;  %v2450_v30 = vperm.slane %v4325_v57, 2 }
0x100e   : > { %v2348_v38 = vpop.f32.mrf.mxu0 }
0x100f   : > { %v2349_v22 = vadd.f32 %v2348_v38, %v2315_v48 }
0x1011   : > { %v2355_v50 = vadd.f32 %v2349_v22, %v4002_v9 }
0x1013   : > { %v2363_v36 = vsel %vm761_vm1, %v2355_v50, 0.0 }
0x1014   : > { %2364 = vadd.xlane.f32.xlu1 %v2363_v36 }
0x1016   : > { %v2350_v45 = vpop.f32.mrf.mxu0 }
0x1017   : > { %v2351_v20 = vadd.f32 %v2350_v45, %v2315_v48 }
0x1019   : > { %v2356_v55 = vadd.f32 %v2351_v20, %v4004_v35 }
0x101b   : > { %v2366_v29 = vsel %vm761_vm1, %v2356_v55, 0.0 }
0x101c   : > { %2367 = vadd.xlane.f32.xlu2 %v2366_v29 }
0x1077   : > { %v2359_v60 = vpop.xlane.xlu1 %2358 }
0x1078   : > { %v2369_v59 = vmul.f32 %v2359_v60, %v3901_v40 }
0x107a   : > { %v2373_v5 = vsub.f32 %v2353_v31, %v2369_v59 }
0x107c   : > { %v2377_v2 = vmul.f32 %v2373_v5, %v2373_v5 }
0x107e   : > { %v2381_v23 = vsel %vm761_vm1, %v2377_v2, 0.0 }
0x107f   : > { %v2362_v58 = vpop.xlane.xlu0 %2361  ;;  %2382 = vadd.xlane.f32.xlu0 %v2381_v23 }
0x1080   : > { %v2370_v9 = vmul.f32 %v2362_v58, %v3901_v40 }
0x1082   : > { %v4339_v14 = vsub.f32 %v2354_v11, %v2370_v9 }
0x1084   : > { %v2378_v4 = vmul.f32 %v4339_v14, %v4339_v14 }
0x1086   : > { %v2384_v35 = vsel %vm761_vm1, %v2378_v4, 0.0 }
0x1087   : > { %2385 = vadd.xlane.f32.xlu1 %v2384_v35  ;;  %v2365_v51 = vpop.xlane.xlu1 %2364 }
0x1088   : > { %v2371_v16 = vmul.f32 %v2365_v51, %v3901_v40 }
0x108a   : > { %v4345_v17 = vsub.f32 %v2355_v50, %v2371_v16 }
0x108c   : > { %v2379_v3 = vmul.f32 %v4345_v17, %v4345_v17 }
0x108e   : > { %v2387_v62 = vsel %vm761_vm1, %v2379_v3, 0.0 }
0x108f   : > { %v2368_v15 = vpop.xlane.xlu2 %2367  ;;  %2388 = vadd.xlane.f32.xlu2 %v2387_v62 }
0x1090   : > { %v2372_v33 = vmul.f32 %v2368_v15, %v3901_v40 }
0x1092   : > { %v4351_v32 = vsub.f32 %v2356_v55, %v2372_v33 }
0x1094   : > { %v2380_v12 = vmul.f32 %v4351_v32, %v4351_v32 }
0x1096   : > { %v2390_v47 = vsel %vm761_vm1, %v2380_v12, 0.0  ;;  %v3155_v12 = vld [vmem:[%s4501_s12 + $0x38] sm:$0xff] }
0x1097   : > { %2391 = vadd.xlane.f32.xlu0 %v2390_v47  ;;  %2554 = vmatpush.bf16.msra.mxu1 %v3155_v12  ;;  %v3152_v47 = vld [vmem:[%s4501_s12 + $0x20] sm:$0xff] }
0x10f2   : > { %v2383_v56 = vpop.xlane.xlu0 %2382 }
0x10f3   : > { %v2393_v7 = vmul.f32 %v2383_v56, %v3901_v40 }
0x10f5   : > { %v2397_v61 = vadd.f32 1e-05, %v2393_v7 }
0x10f7   : > { %3322 = vrsqrt.f32 %v2397_v61  ;;  %vm2407_vm14 = vweird.f32 %v2397_v61 }
0x10fa   : > { %v2386_v10 = vpop.xlane.xlu1 %2385 }
0x10fb   : > { %v2394_v8 = vmul.f32 %v2386_v10, %v3901_v40 }
0x10fd   : > { %v3323_v34 = vpop.eup %3322  ;;  %v2398_v52 = vadd.f32 1e-05, %v2394_v8 }
0x10fe   : > { %v2402_v39 = vmul.f32 %v3323_v34, %v2397_v61  ;;  %vm2408_vm13 = vweird.f32 %v3323_v34 }
0x10ff   : > { %3324 = vrsqrt.f32 %v2398_v52  ;;  %vm2409_vm15 = vmor %vm2407_vm14, %vm2408_vm13  ;;  %vm2417_vm3 = vweird.f32 %v2398_v52 }
0x1100   : > { %v2403_v63 = vmul.f32 %v3323_v34, %v2402_v39 }
0x1102   : > { %v2404_v53 = vmul.f32 0.5, %v2403_v63  ;;  %v2389_v18 = vpop.xlane.xlu2 %2388 }
0x1103   : > { %v2395_v37 = vmul.f32 %v2389_v18, %v3901_v40 }
0x1104   : > { %v2405_v44 = vsub.f32 1.5, %v2404_v53 }
0x1105   : > { %v3325_v21 = vpop.eup %3324  ;;  %v2399_v43 = vadd.f32 1e-05, %v2395_v37 }
0x1106   : > { %v2406_v46 = vmul.f32 %v3323_v34, %v2405_v44  ;;  %v2412_v49 = vmul.f32 %v3325_v21, %v2398_v52  ;;  %vm2418_vm2 = vweird.f32 %v3325_v21 }
0x1107   : > { %3326 = vrsqrt.f32 %v2399_v43  ;;  %vm2419_vm4 = vmor %vm2417_vm3, %vm2418_vm2  ;;  %vm2427_vm6 = vweird.f32 %v2399_v43 }
0x1108   : > { %v2413_v0 = vmul.f32 %v3325_v21, %v2412_v49  ;;  %v2410_v27 = vsel %vm2409_vm15, %v3323_v34, %v2406_v46 }
0x1109   : > { %v2441_v19 = vmul.f32 %v2410_v27, %v2373_v5 }
0x110a   : > { %v2414_v13 = vmul.f32 0.5, %v2413_v0  ;;  %v2392_v25 = vpop.xlane.xlu0 %2391 }
0x110b   : > { %v2396_v26 = vmul.f32 %v2392_v25, %v3901_v40  ;;  %v2446_v38 = vmul.f32 %v2445_v6, %v2441_v19 }
0x110c   : > { %v2415_v24 = vsub.f32 1.5, %v2414_v13 }
0x110d   : > { %v3327_v48 = vpop.eup %3326  ;;  %v2400_v31 = vadd.f32 1e-05, %v2396_v26  ;;  %v2451_v55 = vadd.f32 %v2450_v30, %v2446_v38 }
0x110e   : > { %v2416_v42 = vmul.f32 %v3325_v21, %v2415_v24  ;;  %v2422_v28 = vmul.f32 %v3327_v48, %v2399_v43  ;;  %vm2428_vm5 = vweird.f32 %v3327_v48 }
0x110f   : > { %3328 = vrsqrt.f32 %v2400_v31  ;;  %vm2429_vm7 = vmor %vm2427_vm6, %vm2428_vm5  ;;  %vm2437_vm9 = vweird.f32 %v2400_v31 }
0x1110   : > { %v2420_v1 = vsel %vm2419_vm4, %v3325_v21, %v2416_v42  ;;  %v2423_v11 = vmul.f32 %v3327_v48, %v2422_v28  ;;  %v2519_v21 = vperm.slane %v4325_v57, 3 }
0x1111   : > { %v2442_v22 = vmul.f32 %v2420_v1, %v4339_v14 }
0x1112   : > { %v2424_v50 = vmul.f32 0.5, %v2423_v11 }
0x1113   : > { %v2447_v36 = vmul.f32 %v2445_v6, %v2442_v22 }
0x1114   : > { %v2425_v45 = vsub.f32 1.5, %v2424_v50 }
0x1115   : > { %v3329_v20 = vpop.eup %3328  ;;  %v4369_v29 = vadd.f32 %v2450_v30, %v2447_v36 }
0x1116   : > { %v2426_v60 = vmul.f32 %v3327_v48, %v2425_v45  ;;  %v2432_v59 = vmul.f32 %v3329_v20, %v2400_v31  ;;  %vm2438_vm8 = vweird.f32 %v3329_v20 }
0x1117   : > { %v2460_v5 = vpack.c.bf16 %v4369_v29, %v2451_v55  ;;  %vm2439_vm10 = vmor %vm2437_vm9, %vm2438_vm8 }
0x1118   : > { %v2433_v2 = vmul.f32 %v3329_v20, %v2432_v59  ;;  %v2430_v23 = vsel %vm2429_vm7, %v3327_v48, %v2426_v60 }
0x1119   : > { %3079 = vmatmul.msk.bf16.vlgmr.msra.gmra.mxu2 %vm761_vm1, %v2460_v5  ;;  %v2443_v14 = vmul.f32 %v2430_v23, %v4345_v17  ;;  %v3154_v17 = vld [vmem:[%s4501_s12 + $0x30] sm:$0xff] }
0x111a   : > { %v2434_v58 = vmul.f32 0.5, %v2433_v2  ;;  %2555 = vmatpush.bf16.msra.mxu1 %v3154_v17 }
0x111b   : > { %v2448_v16 = vmul.f32 %v2445_v6, %v2443_v14 }
0x111c   : > { %v2435_v9 = vsub.f32 1.5, %v2434_v58 }
0x111d   : > { %v2453_v62 = vadd.f32 %v2450_v30, %v2448_v16 }
0x111e   : > { %v2436_v4 = vmul.f32 %v3329_v20, %v2435_v9 }
0x1120   : > { %v2440_v35 = vsel %vm2439_vm10, %v3329_v20, %v2436_v4 }
0x1121   : > { %v2444_v51 = vmul.f32 %v2440_v35, %v4351_v32  ;;  %v3153_v32 = vld [vmem:[%s4501_s12 + $0x28] sm:$0xff] }
0x1122   : > { %2556 = vmatpush.bf16.msra.mxu1 %v3153_v32 }
0x1123   : > { %v2449_v3 = vmul.f32 %v2445_v6, %v2444_v51 }
0x1125   : > { %v2454_v15 = vadd.f32 %v2450_v30, %v2449_v3 }
0x1126   : > { %2557 = vmatpush.bf16.msra.mxu1 %v3152_v47 }
0x1127   : > { %v2461_v33 = vpack.c.bf16 %v2454_v15, %v2453_v62 }
0x1129   : > { %3080 = vmatmul.msk.bf16.gmra.mxu2 %vm761_vm1, %v2461_v33 }
0x119c   : > { %v2494_v56 = vpop.f32.mrf.mxu2 }
0x119d   : > { %v2495_v7 = vadd.f32 %v3174_v54, %v2494_v56 }
0x119f   : > { %v2504_v10 = vmax.f32 %v2495_v7, 0.0  ;;  %v2661_v7 = vperm.slane %v4325_v57, 4 }
0x11a4   : > { %v2496_v61 = vpop.f32.mrf.mxu2 }
0x11a5   : > { %v2497_v41 = vadd.f32 %v3174_v54, %v2496_v61 }
0x11a7   : > { %v2505_v8 = vmax.f32 %v2497_v41, 0.0 }
0x11a9   : > { %v2517_v34 = vpack.c.bf16 %v2505_v8, %v2504_v10  ;;  %v2666_v10 = vperm.slane %v4325_v57, 5 }
0x11ab   : > { %3105 = vmatmul.msk.bf16.vlgmr.msra.gmra.mxu1 %vm685_vm0, %v2517_v34 }
0x11ac   : > { %v2499_v52 = vpop.f32.mrf.mxu2 }
0x11ad   : > { %v2500_v39 = vadd.f32 %v3174_v54, %v2499_v52 }
0x11af   : > { %v2506_v18 = vmax.f32 %v2500_v39, 0.0 }
0x11b4   : > { %v2501_v63 = vpop.f32.mrf.mxu2 }
0x11b5   : > { %v2502_v53 = vadd.f32 %v3174_v54, %v2501_v63 }
0x11b7   : > { %v2507_v37 = vmax.f32 %v2502_v53, 0.0 }
0x11b9   : > { %v2518_v44 = vpack.c.bf16 %v2507_v37, %v2506_v18 }
0x11bb   : > { %3106 = vmatmul.msk.bf16.gmra.mxu1 %vm685_vm0, %v2518_v44 }
0x1228   : > { %v2559_v43 = vpop.f32.mrf.mxu1 }
0x1229   : > { %v2560_v46 = vadd.f32 %v2559_v43, %v2519_v21 }
0x122b   : > { %v2569_v49 = vadd.f32 %v2560_v46, %v2451_v55 }
0x122d   : > { %v2573_v0 = vsel %vm761_vm1, %v2569_v49, 0.0 }
0x122e   : > { %2574 = vadd.xlane.f32.xlu0 %v2573_v0 }
0x1230   : > { %v2561_v27 = vpop.f32.mrf.mxu1 }
0x1231   : > { %v2562_v24 = vadd.f32 %v2561_v27, %v2519_v21 }
0x1233   : > { %v2570_v31 = vadd.f32 %v2562_v24, %v4369_v29 }
0x1235   : > { %v2576_v1 = vsel %vm761_vm1, %v2570_v31, 0.0 }
0x1238   : > { %v2564_v13 = vpop.f32.mrf.mxu1 }
0x1239   : > { %v2565_v25 = vadd.f32 %v2564_v13, %v2519_v21 }
0x123b   : > { %v2571_v26 = vadd.f32 %v2565_v25, %v2453_v62 }
0x123d   : > { %v2579_v48 = vsel %vm761_vm1, %v2571_v26, 0.0 }
0x123e   : > { %2580 = vadd.xlane.f32.xlu1 %v2579_v48 }
0x1240   : > { %v2566_v6 = vpop.f32.mrf.mxu1 }
0x1241   : > { %v2567_v19 = vadd.f32 %v2566_v6, %v2519_v21 }
0x1243   : > { %v2572_v42 = vadd.f32 %v2567_v19, %v2454_v15 }
0x1245   : > { %v2582_v28 = vsel %vm761_vm1, %v2572_v42, 0.0 }
0x1246   : > { %2583 = vadd.xlane.f32.xlu2 %v2582_v28  ;;  %2577 = vadd.xlane.f32.xlu1 %v2576_v1 }
0x12a1   : > { %v2575_v11 = vpop.xlane.xlu0 %2574 }
0x12a2   : > { %v2585_v30 = vmul.f32 %v2575_v11, %v3901_v40 }
0x12a4   : > { %v2589_v38 = vsub.f32 %v2569_v49, %v2585_v30 }
0x12a6   : > { %v2593_v22 = vmul.f32 %v2589_v38, %v2589_v38 }
0x12a8   : > { %v2597_v50 = vsel %vm761_vm1, %v2593_v22, 0.0 }
0x12a9   : > { %2598 = vadd.xlane.f32.xlu1 %v2597_v50 }
0x12b1   : > { %v2581_v36 = vpop.xlane.xlu1 %2580 }
0x12b2   : > { %v2587_v45 = vmul.f32 %v2581_v36, %v3901_v40 }
0x12b4   : > { %v4402_v20 = vsub.f32 %v2571_v26, %v2587_v45 }
0x12b6   : > { %v2595_v55 = vmul.f32 %v4402_v20, %v4402_v20 }
0x12b8   : > { %v2603_v29 = vsel %vm761_vm1, %v2595_v55, 0.0 }
0x12b9   : > { %v2584_v60 = vpop.xlane.xlu2 %2583  ;;  %2604 = vadd.xlane.f32.xlu2 %v2603_v29  ;;  %v2578_v59 = vpop.xlane.xlu1 %2577 }
0x12ba   : > { %v2588_v5 = vmul.f32 %v2584_v60, %v3901_v40  ;;  %v2586_v2 = vmul.f32 %v2578_v59, %v3901_v40 }
0x12bc   : > { %v4409_v23 = vsub.f32 %v2572_v42, %v2588_v5  ;;  %v4411_v58 = vsub.f32 %v2570_v31, %v2586_v2 }
0x12be   : > { %v2594_v9 = vmul.f32 %v4411_v58, %v4411_v58  ;;  %v2596_v14 = vmul.f32 %v4409_v23, %v4409_v23 }
0x12c0   : > { %v2600_v4 = vsel %vm761_vm1, %v2594_v9, 0.0  ;;  %v2606_v35 = vsel %vm761_vm1, %v2596_v14, 0.0 }
0x12c1   : > { %2601 = vadd.xlane.f32.xlu2 %v2600_v4  ;;  %2607 = vadd.xlane.f32.xlu0 %v2606_v35 }
0x131c   : > { %v2599_v51 = vpop.xlane.xlu1 %2598 }
0x131d   : > { %v2609_v16 = vmul.f32 %v2599_v51, %v3901_v40 }
0x131f   : > { %v2613_v3 = vadd.f32 1e-05, %v2609_v16 }
0x1321   : > { %3330 = vrsqrt.f32 %v2613_v3  ;;  %vm2623_vm11 = vweird.f32 %v2613_v3 }
0x1327   : > { %v3331_v62 = vpop.eup %3330 }
0x1328   : > { %v2618_v15 = vmul.f32 %v3331_v62, %v2613_v3  ;;  %vm2624_vm0 = vweird.f32 %v3331_v62 }
0x1329   : > { %vm2625_vm12 = vmor %vm2623_vm11, %vm2624_vm0 }
0x132a   : > { %v2619_v33 = vmul.f32 %v3331_v62, %v2618_v15 }
0x132c   : > { %v2620_v12 = vmul.f32 0.5, %v2619_v33  ;;  %v2605_v17 = vpop.xlane.xlu2 %2604 }
0x132d   : > { %v2611_v32 = vmul.f32 %v2605_v17, %v3901_v40 }
0x132e   : > { %v2621_v47 = vsub.f32 1.5, %v2620_v12 }
0x132f   : > { %v2615_v56 = vadd.f32 1e-05, %v2611_v32 }
0x1330   : > { %v2622_v54 = vmul.f32 %v3331_v62, %v2621_v47 }
0x1331   : > { %3332 = vrsqrt.f32 %v2615_v56  ;;  %vm2643_vm14 = vweird.f32 %v2615_v56 }
0x1332   : > { %v2626_v61 = vsel %vm2625_vm12, %v3331_v62, %v2622_v54 }
0x1333   : > { %v2657_v41 = vmul.f32 %v2626_v61, %v2589_v38 }
0x1334   : > { %v2602_v8 = vpop.xlane.xlu2 %2601  ;;  %v2608_v34 = vpop.xlane.xlu0 %2607 }
0x1335   : > { %v2610_v52 = vmul.f32 %v2602_v8, %v3901_v40  ;;  %v2612_v39 = vmul.f32 %v2608_v34, %v3901_v40  ;;  %v2662_v63 = vmul.f32 %v2661_v7, %v2657_v41 }
0x1337   : > { %v3333_v53 = vpop.eup %3332  ;;  %v2614_v18 = vadd.f32 1e-05, %v2610_v52  ;;  %v2616_v37 = vadd.f32 1e-05, %v2612_v39  ;;  %v2667_v44 = vadd.f32 %v2666_v10, %v2662_v63 }
0x1338   : > { %v2638_v21 = vmul.f32 %v3333_v53, %v2615_v56  ;;  %vm2644_vm13 = vweird.f32 %v3333_v53 }
0x1339   : > { %3334 = vrsqrt.f32 %v2614_v18  ;;  %v2671_v43 = vsel %vm761_vm1, %v2667_v44, 0.0  ;;  %vm2645_vm15 = vmor %vm2643_vm14, %vm2644_vm13  ;;  %vm2633_vm4 = vweird.f32 %v2614_v18  ;;  %vm2653_vm6 = vweird.f32 %v2616_v37 }
0x133a   : > { %v2639_v46 = vmul.f32 %v3333_v53, %v2638_v21  ;;  %3336 = vrsqrt.f32 %v2616_v37  ;;  %2672 = vadd.xlane.f32.xlu2 %v2671_v43 }
0x133c   : > { %v2640_v49 = vmul.f32 0.5, %v2639_v46 }
0x133e   : > { %v2641_v57 = vsub.f32 1.5, %v2640_v49 }
0x133f   : > { %v3335_v0 = vpop.eup %3334 }
0x1340   : > { %v3337_v27 = vpop.eup %3336  ;;  %v2642_v13 = vmul.f32 %v3333_v53, %v2641_v57  ;;  %v2628_v25 = vmul.f32 %v3335_v0, %v2614_v18  ;;  %vm2634_vm2 = vweird.f32 %v3335_v0 }
0x1341   : > { %v2648_v26 = vmul.f32 %v3337_v27, %v2616_v37  ;;  %vm2654_vm3 = vweird.f32 %v3337_v27  ;;  %vm2635_vm5 = vmor %vm2633_vm4, %vm2634_vm2 }
0x1342   : > { %v2629_v24 = vmul.f32 %v3335_v0, %v2628_v25  ;;  %v2646_v48 = vsel %vm2645_vm15, %v3333_v53, %v2642_v13  ;;  %vm2655_vm7 = vmor %vm2653_vm6, %vm2654_vm3  ;;  %v3157_v25 = vld [vmem:[%s4504_s15 + $0x8] sm:$0xff] }
0x1343   : > { %v2649_v6 = vmul.f32 %v3337_v27, %v2648_v26  ;;  %v2659_v19 = vmul.f32 %v2646_v48, %v4402_v20  ;;  %2819 = vmatpush.bf16.msra.mxu0 %v3157_v25  ;;  %v3156_v48 = vld [vmem:[%s4504_s15] sm:$0xff] }
0x1344   : > { %v2630_v31 = vmul.f32 0.5, %v2629_v24 }
0x1345   : > { %v2650_v42 = vmul.f32 0.5, %v2649_v6  ;;  %v2664_v28 = vmul.f32 %v2661_v7, %v2659_v19 }
0x1346   : > { %v2631_v1 = vsub.f32 1.5, %v2630_v31 }
0x1347   : > { %v2651_v11 = vsub.f32 1.5, %v2650_v42  ;;  %v2669_v30 = vadd.f32 %v2666_v10, %v2664_v28  ;;  %2820 = vmatpush.bf16.msra.mxu0 %v3156_v48 }
0x1348   : > { %v2632_v38 = vmul.f32 %v3335_v0, %v2631_v1 }
0x1349   : > { %v2652_v22 = vmul.f32 %v3337_v27, %v2651_v11  ;;  %v2677_v50 = vsel %vm761_vm1, %v2669_v30, 0.0 }
0x134a   : > { %2678 = vadd.xlane.f32.xlu0 %v2677_v50  ;;  %v2636_v36 = vsel %vm2635_vm5, %v3335_v0, %v2632_v38 }
0x134b   : > { %v2658_v45 = vmul.f32 %v2636_v36, %v4411_v58  ;;  %v2656_v20 = vsel %vm2655_vm7, %v3337_v27, %v2652_v22 }
0x134c   : > { %v2660_v55 = vmul.f32 %v2656_v20, %v4409_v23 }
0x134d   : > { %v2663_v29 = vmul.f32 %v2661_v7, %v2658_v45 }
0x134e   : > { %v2665_v60 = vmul.f32 %v2661_v7, %v2660_v55  ;;  %v558_v55 = vld [vmem:[%s4503_s14] sm:$0x3] }
0x134f   : > { %v2668_v59 = vadd.f32 %v2666_v10, %v2663_v29 }
0x1350   : > { %v2670_v5 = vadd.f32 %v2666_v10, %v2665_v60 }
0x1351   : > { %v2674_v2 = vsel %vm761_vm1, %v2668_v59, 0.0 }
0x1352   : > { %2675 = vadd.xlane.f32.xlu0 %v2674_v2  ;;  %v2680_v9 = vsel %vm761_vm1, %v2670_v5, 0.0 }
0x1353   : > { %2681 = vadd.xlane.f32.xlu1 %v2680_v9  ;;  %v2759_v9 = vperm.slane %v558_v55, 0 }
0x13ad   : > { %v2673_v14 = vpop.xlane.xlu2 %2672 }
0x13ae   : > { %v2683_v4 = vmul.f32 %v2673_v14, %v3901_v40 }
0x13b0   : > { %v4433_v35 = vsub.f32 %v2667_v44, %v2683_v4 }
0x13b2   : > { %v2691_v58 = vmul.f32 %v4433_v35, %v4433_v35 }
0x13b4   : > { %v2695_v23 = vsel %vm761_vm1, %v2691_v58, 0.0 }
0x13b5   : > { %2696 = vadd.xlane.f32.xlu0 %v2695_v23 }
0x13bd   : > { %v2679_v51 = vpop.xlane.xlu0 %2678 }
0x13be   : > { %v2685_v16 = vmul.f32 %v2679_v51, %v3901_v40 }
0x13c0   : > { %v4439_v3 = vsub.f32 %v2669_v30, %v2685_v16 }
0x13c2   : > { %v2693_v62 = vmul.f32 %v4439_v3, %v4439_v3 }
0x13c4   : > { %v2701_v15 = vsel %vm761_vm1, %v2693_v62, 0.0  ;;  %v2764_v62 = vperm.slane %v558_v55, 1 }
0x13c5   : > { %2702 = vadd.xlane.f32.xlu1 %v2701_v15  ;;  %v2676_v33 = vpop.xlane.xlu0 %2675 }
0x13c6   : > { %v2682_v12 = vpop.xlane.xlu1 %2681  ;;  %v2684_v17 = vmul.f32 %v2676_v33, %v3901_v40 }
0x13c7   : > { %v2686_v32 = vmul.f32 %v2682_v12, %v3901_v40 }
0x13c8   : > { %v4446_v47 = vsub.f32 %v2668_v59, %v2684_v17 }
0x13c9   : > { %v4448_v56 = vsub.f32 %v2670_v5, %v2686_v32 }
0x13ca   : > { %v2692_v54 = vmul.f32 %v4446_v47, %v4446_v47 }
0x13cb   : > { %v2694_v7 = vmul.f32 %v4448_v56, %v4448_v56 }
0x13cc   : > { %v2698_v61 = vsel %vm761_vm1, %v2692_v54, 0.0 }
0x13cd   : > { %v2704_v41 = vsel %vm761_vm1, %v2694_v7, 0.0  ;;  %2699 = vadd.xlane.f32.xlu1 %v2698_v61 }
0x13ce   : > { %2705 = vadd.xlane.f32.xlu2 %v2704_v41 }
0x1428   : > { %v2697_v10 = vpop.xlane.xlu0 %2696 }
0x1429   : > { %v2707_v8 = vmul.f32 %v2697_v10, %v3901_v40  ;;  %v3175_v10 = vld [vmem:[%s4505_s16] ss:$0 sm:$0xff] }
0x142b   : > { %v2711_v34 = vadd.f32 1e-05, %v2707_v8 }
0x142d   : > { %3338 = vrsqrt.f32 %v2711_v34  ;;  %vm2721_vm12 = vweird.f32 %v2711_v34 }
0x1433   : > { %v3339_v53 = vpop.eup %3338 }
0x1434   : > { %v2716_v37 = vmul.f32 %v3339_v53, %v2711_v34  ;;  %vm2722_vm0 = vweird.f32 %v3339_v53 }
0x1435   : > { %vm2723_vm14 = vmor %vm2721_vm12, %vm2722_vm0 }
0x1436   : > { %v2717_v27 = vmul.f32 %v3339_v53, %v2716_v37 }
0x1438   : > { %v2703_v52 = vpop.xlane.xlu1 %2702  ;;  %v2718_v24 = vmul.f32 0.5, %v2717_v27 }
0x1439   : > { %v2709_v39 = vmul.f32 %v2703_v52, %v3901_v40 }
0x143a   : > { %v2719_v42 = vsub.f32 1.5, %v2718_v24 }
0x143b   : > { %v2713_v63 = vadd.f32 1e-05, %v2709_v39 }
0x143c   : > { %v2720_v22 = vmul.f32 %v3339_v53, %v2719_v42 }
0x143d   : > { %3340 = vrsqrt.f32 %v2713_v63  ;;  %vm2741_vm9 = vweird.f32 %v2713_v63 }
0x143e   : > { %v2724_v59 = vsel %vm2723_vm14, %v3339_v53, %v2720_v22 }
0x143f   : > { %v2755_v58 = vmul.f32 %v2724_v59, %v4433_v35 }
0x1440   : > { %v2700_v18 = vpop.xlane.xlu1 %2699 }
0x1441   : > { %v2706_v44 = vpop.xlane.xlu2 %2705  ;;  %v2708_v21 = vmul.f32 %v2700_v18, %v3901_v40  ;;  %v2760_v12 = vmul.f32 %v2759_v9, %v2755_v58 }
0x1442   : > { %v2710_v43 = vmul.f32 %v2706_v44, %v3901_v40 }
0x1443   : > { %v3341_v46 = vpop.eup %3340  ;;  %v2712_v49 = vadd.f32 1e-05, %v2708_v21  ;;  %v2765_v54 = vadd.f32 %v2764_v62, %v2760_v12 }
0x1444   : > { %v2736_v57 = vmul.f32 %v3341_v46, %v2713_v63  ;;  %v2714_v0 = vadd.f32 1e-05, %v2710_v43  ;;  %vm2742_vm8 = vweird.f32 %v3341_v46 }
0x1445   : > { %3342 = vrsqrt.f32 %v2712_v49  ;;  %vm2743_vm10 = vmor %vm2741_vm9, %vm2742_vm8  ;;  %vm2731_vm15 = vweird.f32 %v2712_v49 }
0x1446   : > { %v2737_v13 = vmul.f32 %v3341_v46, %v2736_v57  ;;  %3344 = vrsqrt.f32 %v2714_v0  ;;  %vm2751_vm2 = vweird.f32 %v2714_v0 }
0x1448   : > { %v2738_v26 = vmul.f32 0.5, %v2737_v13 }
0x144a   : > { %v2739_v40 = vsub.f32 1.5, %v2738_v26 }
0x144b   : > { %v3343_v6 = vpop.eup %3342 }
0x144c   : > { %v3345_v19 = vpop.eup %3344  ;;  %v2726_v31 = vmul.f32 %v3343_v6, %v2712_v49  ;;  %v2740_v28 = vmul.f32 %v3341_v46, %v2739_v40  ;;  %vm2732_vm11 = vweird.f32 %v3343_v6 }
0x144d   : > { %v2746_v1 = vmul.f32 %v3345_v19, %v2714_v0  ;;  %vm2752_vm13 = vweird.f32 %v3345_v19  ;;  %vm2733_vm3 = vmor %vm2731_vm15, %vm2732_vm11 }
0x144e   : > { %v2727_v11 = vmul.f32 %v3343_v6, %v2726_v31  ;;  %v2744_v50 = vsel %vm2743_vm10, %v3341_v46, %v2740_v28  ;;  %vm2753_vm4 = vmor %vm2751_vm2, %vm2752_vm13 }
0x144f   : > { %v2747_v30 = vmul.f32 %v3345_v19, %v2746_v1  ;;  %v2757_v29 = vmul.f32 %v2744_v50, %v4439_v3 }
0x1450   : > { %v2728_v38 = vmul.f32 0.5, %v2727_v11 }
0x1451   : > { %v2748_v36 = vmul.f32 0.5, %v2747_v30  ;;  %v2762_v51 = vmul.f32 %v2759_v9, %v2757_v29 }
0x1452   : > { %v2729_v45 = vsub.f32 1.5, %v2728_v38 }
0x1453   : > { %v2749_v20 = vsub.f32 1.5, %v2748_v36  ;;  %v2767_v15 = vadd.f32 %v2764_v62, %v2762_v51 }
0x1454   : > { %v2730_v60 = vmul.f32 %v3343_v6, %v2729_v45 }
0x1455   : > { %v2750_v5 = vmul.f32 %v3345_v19, %v2749_v20 }
0x1456   : > { %v2734_v2 = vsel %vm2733_vm3, %v3343_v6, %v2730_v60 }
0x1457   : > { %v2754_v14 = vsel %vm2753_vm4, %v3345_v19, %v2750_v5  ;;  %v2756_v4 = vmul.f32 %v2734_v2, %v4446_v47  ;;  %v2769_v47 = vld [vmem:[%s4493_s4] sm:$0xf] }
0x1458   : > { %v2758_v23 = vmul.f32 %v2754_v14, %v4448_v56  ;;  %v2770_v7 = vpack.c.bf16 %v2769_v47, %v2769_v47 }
0x1459   : > { %v2761_v3 = vmul.f32 %v2759_v9, %v2756_v4 }
0x145a   : > { %v2763_v16 = vmul.f32 %v2759_v9, %v2758_v23 }
0x145b   : > { %v2766_v32 = vadd.f32 %v2764_v62, %v2761_v3 }
0x145c   : > { %v2768_v33 = vadd.f32 %v2764_v62, %v2763_v16 }
0x145d   : > { %v2771_v35 = vpack.c.bf16 %v2766_v32, %v2765_v54 }
0x145e   : > { %v2772_v17 = vpack.c.bf16 %v2768_v33, %v2767_v15 }
0x1460   : > { %2782 = vmatpush.bf16.msra.mxu3 %v2772_v17 }
0x1464   : > { %2783 = vmatpush.bf16.msra.mxu3 %v2771_v35 }
0x1467   : > { %3107 = vmatmul.msk.bf16.vlgmr.msra.gmra.mxu3 %vm761_vm1, %v2770_v7 }
0x14ea   : > { %v2785_v56 = vpop.f32.mrf.mxu3 }
0x14eb   : > { %v2793_v61 = vpack.c.bf16 %v2785_v56, %v2785_v56 }
0x14ed   : > { %3116 = vmatmul.msk.bf16.vlgmr.msra.gmra.mxu0 %vm761_vm1, %v2793_v61 }
0x14f2   : > { %v2787_v41 = vpop.f32.mrf.mxu3 }
0x156a   : > { %v2822_v8 = vpop.f32.mrf.mxu0 }
0x156b   : > { %v2823_v34 = vadd.f32 %v3175_v10, %v2822_v8 }
0x156d   : > { %v2826_v52 = vmax.f32 %v2823_v34, 0.0 }
0x156f   : > { %2827 = vst [vmem:[%s551_s30] sm:$0xf] %v2826_v52 }
0x1572   : > { %v2824_v39 = vpop.f32.mrf.mxu0 }
0x1573 PF: > { %s27_s24 = sadd.s32 1, %s3356_s24  }
0x1574   : > { %p24_p5 = scmp.ge.s32.totalorder %s27_s24, 4  }
0x1576   :  { %26 = sbr.rel (!%p24_p5) target bundleno = 3 (0x3), region = 125 }

</bundles_post_ra>
